<compile_context>
chip_gen: v7x
topology: tpu7x:2x2x1
jax: 0.10.0
libtpu: 0.0.40
codegen_flags: <defaults>
</compile_context>

<pallas_src>
import jax
import jax.numpy as jnp
import numpy as np
from jax.experimental import pallas as pl
from jax.experimental.pallas import tpu as pltpu

LANES = 128


def cayley_kernel_small(x_ref, o_ref):
    """In-vreg path (n <= 16). x_ref / o_ref: (n, n, bb), batch on lanes."""
    n, _, bb = x_ref.shape
    f32 = jnp.float32

    # (n, 1) iota over the matrix-column (sublane) dim; broadcasts over lanes.
    col_ids = jax.lax.broadcasted_iota(jnp.int32, (n, 1), 0)
    eye_rows = [(col_ids == i).astype(f32) for i in range(n)]  # hoisted

    # Process the block 128 lanes at a time so the whole chunk fits in vregs.
    for c in range(bb // LANES):
        lo = c * LANES

        # Load once: A = I - X for this chunk (n*n*128 f32 == 32 vregs at n=16).
        rows = [eye_rows[i] - x_ref[i, :, lo:lo + LANES].astype(f32)
                for i in range(n)]

        # In-place Gauss-Jordan inversion, fully unrolled (n small & static).
        for k in range(n):
            pivot_row = rows[k]                       # (n, LANES)
            pivot = pivot_row[k:k + 1, :]             # (1, LANES)
            inv_p = 1.0 / pivot                       # exact: feeds every step
            row_norm = pivot_row * inv_p
            mask_k = col_ids == k
            # Hoisted column-k fix-up: at column k,
            #   row_i - m*(1 + inv_p) = m - m - m*inv_p = -m*inv_p.
            row_norm_mod = jnp.where(mask_k, 1.0 + inv_p, row_norm)
            for i in range(n):
                if i == k:
                    continue
                m = rows[i][k:k + 1, :]               # (1, LANES) multiplier
                rows[i] = rows[i] - m * row_norm_mod
            rows[k] = jnp.where(mask_k, inv_p, row_norm)

        # Store once per row: Y = 2 * A^{-1} - I (lane-dense 128-wide stores).
        for i in range(n):
            o_ref[i, :, lo:lo + LANES] = (
                2.0 * rows[i] - eye_rows[i]).astype(o_ref.dtype)


def cayley_kernel_large(x_ref, o_ref, a_sc):
    """Scratch-ref path (n > 16): keeps vreg pressure bounded via VMEM rows."""
    n = x_ref.shape[0]
    f32 = jnp.float32
    col_ids = jax.lax.broadcasted_iota(jnp.int32, (n, 1), 0)

    for i in range(n):
        e_i = (col_ids == i).astype(f32)
        a_sc[i] = e_i - x_ref[i].astype(f32)

    # TODO(synk): for n >~ 64 replace this scalar-pivot elimination with an MXU
    # formulation (blocked LU panels / Newton-Schulz); the VPU path is only the
    # right regime for small n.
    for k in range(n):
        pivot_row = a_sc[k]
        pivot = pivot_row[k:k + 1, :]
        inv_p = 1.0 / pivot
        row_norm = pivot_row * inv_p
        mask_k = col_ids == k
        row_norm_mod = jnp.where(mask_k, 1.0 + inv_p, row_norm)
        for i in range(n):
            if i == k:
                continue
            row_i = a_sc[i]
            m = row_i[k:k + 1, :]
            a_sc[i] = row_i - m * row_norm_mod
        a_sc[k] = jnp.where(mask_k, inv_p, row_norm)

    for i in range(n):
        e_i = (col_ids == i).astype(f32)
        o_ref[i] = (2.0 * a_sc[i] - e_i).astype(o_ref.dtype)


def cayley_map(x, *, batch_block=512, lane_major=False):
    """Cayley map Y = (I - X)^{-1} (I + X).

    x: (n, n), (B, n, n), or -- with lane_major=True -- (n, n, B) (no wrapper
    transposes).  Precondition: unpivoted elimination; intended for the
    skew-symmetric parametrization case where diag(I - X) ~ 1.
    """
    squeeze = False
    if lane_major:
        n, n2, B = x.shape
    else:
        if x.ndim == 2:
            x = x[None]
            squeeze = True
        B, n, n2 = x.shape
    assert n == n2, "CayleyMap expects square matrices"

    # Pad batch to a multiple of 128 lanes (padded A = I stays invertible);
    # skipped entirely when B is already lane-aligned.
    Bp = ((B + LANES - 1) // LANES) * LANES
    if lane_major:
        xt = x if Bp == B else jnp.pad(x, ((0, 0), (0, 0), (0, Bp - B)))
    else:
        if Bp != B:
            x = jnp.concatenate([x, jnp.zeros((Bp - B, n, n), x.dtype)], axis=0)
        # Layout plumbing only; allow_input_fusion lets XLA fuse it into the
        # pallas_call input.
        xt = jnp.transpose(x, (1, 2, 0))              # (n, n, Bp)

    # Batch block: as large as possible (amortize ~0.35 us/step), but keep at
    # least 2 grid steps when Bp allows so v7x's two TensorCores both get work.
    bb = max(LANES, (min(batch_block, Bp) // LANES) * LANES)
    if Bp // bb < 2 and Bp >= 2 * LANES:
        bb = (Bp // 2 // LANES) * LANES
    while Bp % bb:
        bb -= LANES
    grid = (Bp // bb,)

    small = n <= 16                      # whole (n, n, 128) chunk <= 32 vregs
    kernel = cayley_kernel_small if small else cayley_kernel_large
    scratch = [] if small else [pltpu.VMEM((n, n, bb), jnp.float32)]

    # Scoped-VMEM budget: double-buffered in + out blocks (+ f32 scratch),
    # clamped to v7x's 64 MiB physical VMEM; also covers v5e's 16 MiB default.
    blk = n * n * bb * x.dtype.itemsize
    need = 4 * blk + (0 if small else n * n * bb * 4)
    vmem_limit = int(min(max(2 * need, 16 * 1024 * 1024), 64 * 1024 * 1024))

    yt = pl.pallas_call(
        kernel,
        out_shape=jax.ShapeDtypeStruct((n, n, Bp), x.dtype),
        grid_spec=pltpu.PrefetchScalarGridSpec(
            num_scalar_prefetch=0,
            grid=grid,
            in_specs=[pl.BlockSpec((n, n, bb), lambda g: (0, 0, g))],
            out_specs=pl.BlockSpec((n, n, bb), lambda g: (0, 0, g)),
            scratch_shapes=scratch,
        ),
        compiler_params=pltpu.CompilerParams(
            dimension_semantics=("parallel",),
            allow_input_fusion=[True],
            vmem_limit_bytes=vmem_limit),
    )(xt)

    if lane_major:
        return yt if Bp == B else yt[:, :, :B]
    y = jnp.transpose(yt, (2, 0, 1))[:B]
    return y[0] if squeeze else y


if __name__ == "__main__":
    key = jax.random.PRNGKey(0)
    k_batch, k_single = jax.random.split(key)

    # Batched case: 256 independent 16x16 Cayley maps (grid of 2 x 128-lane blocks).
    B, n = 256, 16
    r = jax.random.uniform(k_batch, (B, n, n), dtype=jnp.float32)
    X = 0.1 * (r - jnp.transpose(r, (0, 2, 1)))        # skew-symmetric, small norm
    y = cayley_map(X)
    jax.block_until_ready(y)

    I = jnp.eye(n, dtype=jnp.float32)
    y_ref = jnp.linalg.solve(I - X, I + X)
    np.testing.assert_allclose(np.asarray(y), np.asarray(y_ref), rtol=1e-4, atol=1e-5)

    # Lane-major end-to-end layout (no wrapper transposes / padding at all).
    Xt = jnp.transpose(X, (1, 2, 0))                   # (n, n, B), caller-owned layout
    y_lm = cayley_map(Xt, lane_major=True)
    jax.block_until_ready(y_lm)
    np.testing.assert_allclose(np.asarray(jnp.transpose(y_lm, (2, 0, 1))),
                               np.asarray(y_ref), rtol=1e-4, atol=1e-5)

    # Single-matrix case matching the PyTorch spec (nn.Linear(3, 3) weight).
    r3 = jax.random.uniform(k_single, (3, 3), dtype=jnp.float32)
    X3 = 0.1 * (r3 - r3.T)
    y3 = cayley_map(X3)
    jax.block_until_ready(y3)
    I3 = jnp.eye(3, dtype=jnp.float32)
    y3_ref = jnp.linalg.solve(I3 - X3, I3 + X3)
    np.testing.assert_allclose(np.asarray(y3), np.asarray(y3_ref), rtol=1e-4, atol=1e-5)

    print("KERNEL_OK")
</pallas_src>

<mosaic_0001>
module attributes {stable_mosaic.version = 11 : i64} {
  func.func @cayley_kernel_small(%arg0: i32, %arg1: memref<16x16x128xf32, #tpu.memory_space<vmem>>, %arg2: memref<16x16x128xf32, #tpu.memory_space<vmem>>) attributes {dimension_semantics = [#tpu.dimension_semantics<parallel>], iteration_bounds = array<i64: 2>, scalar_prefetch = 0 : i64, scratch_operands = 0 : i64, tpu.core_type = #tpu.core_type<tc>, window_params = [{transform_indices = @transform_0, window_bounds = array<i64: 16, 16, 128>}, {transform_indices = @transform_1, window_bounds = array<i64: 16, 16, 128>}]} {
    %0 = tpu.iota {dimensions = array<i32: 0>} : vector<16x1xi32>
    %c0_i32 = arith.constant 0 : i32
    %1 = vector.broadcast %c0_i32 : i32 to vector<16x1xi32>
    %2 = arith.cmpi eq, %0, %1 : vector<16x1xi32>
    %3 = arith.extui %2 : vector<16x1xi1> to vector<16x1xi32>
    %4 = arith.sitofp %3 : vector<16x1xi32> to vector<16x1xf32>
    %c1_i32 = arith.constant 1 : i32
    %5 = vector.broadcast %c1_i32 : i32 to vector<16x1xi32>
    %6 = arith.cmpi eq, %0, %5 : vector<16x1xi32>
    %7 = arith.extui %6 : vector<16x1xi1> to vector<16x1xi32>
    %8 = arith.sitofp %7 : vector<16x1xi32> to vector<16x1xf32>
    %c2_i32 = arith.constant 2 : i32
    %9 = vector.broadcast %c2_i32 : i32 to vector<16x1xi32>
    %10 = arith.cmpi eq, %0, %9 : vector<16x1xi32>
    %11 = arith.extui %10 : vector<16x1xi1> to vector<16x1xi32>
    %12 = arith.sitofp %11 : vector<16x1xi32> to vector<16x1xf32>
    %c3_i32 = arith.constant 3 : i32
    %13 = vector.broadcast %c3_i32 : i32 to vector<16x1xi32>
    %14 = arith.cmpi eq, %0, %13 : vector<16x1xi32>
    %15 = arith.extui %14 : vector<16x1xi1> to vector<16x1xi32>
    %16 = arith.sitofp %15 : vector<16x1xi32> to vector<16x1xf32>
    %c4_i32 = arith.constant 4 : i32
    %17 = vector.broadcast %c4_i32 : i32 to vector<16x1xi32>
    %18 = arith.cmpi eq, %0, %17 : vector<16x1xi32>
    %19 = arith.extui %18 : vector<16x1xi1> to vector<16x1xi32>
    %20 = arith.sitofp %19 : vector<16x1xi32> to vector<16x1xf32>
    %c5_i32 = arith.constant 5 : i32
    %21 = vector.broadcast %c5_i32 : i32 to vector<16x1xi32>
    %22 = arith.cmpi eq, %0, %21 : vector<16x1xi32>
    %23 = arith.extui %22 : vector<16x1xi1> to vector<16x1xi32>
    %24 = arith.sitofp %23 : vector<16x1xi32> to vector<16x1xf32>
    %c6_i32 = arith.constant 6 : i32
    %25 = vector.broadcast %c6_i32 : i32 to vector<16x1xi32>
    %26 = arith.cmpi eq, %0, %25 : vector<16x1xi32>
    %27 = arith.extui %26 : vector<16x1xi1> to vector<16x1xi32>
    %28 = arith.sitofp %27 : vector<16x1xi32> to vector<16x1xf32>
    %c7_i32 = arith.constant 7 : i32
    %29 = vector.broadcast %c7_i32 : i32 to vector<16x1xi32>
    %30 = arith.cmpi eq, %0, %29 : vector<16x1xi32>
    %31 = arith.extui %30 : vector<16x1xi1> to vector<16x1xi32>
    %32 = arith.sitofp %31 : vector<16x1xi32> to vector<16x1xf32>
    %c8_i32 = arith.constant 8 : i32
    %33 = vector.broadcast %c8_i32 : i32 to vector<16x1xi32>
    %34 = arith.cmpi eq, %0, %33 : vector<16x1xi32>
    %35 = arith.extui %34 : vector<16x1xi1> to vector<16x1xi32>
    %36 = arith.sitofp %35 : vector<16x1xi32> to vector<16x1xf32>
    %c9_i32 = arith.constant 9 : i32
    %37 = vector.broadcast %c9_i32 : i32 to vector<16x1xi32>
    %38 = arith.cmpi eq, %0, %37 : vector<16x1xi32>
    %39 = arith.extui %38 : vector<16x1xi1> to vector<16x1xi32>
    %40 = arith.sitofp %39 : vector<16x1xi32> to vector<16x1xf32>
    %c10_i32 = arith.constant 10 : i32
    %41 = vector.broadcast %c10_i32 : i32 to vector<16x1xi32>
    %42 = arith.cmpi eq, %0, %41 : vector<16x1xi32>
    %43 = arith.extui %42 : vector<16x1xi1> to vector<16x1xi32>
    %44 = arith.sitofp %43 : vector<16x1xi32> to vector<16x1xf32>
    %c11_i32 = arith.constant 11 : i32
    %45 = vector.broadcast %c11_i32 : i32 to vector<16x1xi32>
    %46 = arith.cmpi eq, %0, %45 : vector<16x1xi32>
    %47 = arith.extui %46 : vector<16x1xi1> to vector<16x1xi32>
    %48 = arith.sitofp %47 : vector<16x1xi32> to vector<16x1xf32>
    %c12_i32 = arith.constant 12 : i32
    %49 = vector.broadcast %c12_i32 : i32 to vector<16x1xi32>
    %50 = arith.cmpi eq, %0, %49 : vector<16x1xi32>
    %51 = arith.extui %50 : vector<16x1xi1> to vector<16x1xi32>
    %52 = arith.sitofp %51 : vector<16x1xi32> to vector<16x1xf32>
    %c13_i32 = arith.constant 13 : i32
    %53 = vector.broadcast %c13_i32 : i32 to vector<16x1xi32>
    %54 = arith.cmpi eq, %0, %53 : vector<16x1xi32>
    %55 = arith.extui %54 : vector<16x1xi1> to vector<16x1xi32>
    %56 = arith.sitofp %55 : vector<16x1xi32> to vector<16x1xf32>
    %c14_i32 = arith.constant 14 : i32
    %57 = vector.broadcast %c14_i32 : i32 to vector<16x1xi32>
    %58 = arith.cmpi eq, %0, %57 : vector<16x1xi32>
    %59 = arith.extui %58 : vector<16x1xi1> to vector<16x1xi32>
    %60 = arith.sitofp %59 : vector<16x1xi32> to vector<16x1xf32>
    %c15_i32 = arith.constant 15 : i32
    %61 = vector.broadcast %c15_i32 : i32 to vector<16x1xi32>
    %62 = arith.cmpi eq, %0, %61 : vector<16x1xi32>
    %63 = arith.extui %62 : vector<16x1xi1> to vector<16x1xi32>
    %64 = arith.sitofp %63 : vector<16x1xi32> to vector<16x1xf32>
    %c0 = arith.constant 0 : index
    %c0_0 = arith.constant 0 : index
    %c0_1 = arith.constant 0 : index
    %65 = vector.load %arg1[%c0, %c0_0, %c0_1] : memref<16x16x128xf32, #tpu.memory_space<vmem>>, vector<1x16x128xf32>
    %66 = vector.shape_cast %65 : vector<1x16x128xf32> to vector<16x128xf32>
    %67 = vector.broadcast %4 : vector<16x1xf32> to vector<16x128xf32>
    %68 = arith.subf %67, %66 : vector<16x128xf32>
    %c1 = arith.constant 1 : index
    %c0_2 = arith.constant 0 : index
    %c0_3 = arith.constant 0 : index
    %69 = vector.load %arg1[%c1, %c0_2, %c0_3] : memref<16x16x128xf32, #tpu.memory_space<vmem>>, vector<1x16x128xf32>
    %70 = vector.shape_cast %69 : vector<1x16x128xf32> to vector<16x128xf32>
    %71 = vector.broadcast %8 : vector<16x1xf32> to vector<16x128xf32>
    %72 = arith.subf %71, %70 : vector<16x128xf32>
    %c2 = arith.constant 2 : index
    %c0_4 = arith.constant 0 : index
    %c0_5 = arith.constant 0 : index
    %73 = vector.load %arg1[%c2, %c0_4, %c0_5] : memref<16x16x128xf32, #tpu.memory_space<vmem>>, vector<1x16x128xf32>
    %74 = vector.shape_cast %73 : vector<1x16x128xf32> to vector<16x128xf32>
    %75 = vector.broadcast %12 : vector<16x1xf32> to vector<16x128xf32>
    %76 = arith.subf %75, %74 : vector<16x128xf32>
    %c3 = arith.constant 3 : index
    %c0_6 = arith.constant 0 : index
    %c0_7 = arith.constant 0 : index
    %77 = vector.load %arg1[%c3, %c0_6, %c0_7] : memref<16x16x128xf32, #tpu.memory_space<vmem>>, vector<1x16x128xf32>
    %78 = vector.shape_cast %77 : vector<1x16x128xf32> to vector<16x128xf32>
    %79 = vector.broadcast %16 : vector<16x1xf32> to vector<16x128xf32>
    %80 = arith.subf %79, %78 : vector<16x128xf32>
    %c4 = arith.constant 4 : index
    %c0_8 = arith.constant 0 : index
    %c0_9 = arith.constant 0 : index
    %81 = vector.load %arg1[%c4, %c0_8, %c0_9] : memref<16x16x128xf32, #tpu.memory_space<vmem>>, vector<1x16x128xf32>
    %82 = vector.shape_cast %81 : vector<1x16x128xf32> to vector<16x128xf32>
    %83 = vector.broadcast %20 : vector<16x1xf32> to vector<16x128xf32>
    %84 = arith.subf %83, %82 : vector<16x128xf32>
    %c5 = arith.constant 5 : index
    %c0_10 = arith.constant 0 : index
    %c0_11 = arith.constant 0 : index
    %85 = vector.load %arg1[%c5, %c0_10, %c0_11] : memref<16x16x128xf32, #tpu.memory_space<vmem>>, vector<1x16x128xf32>
    %86 = vector.shape_cast %85 : vector<1x16x128xf32> to vector<16x128xf32>
    %87 = vector.broadcast %24 : vector<16x1xf32> to vector<16x128xf32>
    %88 = arith.subf %87, %86 : vector<16x128xf32>
    %c6 = arith.constant 6 : index
    %c0_12 = arith.constant 0 : index
    %c0_13 = arith.constant 0 : index
    %89 = vector.load %arg1[%c6, %c0_12, %c0_13] : memref<16x16x128xf32, #tpu.memory_space<vmem>>, vector<1x16x128xf32>
    %90 = vector.shape_cast %89 : vector<1x16x128xf32> to vector<16x128xf32>
    %91 = vector.broadcast %28 : vector<16x1xf32> to vector<16x128xf32>
    %92 = arith.subf %91, %90 : vector<16x128xf32>
    %c7 = arith.constant 7 : index
    %c0_14 = arith.constant 0 : index
    %c0_15 = arith.constant 0 : index
    %93 = vector.load %arg1[%c7, %c0_14, %c0_15] : memref<16x16x128xf32, #tpu.memory_space<vmem>>, vector<1x16x128xf32>
    %94 = vector.shape_cast %93 : vector<1x16x128xf32> to vector<16x128xf32>
    %95 = vector.broadcast %32 : vector<16x1xf32> to vector<16x128xf32>
    %96 = arith.subf %95, %94 : vector<16x128xf32>
    %c8 = arith.constant 8 : index
    %c0_16 = arith.constant 0 : index
    %c0_17 = arith.constant 0 : index
    %97 = vector.load %arg1[%c8, %c0_16, %c0_17] : memref<16x16x128xf32, #tpu.memory_space<vmem>>, vector<1x16x128xf32>
    %98 = vector.shape_cast %97 : vector<1x16x128xf32> to vector<16x128xf32>
    %99 = vector.broadcast %36 : vector<16x1xf32> to vector<16x128xf32>
    %100 = arith.subf %99, %98 : vector<16x128xf32>
    %c9 = arith.constant 9 : index
    %c0_18 = arith.constant 0 : index
    %c0_19 = arith.constant 0 : index
    %101 = vector.load %arg1[%c9, %c0_18, %c0_19] : memref<16x16x128xf32, #tpu.memory_space<vmem>>, vector<1x16x128xf32>
    %102 = vector.shape_cast %101 : vector<1x16x128xf32> to vector<16x128xf32>
    %103 = vector.broadcast %40 : vector<16x1xf32> to vector<16x128xf32>
    %104 = arith.subf %103, %102 : vector<16x128xf32>
    %c10 = arith.constant 10 : index
    %c0_20 = arith.constant 0 : index
    %c0_21 = arith.constant 0 : index
    %105 = vector.load %arg1[%c10, %c0_20, %c0_21] : memref<16x16x128xf32, #tpu.memory_space<vmem>>, vector<1x16x128xf32>
    %106 = vector.shape_cast %105 : vector<1x16x128xf32> to vector<16x128xf32>
    %107 = vector.broadcast %44 : vector<16x1xf32> to vector<16x128xf32>
    %108 = arith.subf %107, %106 : vector<16x128xf32>
    %c11 = arith.constant 11 : index
    %c0_22 = arith.constant 0 : index
    %c0_23 = arith.constant 0 : index
    %109 = vector.load %arg1[%c11, %c0_22, %c0_23] : memref<16x16x128xf32, #tpu.memory_space<vmem>>, vector<1x16x128xf32>
    %110 = vector.shape_cast %109 : vector<1x16x128xf32> to vector<16x128xf32>
    %111 = vector.broadcast %48 : vector<16x1xf32> to vector<16x128xf32>
    %112 = arith.subf %111, %110 : vector<16x128xf32>
    %c12 = arith.constant 12 : index
    %c0_24 = arith.constant 0 : index
    %c0_25 = arith.constant 0 : index
    %113 = vector.load %arg1[%c12, %c0_24, %c0_25] : memref<16x16x128xf32, #tpu.memory_space<vmem>>, vector<1x16x128xf32>
    %114 = vector.shape_cast %113 : vector<1x16x128xf32> to vector<16x128xf32>
    %115 = vector.broadcast %52 : vector<16x1xf32> to vector<16x128xf32>
    %116 = arith.subf %115, %114 : vector<16x128xf32>
    %c13 = arith.constant 13 : index
    %c0_26 = arith.constant 0 : index
    %c0_27 = arith.constant 0 : index
    %117 = vector.load %arg1[%c13, %c0_26, %c0_27] : memref<16x16x128xf32, #tpu.memory_space<vmem>>, vector<1x16x128xf32>
    %118 = vector.shape_cast %117 : vector<1x16x128xf32> to vector<16x128xf32>
    %119 = vector.broadcast %56 : vector<16x1xf32> to vector<16x128xf32>
    %120 = arith.subf %119, %118 : vector<16x128xf32>
    %c14 = arith.constant 14 : index
    %c0_28 = arith.constant 0 : index
    %c0_29 = arith.constant 0 : index
    %121 = vector.load %arg1[%c14, %c0_28, %c0_29] : memref<16x16x128xf32, #tpu.memory_space<vmem>>, vector<1x16x128xf32>
    %122 = vector.shape_cast %121 : vector<1x16x128xf32> to vector<16x128xf32>
    %123 = vector.broadcast %60 : vector<16x1xf32> to vector<16x128xf32>
    %124 = arith.subf %123, %122 : vector<16x128xf32>
    %c15 = arith.constant 15 : index
    %c0_30 = arith.constant 0 : index
    %c0_31 = arith.constant 0 : index
    %125 = vector.load %arg1[%c15, %c0_30, %c0_31] : memref<16x16x128xf32, #tpu.memory_space<vmem>>, vector<1x16x128xf32>
    %126 = vector.shape_cast %125 : vector<1x16x128xf32> to vector<16x128xf32>
    %127 = vector.broadcast %64 : vector<16x1xf32> to vector<16x128xf32>
    %128 = arith.subf %127, %126 : vector<16x128xf32>
    %129 = vector.extract_strided_slice %68 {offsets = [0, 0], sizes = [1, 128], strides = [1, 1]} : vector<16x128xf32> to vector<1x128xf32>
    %cst = arith.constant 1.000000e+00 : f32
    %130 = vector.broadcast %cst : f32 to vector<1x128xf32>
    %131 = arith.divf %130, %129 : vector<1x128xf32>
    %132 = vector.broadcast %131 : vector<1x128xf32> to vector<16x128xf32>
    %133 = arith.mulf %68, %132 : vector<16x128xf32>
    %c0_i32_32 = arith.constant 0 : i32
    %134 = vector.broadcast %c0_i32_32 : i32 to vector<16x1xi32>
    %135 = arith.cmpi eq, %0, %134 : vector<16x1xi32>
    %cst_33 = arith.constant 1.000000e+00 : f32
    %136 = vector.broadcast %cst_33 : f32 to vector<1x128xf32>
    %137 = arith.addf %136, %131 : vector<1x128xf32>
    %138 = vector.shape_cast %135 : vector<16x1xi1> to vector<16x1xi1>
    %139 = vector.broadcast %138 : vector<16x1xi1> to vector<16x128xi1>
    %140 = vector.shape_cast %137 : vector<1x128xf32> to vector<1x128xf32>
    %141 = vector.broadcast %140 : vector<1x128xf32> to vector<16x128xf32>
    %142 = arith.select %139, %141, %133 : vector<16x128xi1>, vector<16x128xf32>
    %143 = vector.extract_strided_slice %72 {offsets = [0, 0], sizes = [1, 128], strides = [1, 1]} : vector<16x128xf32> to vector<1x128xf32>
    %144 = vector.broadcast %143 : vector<1x128xf32> to vector<16x128xf32>
    %145 = arith.mulf %144, %142 : vector<16x128xf32>
    %146 = arith.subf %72, %145 : vector<16x128xf32>
    %147 = vector.extract_strided_slice %76 {offsets = [0, 0], sizes = [1, 128], strides = [1, 1]} : vector<16x128xf32> to vector<1x128xf32>
    %148 = vector.broadcast %147 : vector<1x128xf32> to vector<16x128xf32>
    %149 = arith.mulf %148, %142 : vector<16x128xf32>
    %150 = arith.subf %76, %149 : vector<16x128xf32>
    %151 = vector.extract_strided_slice %80 {offsets = [0, 0], sizes = [1, 128], strides = [1, 1]} : vector<16x128xf32> to vector<1x128xf32>
    %152 = vector.broadcast %151 : vector<1x128xf32> to vector<16x128xf32>
    %153 = arith.mulf %152, %142 : vector<16x128xf32>
    %154 = arith.subf %80, %153 : vector<16x128xf32>
    %155 = vector.extract_strided_slice %84 {offsets = [0, 0], sizes = [1, 128], strides = [1, 1]} : vector<16x128xf32> to vector<1x128xf32>
    %156 = vector.broadcast %155 : vector<1x128xf32> to vector<16x128xf32>
    %157 = arith.mulf %156, %142 : vector<16x128xf32>
    %158 = arith.subf %84, %157 : vector<16x128xf32>
    %159 = vector.extract_strided_slice %88 {offsets = [0, 0], sizes = [1, 128], strides = [1, 1]} : vector<16x128xf32> to vector<1x128xf32>
    %160 = vector.broadcast %159 : vector<1x128xf32> to vector<16x128xf32>
    %161 = arith.mulf %160, %142 : vector<16x128xf32>
    %162 = arith.subf %88, %161 : vector<16x128xf32>
    %163 = vector.extract_strided_slice %92 {offsets = [0, 0], sizes = [1, 128], strides = [1, 1]} : vector<16x128xf32> to vector<1x128xf32>
    %164 = vector.broadcast %163 : vector<1x128xf32> to vector<16x128xf32>
    %165 = arith.mulf %164, %142 : vector<16x128xf32>
    %166 = arith.subf %92, %165 : vector<16x128xf32>
    %167 = vector.extract_strided_slice %96 {offsets = [0, 0], sizes = [1, 128], strides = [1, 1]} : vector<16x128xf32> to vector<1x128xf32>
    %168 = vector.broadcast %167 : vector<1x128xf32> to vector<16x128xf32>
    %169 = arith.mulf %168, %142 : vector<16x128xf32>
    %170 = arith.subf %96, %169 : vector<16x128xf32>
    %171 = vector.extract_strided_slice %100 {offsets = [0, 0], sizes = [1, 128], strides = [1, 1]} : vector<16x128xf32> to vector<1x128xf32>
    %172 = vector.broadcast %171 : vector<1x128xf32> to vector<16x128xf32>
    %173 = arith.mulf %172, %142 : vector<16x128xf32>
    %174 = arith.subf %100, %173 : vector<16x128xf32>
    %175 = vector.extract_strided_slice %104 {offsets = [0, 0], sizes = [1, 128], strides = [1, 1]} : vector<16x128xf32> to vector<1x128xf32>
    %176 = vector.broadcast %175 : vector<1x128xf32> to vector<16x128xf32>
    %177 = arith.mulf %176, %142 : vector<16x128xf32>
    %178 = arith.subf %104, %177 : vector<16x128xf32>
    %179 = vector.extract_strided_slice %108 {offsets = [0, 0], sizes = [1, 128], strides = [1, 1]} : vector<16x128xf32> to vector<1x128xf32>
    %180 = vector.broadcast %179 : vector<1x128xf32> to vector<16x128xf32>
    %181 = arith.mulf %180, %142 : vector<16x128xf32>
    %182 = arith.subf %108, %181 : vector<16x128xf32>
    %183 = vector.extract_strided_slice %112 {offsets = [0, 0], sizes = [1, 128], strides = [1, 1]} : vector<16x128xf32> to vector<1x128xf32>
    %184 = vector.broadcast %183 : vector<1x128xf32> to vector<16x128xf32>
    %185 = arith.mulf %184, %142 : vector<16x128xf32>
    %186 = arith.subf %112, %185 : vector<16x128xf32>
    %187 = vector.extract_strided_slice %116 {offsets = [0, 0], sizes = [1, 128], strides = [1, 1]} : vector<16x128xf32> to vector<1x128xf32>
    %188 = vector.broadcast %187 : vector<1x128xf32> to vector<16x128xf32>
    %189 = arith.mulf %188, %142 : vector<16x128xf32>
    %190 = arith.subf %116, %189 : vector<16x128xf32>
    %191 = vector.extract_strided_slice %120 {offsets = [0, 0], sizes = [1, 128], strides = [1, 1]} : vector<16x128xf32> to vector<1x128xf32>
    %192 = vector.broadcast %191 : vector<1x128xf32> to vector<16x128xf32>
    %193 = arith.mulf %192, %142 : vector<16x128xf32>
    %194 = arith.subf %120, %193 : vector<16x128xf32>
    %195 = vector.extract_strided_slice %124 {offsets = [0, 0], sizes = [1, 128], strides = [1, 1]} : vector<16x128xf32> to vector<1x128xf32>
    %196 = vector.broadcast %195 : vector<1x128xf32> to vector<16x128xf32>
    %197 = arith.mulf %196, %142 : vector<16x128xf32>
    %198 = arith.subf %124, %197 : vector<16x128xf32>
    %199 = vector.extract_strided_slice %128 {offsets = [0, 0], sizes = [1, 128], strides = [1, 1]} : vector<16x128xf32> to vector<1x128xf32>
    %200 = vector.broadcast %199 : vector<1x128xf32> to vector<16x128xf32>
    %201 = arith.mulf %200, %142 : vector<16x128xf32>
    %202 = arith.subf %128, %201 : vector<16x128xf32>
    %203 = vector.shape_cast %135 : vector<16x1xi1> to vector<16x1xi1>
    %204 = vector.broadcast %203 : vector<16x1xi1> to vector<16x128xi1>
    %205 = vector.shape_cast %131 : vector<1x128xf32> to vector<1x128xf32>
    %206 = vector.broadcast %205 : vector<1x128xf32> to vector<16x128xf32>
    %207 = arith.select %204, %206, %133 : vector<16x128xi1>, vector<16x128xf32>
    %208 = vector.extract_strided_slice %146 {offsets = [1, 0], sizes = [1, 128], strides = [1, 1]} : vector<16x128xf32> to vector<1x128xf32>
    %cst_34 = arith.constant 1.000000e+00 : f32
    %209 = vector.broadcast %cst_34 : f32 to vector<1x128xf32>
    %210 = arith.divf %209, %208 : vector<1x128xf32>
    %211 = vector.broadcast %210 : vector<1x128xf32> to vector<16x128xf32>
    %212 = arith.mulf %146, %211 : vector<16x128xf32>
    %c1_i32_35 = arith.constant 1 : i32
    %213 = vector.broadcast %c1_i32_35 : i32 to vector<16x1xi32>
    %214 = arith.cmpi eq, %0, %213 : vector<16x1xi32>
    %cst_36 = arith.constant 1.000000e+00 : f32
    %215 = vector.broadcast %cst_36 : f32 to vector<1x128xf32>
    %216 = arith.addf %215, %210 : vector<1x128xf32>
    %217 = vector.shape_cast %214 : vector<16x1xi1> to vector<16x1xi1>
    %218 = vector.broadcast %217 : vector<16x1xi1> to vector<16x128xi1>
    %219 = vector.shape_cast %216 : vector<1x128xf32> to vector<1x128xf32>
    %220 = vector.broadcast %219 : vector<1x128xf32> to vector<16x128xf32>
    %221 = arith.select %218, %220, %212 : vector<16x128xi1>, vector<16x128xf32>
    %222 = vector.extract_strided_slice %207 {offsets = [1, 0], sizes = [1, 128], strides = [1, 1]} : vector<16x128xf32> to vector<1x128xf32>
    %223 = vector.broadcast %222 : vector<1x128xf32> to vector<16x128xf32>
    %224 = arith.mulf %223, %221 : vector<16x128xf32>
    %225 = arith.subf %207, %224 : vector<16x128xf32>
    %226 = vector.extract_strided_slice %150 {offsets = [1, 0], sizes = [1, 128], strides = [1, 1]} : vector<16x128xf32> to vector<1x128xf32>
    %227 = vector.broadcast %226 : vector<1x128xf32> to vector<16x128xf32>
    %228 = arith.mulf %227, %221 : vector<16x128xf32>
    %229 = arith.subf %150, %228 : vector<16x128xf32>
    %230 = vector.extract_strided_slice %154 {offsets = [1, 0], sizes = [1, 128], strides = [1, 1]} : vector<16x128xf32> to vector<1x128xf32>
    %231 = vector.broadcast %230 : vector<1x128xf32> to vector<16x128xf32>
    %232 = arith.mulf %231, %221 : vector<16x128xf32>
    %233 = arith.subf %154, %232 : vector<16x128xf32>
    %234 = vector.extract_strided_slice %158 {offsets = [1, 0], sizes = [1, 128], strides = [1, 1]} : vector<16x128xf32> to vector<1x128xf32>
    %235 = vector.broadcast %234 : vector<1x128xf32> to vector<16x128xf32>
    %236 = arith.mulf %235, %221 : vector<16x128xf32>
    %237 = arith.subf %158, %236 : vector<16x128xf32>
    %238 = vector.extract_strided_slice %162 {offsets = [1, 0], sizes = [1, 128], strides = [1, 1]} : vector<16x128xf32> to vector<1x128xf32>
    %239 = vector.broadcast %238 : vector<1x128xf32> to vector<16x128xf32>
    %240 = arith.mulf %239, %221 : vector<16x128xf32>
    %241 = arith.subf %162, %240 : vector<16x128xf32>
    %242 = vector.extract_strided_slice %166 {offsets = [1, 0], sizes = [1, 128], strides = [1, 1]} : vector<16x128xf32> to vector<1x128xf32>
    %243 = vector.broadcast %242 : vector<1x128xf32> to vector<16x128xf32>
    %244 = arith.mulf %243, %221 : vector<16x128xf32>
    %245 = arith.subf %166, %244 : vector<16x128xf32>
    %246 = vector.extract_strided_slice %170 {offsets = [1, 0], sizes = [1, 128], strides = [1, 1]} : vector<16x128xf32> to vector<1x128xf32>
    %247 = vector.broadcast %246 : vector<1x128xf32> to vector<16x128xf32>
    %248 = arith.mulf %247, %221 : vector<16x128xf32>
    %249 = arith.subf %170, %248 : vector<16x128xf32>
    %250 = vector.extract_strided_slice %174 {offsets = [1, 0], sizes = [1, 128], strides = [1, 1]} : vector<16x128xf32> to vector<1x128xf32>
    %251 = vector.broadcast %250 : vector<1x128xf32> to vector<16x128xf32>
    %252 = arith.mulf %251, %221 : vector<16x128xf32>
    %253 = arith.subf %174, %252 : vector<16x128xf32>
    %254 = vector.extract_strided_slice %178 {offsets = [1, 0], sizes = [1, 128], strides = [1, 1]} : vector<16x128xf32> to vector<1x128xf32>
    %255 = vector.broadcast %254 : vector<1x128xf32> to vector<16x128xf32>
    %256 = arith.mulf %255, %221 : vector<16x128xf32>
    %257 = arith.subf %178, %256 : vector<16x128xf32>
    %258 = vector.extract_strided_slice %182 {offsets = [1, 0], sizes = [1, 128], strides = [1, 1]} : vector<16x128xf32> to vector<1x128xf32>
    %259 = vector.broadcast %258 : vector<1x128xf32> to vector<16x128xf32>
    %260 = arith.mulf %259, %221 : vector<16x128xf32>
    %261 = arith.subf %182, %260 : vector<16x128xf32>
    %262 = vector.extract_strided_slice %186 {offsets = [1, 0], sizes = [1, 128], strides = [1, 1]} : vector<16x128xf32> to vector<1x128xf32>
    %263 = vector.broadcast %262 : vector<1x128xf32> to vector<16x128xf32>
    %264 = arith.mulf %263, %221 : vector<16x128xf32>
    %265 = arith.subf %186, %264 : vector<16x128xf32>
    %266 = vector.extract_strided_slice %190 {offsets = [1, 0], sizes = [1, 128], strides = [1, 1]} : vector<16x128xf32> to vector<1x128xf32>
    %267 = vector.broadcast %266 : vector<1x128xf32> to vector<16x128xf32>
    %268 = arith.mulf %267, %221 : vector<16x128xf32>
    %269 = arith.subf %190, %268 : vector<16x128xf32>
    %270 = vector.extract_strided_slice %194 {offsets = [1, 0], sizes = [1, 128], strides = [1, 1]} : vector<16x128xf32> to vector<1x128xf32>
    %271 = vector.broadcast %270 : vector<1x128xf32> to vector<16x128xf32>
    %272 = arith.mulf %271, %221 : vector<16x128xf32>
    %273 = arith.subf %194, %272 : vector<16x128xf32>
    %274 = vector.extract_strided_slice %198 {offsets = [1, 0], sizes = [1, 128], strides = [1, 1]} : vector<16x128xf32> to vector<1x128xf32>
    %275 = vector.broadcast %274 : vector<1x128xf32> to vector<16x128xf32>
    %276 = arith.mulf %275, %221 : vector<16x128xf32>
    %277 = arith.subf %198, %276 : vector<16x128xf32>
    %278 = vector.extract_strided_slice %202 {offsets = [1, 0], sizes = [1, 128], strides = [1, 1]} : vector<16x128xf32> to vector<1x128xf32>
    %279 = vector.broadcast %278 : vector<1x128xf32> to vector<16x128xf32>
    %280 = arith.mulf %279, %221 : vector<16x128xf32>
    %281 = arith.subf %202, %280 : vector<16x128xf32>
    %282 = vector.shape_cast %214 : vector<16x1xi1> to vector<16x1xi1>
    %283 = vector.broadcast %282 : vector<16x1xi1> to vector<16x128xi1>
    %284 = vector.shape_cast %210 : vector<1x128xf32> to vector<1x128xf32>
    %285 = vector.broadcast %284 : vector<1x128xf32> to vector<16x128xf32>
    %286 = arith.select %283, %285, %212 : vector<16x128xi1>, vector<16x128xf32>
    %287 = vector.extract_strided_slice %229 {offsets = [2, 0], sizes = [1, 128], strides = [1, 1]} : vector<16x128xf32> to vector<1x128xf32>
    %cst_37 = arith.constant 1.000000e+00 : f32
    %288 = vector.broadcast %cst_37 : f32 to vector<1x128xf32>
    %289 = arith.divf %288, %287 : vector<1x128xf32>
    %290 = vector.broadcast %289 : vector<1x128xf32> to vector<16x128xf32>
    %291 = arith.mulf %229, %290 : vector<16x128xf32>
    %c2_i32_38 = arith.constant 2 : i32
    %292 = vector.broadcast %c2_i32_38 : i32 to vector<16x1xi32>
    %293 = arith.cmpi eq, %0, %292 : vector<16x1xi32>
    %cst_39 = arith.constant 1.000000e+00 : f32
    %294 = vector.broadcast %cst_39 : f32 to vector<1x128xf32>
    %295 = arith.addf %294, %289 : vector<1x128xf32>
    %296 = vector.shape_cast %293 : vector<16x1xi1> to vector<16x1xi1>
    %297 = vector.broadcast %296 : vector<16x1xi1> to vector<16x128xi1>
    %298 = vector.shape_cast %295 : vector<1x128xf32> to vector<1x128xf32>
    %299 = vector.broadcast %298 : vector<1x128xf32> to vector<16x128xf32>
    %300 = arith.select %297, %299, %291 : vector<16x128xi1>, vector<16x128xf32>
    %301 = vector.extract_strided_slice %225 {offsets = [2, 0], sizes = [1, 128], strides = [1, 1]} : vector<16x128xf32> to vector<1x128xf32>
    %302 = vector.broadcast %301 : vector<1x128xf32> to vector<16x128xf32>
    %303 = arith.mulf %302, %300 : vector<16x128xf32>
    %304 = arith.subf %225, %303 : vector<16x128xf32>
    %305 = vector.extract_strided_slice %286 {offsets = [2, 0], sizes = [1, 128], strides = [1, 1]} : vector<16x128xf32> to vector<1x128xf32>
    %306 = vector.broadcast %305 : vector<1x128xf32> to vector<16x128xf32>
    %307 = arith.mulf %306, %300 : vector<16x128xf32>
    %308 = arith.subf %286, %307 : vector<16x128xf32>
    %309 = vector.extract_strided_slice %233 {offsets = [2, 0], sizes = [1, 128], strides = [1, 1]} : vector<16x128xf32> to vector<1x128xf32>
    %310 = vector.broadcast %309 : vector<1x128xf32> to vector<16x128xf32>
    %311 = arith.mulf %310, %300 : vector<16x128xf32>
    %312 = arith.subf %233, %311 : vector<16x128xf32>
    %313 = vector.extract_strided_slice %237 {offsets = [2, 0], sizes = [1, 128], strides = [1, 1]} : vector<16x128xf32> to vector<1x128xf32>
    %314 = vector.broadcast %313 : vector<1x128xf32> to vector<16x128xf32>
    %315 = arith.mulf %314, %300 : vector<16x128xf32>
    %316 = arith.subf %237, %315 : vector<16x128xf32>
    %317 = vector.extract_strided_slice %241 {offsets = [2, 0], sizes = [1, 128], strides = [1, 1]} : vector<16x128xf32> to vector<1x128xf32>
    %318 = vector.broadcast %317 : vector<1x128xf32> to vector<16x128xf32>
    %319 = arith.mulf %318, %300 : vector<16x128xf32>
    %320 = arith.subf %241, %319 : vector<16x128xf32>
    %321 = vector.extract_strided_slice %245 {offsets = [2, 0], sizes = [1, 128], strides = [1, 1]} : vector<16x128xf32> to vector<1x128xf32>
    %322 = vector.broadcast %321 : vector<1x128xf32> to vector<16x128xf32>
    %323 = arith.mulf %322, %300 : vector<16x128xf32>
    %324 = arith.subf %245, %323 : vector<16x128xf32>
    %325 = vector.extract_strided_slice %249 {offsets = [2, 0], sizes = [1, 128], strides = [1, 1]} : vector<16x128xf32> to vector<1x128xf32>
    %326 = vector.broadcast %325 : vector<1x128xf32> to vector<16x128xf32>
    %327 = arith.mulf %326, %300 : vector<16x128xf32>
    %328 = arith.subf %249, %327 : vector<16x128xf32>
    %329 = vector.extract_strided_slice %253 {offsets = [2, 0], sizes = [1, 128], strides = [1, 1]} : vector<16x128xf32> to vector<1x128xf32>
    %330 = vector.broadcast %329 : vector<1x128xf32> to vector<16x128xf32>
    %331 = arith.mulf %330, %300 : vector<16x128xf32>
    %332 = arith.subf %253, %331 : vector<16x128xf32>
    %333 = vector.extract_strided_slice %257 {offsets = [2, 0], sizes = [1, 128], strides = [1, 1]} : vector<16x128xf32> to vector<1x128xf32>
    %334 = vector.broadcast %333 : vector<1x128xf32> to vector<16x128xf32>
    %335 = arith.mulf %334, %300 : vector<16x128xf32>
    %336 = arith.subf %257, %335 : vector<16x128xf32>
    %337 = vector.extract_strided_slice %261 {offsets = [2, 0], sizes = [1, 128], strides = [1, 1]} : vector<16x128xf32> to vector<1x128xf32>
    %338 = vector.broadcast %337 : vector<1x128xf32> to vector<16x128xf32>
    %339 = arith.mulf %338, %300 : vector<16x128xf32>
    %340 = arith.subf %261, %339 : vector<16x128xf32>
    %341 = vector.extract_strided_slice %265 {offsets = [2, 0], sizes = [1, 128], strides = [1, 1]} : vector<16x128xf32> to vector<1x128xf32>
    %342 = vector.broadcast %341 : vector<1x128xf32> to vector<16x128xf32>
    %343 = arith.mulf %342, %300 : vector<16x128xf32>
    %344 = arith.subf %265, %343 : vector<16x128xf32>
    %345 = vector.extract_strided_slice %269 {offsets = [2, 0], sizes = [1, 128], strides = [1, 1]} : vector<16x128xf32> to vector<1x128xf32>
    %346 = vector.broadcast %345 : vector<1x128xf32> to vector<16x128xf32>
    %347 = arith.mulf %346, %300 : vector<16x128xf32>
    %348 = arith.subf %269, %347 : vector<16x128xf32>
    %349 = vector.extract_strided_slice %273 {offsets = [2, 0], sizes = [1, 128], strides = [1, 1]} : vector<16x128xf32> to vector<1x128xf32>
    %350 = vector.broadcast %349 : vector<1x128xf32> to vector<16x128xf32>
    %351 = arith.mulf %350, %300 : vector<16x128xf32>
    %352 = arith.subf %273, %351 : vector<16x128xf32>
    %353 = vector.extract_strided_slice %277 {offsets = [2, 0], sizes = [1, 128], strides = [1, 1]} : vector<16x128xf32> to vector<1x128xf32>
    %354 = vector.broadcast %353 : vector<1x128xf32> to vector<16x128xf32>
    %355 = arith.mulf %354, %300 : vector<16x128xf32>
    %356 = arith.subf %277, %355 : vector<16x128xf32>
    %357 = vector.extract_strided_slice %281 {offsets = [2, 0], sizes = [1, 128], strides = [1, 1]} : vector<16x128xf32> to vector<1x128xf32>
    %358 = vector.broadcast %357 : vector<1x128xf32> to vector<16x128xf32>
    %359 = arith.mulf %358, %300 : vector<16x128xf32>
    %360 = arith.subf %281, %359 : vector<16x128xf32>
    %361 = vector.shape_cast %293 : vector<16x1xi1> to vector<16x1xi1>
    %362 = vector.broadcast %361 : vector<16x1xi1> to vector<16x128xi1>
    %363 = vector.shape_cast %289 : vector<1x128xf32> to vector<1x128xf32>
    %364 = vector.broadcast %363 : vector<1x128xf32> to vector<16x128xf32>
    %365 = arith.select %362, %364, %291 : vector<16x128xi1>, vector<16x128xf32>
    %366 = vector.extract_strided_slice %312 {offsets = [3, 0], sizes = [1, 128], strides = [1, 1]} : vector<16x128xf32> to vector<1x128xf32>
    %cst_40 = arith.constant 1.000000e+00 : f32
    %367 = vector.broadcast %cst_40 : f32 to vector<1x128xf32>
    %368 = arith.divf %367, %366 : vector<1x128xf32>
    %369 = vector.broadcast %368 : vector<1x128xf32> to vector<16x128xf32>
    %370 = arith.mulf %312, %369 : vector<16x128xf32>
    %c3_i32_41 = arith.constant 3 : i32
    %371 = vector.broadcast %c3_i32_41 : i32 to vector<16x1xi32>
    %372 = arith.cmpi eq, %0, %371 : vector<16x1xi32>
    %cst_42 = arith.constant 1.000000e+00 : f32
    %373 = vector.broadcast %cst_42 : f32 to vector<1x128xf32>
    %374 = arith.addf %373, %368 : vector<1x128xf32>
    %375 = vector.shape_cast %372 : vector<16x1xi1> to vector<16x1xi1>
    %376 = vector.broadcast %375 : vector<16x1xi1> to vector<16x128xi1>
    %377 = vector.shape_cast %374 : vector<1x128xf32> to vector<1x128xf32>
    %378 = vector.broadcast %377 : vector<1x128xf32> to vector<16x128xf32>
    %379 = arith.select %376, %378, %370 : vector<16x128xi1>, vector<16x128xf32>
    %380 = vector.extract_strided_slice %304 {offsets = [3, 0], sizes = [1, 128], strides = [1, 1]} : vector<16x128xf32> to vector<1x128xf32>
    %381 = vector.broadcast %380 : vector<1x128xf32> to vector<16x128xf32>
    %382 = arith.mulf %381, %379 : vector<16x128xf32>
    %383 = arith.subf %304, %382 : vector<16x128xf32>
    %384 = vector.extract_strided_slice %308 {offsets = [3, 0], sizes = [1, 128], strides = [1, 1]} : vector<16x128xf32> to vector<1x128xf32>
    %385 = vector.broadcast %384 : vector<1x128xf32> to vector<16x128xf32>
    %386 = arith.mulf %385, %379 : vector<16x128xf32>
    %387 = arith.subf %308, %386 : vector<16x128xf32>
    %388 = vector.extract_strided_slice %365 {offsets = [3, 0], sizes = [1, 128], strides = [1, 1]} : vector<16x128xf32> to vector<1x128xf32>
    %389 = vector.broadcast %388 : vector<1x128xf32> to vector<16x128xf32>
    %390 = arith.mulf %389, %379 : vector<16x128xf32>
    %391 = arith.subf %365, %390 : vector<16x128xf32>
    %392 = vector.extract_strided_slice %316 {offsets = [3, 0], sizes = [1, 128], strides = [1, 1]} : vector<16x128xf32> to vector<1x128xf32>
    %393 = vector.broadcast %392 : vector<1x128xf32> to vector<16x128xf32>
    %394 = arith.mulf %393, %379 : vector<16x128xf32>
    %395 = arith.subf %316, %394 : vector<16x128xf32>
    %396 = vector.extract_strided_slice %320 {offsets = [3, 0], sizes = [1, 128], strides = [1, 1]} : vector<16x128xf32> to vector<1x128xf32>
    %397 = vector.broadcast %396 : vector<1x128xf32> to vector<16x128xf32>
    %398 = arith.mulf %397, %379 : vector<16x128xf32>
    %399 = arith.subf %320, %398 : vector<16x128xf32>
    %400 = vector.extract_strided_slice %324 {offsets = [3, 0], sizes = [1, 128], strides = [1, 1]} : vector<16x128xf32> to vector<1x128xf32>
    %401 = vector.broadcast %400 : vector<1x128xf32> to vector<16x128xf32>
    %402 = arith.mulf %401, %379 : vector<16x128xf32>
    %403 = arith.subf %324, %402 : vector<16x128xf32>
    %404 = vector.extract_strided_slice %328 {offsets = [3, 0], sizes = [1, 128], strides = [1, 1]} : vector<16x128xf32> to vector<1x128xf32>
    %405 = vector.broadcast %404 : vector<1x128xf32> to vector<16x128xf32>
    %406 = arith.mulf %405, %379 : vector<16x128xf32>
    %407 = arith.subf %328, %406 : vector<16x128xf32>
    %408 = vector.extract_strided_slice %332 {offsets = [3, 0], sizes = [1, 128], strides = [1, 1]} : vector<16x128xf32> to vector<1x128xf32>
    %409 = vector.broadcast %408 : vector<1x128xf32> to vector<16x128xf32>
    %410 = arith.mulf %409, %379 : vector<16x128xf32>
    %411 = arith.subf %332, %410 : vector<16x128xf32>
    %412 = vector.extract_strided_slice %336 {offsets = [3, 0], sizes = [1, 128], strides = [1, 1]} : vector<16x128xf32> to vector<1x128xf32>
    %413 = vector.broadcast %412 : vector<1x128xf32> to vector<16x128xf32>
    %414 = arith.mulf %413, %379 : vector<16x128xf32>
    %415 = arith.subf %336, %414 : vector<16x128xf32>
    %416 = vector.extract_strided_slice %340 {offsets = [3, 0], sizes = [1, 128], strides = [1, 1]} : vector<16x128xf32> to vector<1x128xf32>
    %417 = vector.broadcast %416 : vector<1x128xf32> to vector<16x128xf32>
    %418 = arith.mulf %417, %379 : vector<16x128xf32>
    %419 = arith.subf %340, %418 : vector<16x128xf32>
    %420 = vector.extract_strided_slice %344 {offsets = [3, 0], sizes = [1, 128], strides = [1, 1]} : vector<16x128xf32> to vector<1x128xf32>
    %421 = vector.broadcast %420 : vector<1x128xf32> to vector<16x128xf32>
    %422 = arith.mulf %421, %379 : vector<16x128xf32>
    %423 = arith.subf %344, %422 : vector<16x128xf32>
    %424 = vector.extract_strided_slice %348 {offsets = [3, 0], sizes = [1, 128], strides = [1, 1]} : vector<16x128xf32> to vector<1x128xf32>
    %425 = vector.broadcast %424 : vector<1x128xf32> to vector<16x128xf32>
    %426 = arith.mulf %425, %379 : vector<16x128xf32>
    %427 = arith.subf %348, %426 : vector<16x128xf32>
    %428 = vector.extract_strided_slice %352 {offsets = [3, 0], sizes = [1, 128], strides = [1, 1]} : vector<16x128xf32> to vector<1x128xf32>
    %429 = vector.broadcast %428 : vector<1x128xf32> to vector<16x128xf32>
    %430 = arith.mulf %429, %379 : vector<16x128xf32>
    %431 = arith.subf %352, %430 : vector<16x128xf32>
    %432 = vector.extract_strided_slice %356 {offsets = [3, 0], sizes = [1, 128], strides = [1, 1]} : vector<16x128xf32> to vector<1x128xf32>
    %433 = vector.broadcast %432 : vector<1x128xf32> to vector<16x128xf32>
    %434 = arith.mulf %433, %379 : vector<16x128xf32>
    %435 = arith.subf %356, %434 : vector<16x128xf32>
    %436 = vector.extract_strided_slice %360 {offsets = [3, 0], sizes = [1, 128], strides = [1, 1]} : vector<16x128xf32> to vector<1x128xf32>
    %437 = vector.broadcast %436 : vector<1x128xf32> to vector<16x128xf32>
    %438 = arith.mulf %437, %379 : vector<16x128xf32>
    %439 = arith.subf %360, %438 : vector<16x128xf32>
    %440 = vector.shape_cast %372 : vector<16x1xi1> to vector<16x1xi1>
    %441 = vector.broadcast %440 : vector<16x1xi1> to vector<16x128xi1>
    %442 = vector.shape_cast %368 : vector<1x128xf32> to vector<1x128xf32>
    %443 = vector.broadcast %442 : vector<1x128xf32> to vector<16x128xf32>
    %444 = arith.select %441, %443, %370 : vector<16x128xi1>, vector<16x128xf32>
    %445 = vector.extract_strided_slice %395 {offsets = [4, 0], sizes = [1, 128], strides = [1, 1]} : vector<16x128xf32> to vector<1x128xf32>
    %cst_43 = arith.constant 1.000000e+00 : f32
    %446 = vector.broadcast %cst_43 : f32 to vector<1x128xf32>
    %447 = arith.divf %446, %445 : vector<1x128xf32>
    %448 = vector.broadcast %447 : vector<1x128xf32> to vector<16x128xf32>
    %449 = arith.mulf %395, %448 : vector<16x128xf32>
    %c4_i32_44 = arith.constant 4 : i32
    %450 = vector.broadcast %c4_i32_44 : i32 to vector<16x1xi32>
    %451 = arith.cmpi eq, %0, %450 : vector<16x1xi32>
    %cst_45 = arith.constant 1.000000e+00 : f32
    %452 = vector.broadcast %cst_45 : f32 to vector<1x128xf32>
    %453 = arith.addf %452, %447 : vector<1x128xf32>
    %454 = vector.shape_cast %451 : vector<16x1xi1> to vector<16x1xi1>
    %455 = vector.broadcast %454 : vector<16x1xi1> to vector<16x128xi1>
    %456 = vector.shape_cast %453 : vector<1x128xf32> to vector<1x128xf32>
    %457 = vector.broadcast %456 : vector<1x128xf32> to vector<16x128xf32>
    %458 = arith.select %455, %457, %449 : vector<16x128xi1>, vector<16x128xf32>
    %459 = vector.extract_strided_slice %383 {offsets = [4, 0], sizes = [1, 128], strides = [1, 1]} : vector<16x128xf32> to vector<1x128xf32>
    %460 = vector.broadcast %459 : vector<1x128xf32> to vector<16x128xf32>
    %461 = arith.mulf %460, %458 : vector<16x128xf32>
    %462 = arith.subf %383, %461 : vector<16x128xf32>
    %463 = vector.extract_strided_slice %387 {offsets = [4, 0], sizes = [1, 128], strides = [1, 1]} : vector<16x128xf32> to vector<1x128xf32>
    %464 = vector.broadcast %463 : vector<1x128xf32> to vector<16x128xf32>
    %465 = arith.mulf %464, %458 : vector<16x128xf32>
    %466 = arith.subf %387, %465 : vector<16x128xf32>
    %467 = vector.extract_strided_slice %391 {offsets = [4, 0], sizes = [1, 128], strides = [1, 1]} : vector<16x128xf32> to vector<1x128xf32>
    %468 = vector.broadcast %467 : vector<1x128xf32> to vector<16x128xf32>
    %469 = arith.mulf %468, %458 : vector<16x128xf32>
    %470 = arith.subf %391, %469 : vector<16x128xf32>
    %471 = vector.extract_strided_slice %444 {offsets = [4, 0], sizes = [1, 128], strides = [1, 1]} : vector<16x128xf32> to vector<1x128xf32>
    %472 = vector.broadcast %471 : vector<1x128xf32> to vector<16x128xf32>
    %473 = arith.mulf %472, %458 : vector<16x128xf32>
    %474 = arith.subf %444, %473 : vector<16x128xf32>
    %475 = vector.extract_strided_slice %399 {offsets = [4, 0], sizes = [1, 128], strides = [1, 1]} : vector<16x128xf32> to vector<1x128xf32>
    %476 = vector.broadcast %475 : vector<1x128xf32> to vector<16x128xf32>
    %477 = arith.mulf %476, %458 : vector<16x128xf32>
    %478 = arith.subf %399, %477 : vector<16x128xf32>
    %479 = vector.extract_strided_slice %403 {offsets = [4, 0], sizes = [1, 128], strides = [1, 1]} : vector<16x128xf32> to vector<1x128xf32>
    %480 = vector.broadcast %479 : vector<1x128xf32> to vector<16x128xf32>
    %481 = arith.mulf %480, %458 : vector<16x128xf32>
    %482 = arith.subf %403, %481 : vector<16x128xf32>
    %483 = vector.extract_strided_slice %407 {offsets = [4, 0], sizes = [1, 128], strides = [1, 1]} : vector<16x128xf32> to vector<1x128xf32>
    %484 = vector.broadcast %483 : vector<1x128xf32> to vector<16x128xf32>
    %485 = arith.mulf %484, %458 : vector<16x128xf32>
    %486 = arith.subf %407, %485 : vector<16x128xf32>
    %487 = vector.extract_strided_slice %411 {offsets = [4, 0], sizes = [1, 128], strides = [1, 1]} : vector<16x128xf32> to vector<1x128xf32>
    %488 = vector.broadcast %487 : vector<1x128xf32> to vector<16x128xf32>
    %489 = arith.mulf %488, %458 : vector<16x128xf32>
    %490 = arith.subf %411, %489 : vector<16x128xf32>
    %491 = vector.extract_strided_slice %415 {offsets = [4, 0], sizes = [1, 128], strides = [1, 1]} : vector<16x128xf32> to vector<1x128xf32>
    %492 = vector.broadcast %491 : vector<1x128xf32> to vector<16x128xf32>
    %493 = arith.mulf %492, %458 : vector<16x128xf32>
    %494 = arith.subf %415, %493 : vector<16x128xf32>
    %495 = vector.extract_strided_slice %419 {offsets = [4, 0], sizes = [1, 128], strides = [1, 1]} : vector<16x128xf32> to vector<1x128xf32>
    %496 = vector.broadcast %495 : vector<1x128xf32> to vector<16x128xf32>
    %497 = arith.mulf %496, %458 : vector<16x128xf32>
    %498 = arith.subf %419, %497 : vector<16x128xf32>
    %499 = vector.extract_strided_slice %423 {offsets = [4, 0], sizes = [1, 128], strides = [1, 1]} : vector<16x128xf32> to vector<1x128xf32>
    %500 = vector.broadcast %499 : vector<1x128xf32> to vector<16x128xf32>
    %501 = arith.mulf %500, %458 : vector<16x128xf32>
    %502 = arith.subf %423, %501 : vector<16x128xf32>
    %503 = vector.extract_strided_slice %427 {offsets = [4, 0], sizes = [1, 128], strides = [1, 1]} : vector<16x128xf32> to vector<1x128xf32>
    %504 = vector.broadcast %503 : vector<1x128xf32> to vector<16x128xf32>
    %505 = arith.mulf %504, %458 : vector<16x128xf32>
    %506 = arith.subf %427, %505 : vector<16x128xf32>
    %507 = vector.extract_strided_slice %431 {offsets = [4, 0], sizes = [1, 128], strides = [1, 1]} : vector<16x128xf32> to vector<1x128xf32>
    %508 = vector.broadcast %507 : vector<1x128xf32> to vector<16x128xf32>
    %509 = arith.mulf %508, %458 : vector<16x128xf32>
    %510 = arith.subf %431, %509 : vector<16x128xf32>
    %511 = vector.extract_strided_slice %435 {offsets = [4, 0], sizes = [1, 128], strides = [1, 1]} : vector<16x128xf32> to vector<1x128xf32>
    %512 = vector.broadcast %511 : vector<1x128xf32> to vector<16x128xf32>
    %513 = arith.mulf %512, %458 : vector<16x128xf32>
    %514 = arith.subf %435, %513 : vector<16x128xf32>
    %515 = vector.extract_strided_slice %439 {offsets = [4, 0], sizes = [1, 128], strides = [1, 1]} : vector<16x128xf32> to vector<1x128xf32>
    %516 = vector.broadcast %515 : vector<1x128xf32> to vector<16x128xf32>
    %517 = arith.mulf %516, %458 : vector<16x128xf32>
    %518 = arith.subf %439, %517 : vector<16x128xf32>
    %519 = vector.shape_cast %451 : vector<16x1xi1> to vector<16x1xi1>
    %520 = vector.broadcast %519 : vector<16x1xi1> to vector<16x128xi1>
    %521 = vector.shape_cast %447 : vector<1x128xf32> to vector<1x128xf32>
    %522 = vector.broadcast %521 : vector<1x128xf32> to vector<16x128xf32>
    %523 = arith.select %520, %522, %449 : vector<16x128xi1>, vector<16x128xf32>
    %524 = vector.extract_strided_slice %478 {offsets = [5, 0], sizes = [1, 128], strides = [1, 1]} : vector<16x128xf32> to vector<1x128xf32>
    %cst_46 = arith.constant 1.000000e+00 : f32
    %525 = vector.broadcast %cst_46 : f32 to vector<1x128xf32>
    %526 = arith.divf %525, %524 : vector<1x128xf32>
    %527 = vector.broadcast %526 : vector<1x128xf32> to vector<16x128xf32>
    %528 = arith.mulf %478, %527 : vector<16x128xf32>
    %c5_i32_47 = arith.constant 5 : i32
    %529 = vector.broadcast %c5_i32_47 : i32 to vector<16x1xi32>
    %530 = arith.cmpi eq, %0, %529 : vector<16x1xi32>
    %cst_48 = arith.constant 1.000000e+00 : f32
    %531 = vector.broadcast %cst_48 : f32 to vector<1x128xf32>
    %532 = arith.addf %531, %526 : vector<1x128xf32>
    %533 = vector.shape_cast %530 : vector<16x1xi1> to vector<16x1xi1>
    %534 = vector.broadcast %533 : vector<16x1xi1> to vector<16x128xi1>
    %535 = vector.shape_cast %532 : vector<1x128xf32> to vector<1x128xf32>
    %536 = vector.broadcast %535 : vector<1x128xf32> to vector<16x128xf32>
    %537 = arith.select %534, %536, %528 : vector<16x128xi1>, vector<16x128xf32>
    %538 = vector.extract_strided_slice %462 {offsets = [5, 0], sizes = [1, 128], strides = [1, 1]} : vector<16x128xf32> to vector<1x128xf32>
    %539 = vector.broadcast %538 : vector<1x128xf32> to vector<16x128xf32>
    %540 = arith.mulf %539, %537 : vector<16x128xf32>
    %541 = arith.subf %462, %540 : vector<16x128xf32>
    %542 = vector.extract_strided_slice %466 {offsets = [5, 0], sizes = [1, 128], strides = [1, 1]} : vector<16x128xf32> to vector<1x128xf32>
    %543 = vector.broadcast %542 : vector<1x128xf32> to vector<16x128xf32>
    %544 = arith.mulf %543, %537 : vector<16x128xf32>
    %545 = arith.subf %466, %544 : vector<16x128xf32>
    %546 = vector.extract_strided_slice %470 {offsets = [5, 0], sizes = [1, 128], strides = [1, 1]} : vector<16x128xf32> to vector<1x128xf32>
    %547 = vector.broadcast %546 : vector<1x128xf32> to vector<16x128xf32>
    %548 = arith.mulf %547, %537 : vector<16x128xf32>
    %549 = arith.subf %470, %548 : vector<16x128xf32>
    %550 = vector.extract_strided_slice %474 {offsets = [5, 0], sizes = [1, 128], strides = [1, 1]} : vector<16x128xf32> to vector<1x128xf32>
    %551 = vector.broadcast %550 : vector<1x128xf32> to vector<16x128xf32>
    %552 = arith.mulf %551, %537 : vector<16x128xf32>
    %553 = arith.subf %474, %552 : vector<16x128xf32>
    %554 = vector.extract_strided_slice %523 {offsets = [5, 0], sizes = [1, 128], strides = [1, 1]} : vector<16x128xf32> to vector<1x128xf32>
    %555 = vector.broadcast %554 : vector<1x128xf32> to vector<16x128xf32>
    %556 = arith.mulf %555, %537 : vector<16x128xf32>
    %557 = arith.subf %523, %556 : vector<16x128xf32>
    %558 = vector.extract_strided_slice %482 {offsets = [5, 0], sizes = [1, 128], strides = [1, 1]} : vector<16x128xf32> to vector<1x128xf32>
    %559 = vector.broadcast %558 : vector<1x128xf32> to vector<16x128xf32>
    %560 = arith.mulf %559, %537 : vector<16x128xf32>
    %561 = arith.subf %482, %560 : vector<16x128xf32>
    %562 = vector.extract_strided_slice %486 {offsets = [5, 0], sizes = [1, 128], strides = [1, 1]} : vector<16x128xf32> to vector<1x128xf32>
    %563 = vector.broadcast %562 : vector<1x128xf32> to vector<16x128xf32>
    %564 = arith.mulf %563, %537 : vector<16x128xf32>
    %565 = arith.subf %486, %564 : vector<16x128xf32>
    %566 = vector.extract_strided_slice %490 {offsets = [5, 0], sizes = [1, 128], strides = [1, 1]} : vector<16x128xf32> to vector<1x128xf32>
    %567 = vector.broadcast %566 : vector<1x128xf32> to vector<16x128xf32>
    %568 = arith.mulf %567, %537 : vector<16x128xf32>
    %569 = arith.subf %490, %568 : vector<16x128xf32>
    %570 = vector.extract_strided_slice %494 {offsets = [5, 0], sizes = [1, 128], strides = [1, 1]} : vector<16x128xf32> to vector<1x128xf32>
    %571 = vector.broadcast %570 : vector<1x128xf32> to vector<16x128xf32>
    %572 = arith.mulf %571, %537 : vector<16x128xf32>
    %573 = arith.subf %494, %572 : vector<16x128xf32>
    %574 = vector.extract_strided_slice %498 {offsets = [5, 0], sizes = [1, 128], strides = [1, 1]} : vector<16x128xf32> to vector<1x128xf32>
    %575 = vector.broadcast %574 : vector<1x128xf32> to vector<16x128xf32>
    %576 = arith.mulf %575, %537 : vector<16x128xf32>
    %577 = arith.subf %498, %576 : vector<16x128xf32>
    %578 = vector.extract_strided_slice %502 {offsets = [5, 0], sizes = [1, 128], strides = [1, 1]} : vector<16x128xf32> to vector<1x128xf32>
    %579 = vector.broadcast %578 : vector<1x128xf32> to vector<16x128xf32>
    %580 = arith.mulf %579, %537 : vector<16x128xf32>
    %581 = arith.subf %502, %580 : vector<16x128xf32>
    %582 = vector.extract_strided_slice %506 {offsets = [5, 0], sizes = [1, 128], strides = [1, 1]} : vector<16x128xf32> to vector<1x128xf32>
    %583 = vector.broadcast %582 : vector<1x128xf32> to vector<16x128xf32>
    %584 = arith.mulf %583, %537 : vector<16x128xf32>
    %585 = arith.subf %506, %584 : vector<16x128xf32>
    %586 = vector.extract_strided_slice %510 {offsets = [5, 0], sizes = [1, 128], strides = [1, 1]} : vector<16x128xf32> to vector<1x128xf32>
    %587 = vector.broadcast %586 : vector<1x128xf32> to vector<16x128xf32>
    %588 = arith.mulf %587, %537 : vector<16x128xf32>
    %589 = arith.subf %510, %588 : vector<16x128xf32>
    %590 = vector.extract_strided_slice %514 {offsets = [5, 0], sizes = [1, 128], strides = [1, 1]} : vector<16x128xf32> to vector<1x128xf32>
    %591 = vector.broadcast %590 : vector<1x128xf32> to vector<16x128xf32>
    %592 = arith.mulf %591, %537 : vector<16x128xf32>
    %593 = arith.subf %514, %592 : vector<16x128xf32>
    %594 = vector.extract_strided_slice %518 {offsets = [5, 0], sizes = [1, 128], strides = [1, 1]} : vector<16x128xf32> to vector<1x128xf32>
    %595 = vector.broadcast %594 : vector<1x128xf32> to vector<16x128xf32>
    %596 = arith.mulf %595, %537 : vector<16x128xf32>
    %597 = arith.subf %518, %596 : vector<16x128xf32>
    %598 = vector.shape_cast %530 : vector<16x1xi1> to vector<16x1xi1>
    %599 = vector.broadcast %598 : vector<16x1xi1> to vector<16x128xi1>
    %600 = vector.shape_cast %526 : vector<1x128xf32> to vector<1x128xf32>
    %601 = vector.broadcast %600 : vector<1x128xf32> to vector<16x128xf32>
    %602 = arith.select %599, %601, %528 : vector<16x128xi1>, vector<16x128xf32>
    %603 = vector.extract_strided_slice %561 {offsets = [6, 0], sizes = [1, 128], strides = [1, 1]} : vector<16x128xf32> to vector<1x128xf32>
    %cst_49 = arith.constant 1.000000e+00 : f32
    %604 = vector.broadcast %cst_49 : f32 to vector<1x128xf32>
    %605 = arith.divf %604, %603 : vector<1x128xf32>
    %606 = vector.broadcast %605 : vector<1x128xf32> to vector<16x128xf32>
    %607 = arith.mulf %561, %606 : vector<16x128xf32>
    %c6_i32_50 = arith.constant 6 : i32
    %608 = vector.broadcast %c6_i32_50 : i32 to vector<16x1xi32>
    %609 = arith.cmpi eq, %0, %608 : vector<16x1xi32>
    %cst_51 = arith.constant 1.000000e+00 : f32
    %610 = vector.broadcast %cst_51 : f32 to vector<1x128xf32>
    %611 = arith.addf %610, %605 : vector<1x128xf32>
    %612 = vector.shape_cast %609 : vector<16x1xi1> to vector<16x1xi1>
    %613 = vector.broadcast %612 : vector<16x1xi1> to vector<16x128xi1>
    %614 = vector.shape_cast %611 : vector<1x128xf32> to vector<1x128xf32>
    %615 = vector.broadcast %614 : vector<1x128xf32> to vector<16x128xf32>
    %616 = arith.select %613, %615, %607 : vector<16x128xi1>, vector<16x128xf32>
    %617 = vector.extract_strided_slice %541 {offsets = [6, 0], sizes = [1, 128], strides = [1, 1]} : vector<16x128xf32> to vector<1x128xf32>
    %618 = vector.broadcast %617 : vector<1x128xf32> to vector<16x128xf32>
    %619 = arith.mulf %618, %616 : vector<16x128xf32>
    %620 = arith.subf %541, %619 : vector<16x128xf32>
    %621 = vector.extract_strided_slice %545 {offsets = [6, 0], sizes = [1, 128], strides = [1, 1]} : vector<16x128xf32> to vector<1x128xf32>
    %622 = vector.broadcast %621 : vector<1x128xf32> to vector<16x128xf32>
    %623 = arith.mulf %622, %616 : vector<16x128xf32>
    %624 = arith.subf %545, %623 : vector<16x128xf32>
    %625 = vector.extract_strided_slice %549 {offsets = [6, 0], sizes = [1, 128], strides = [1, 1]} : vector<16x128xf32> to vector<1x128xf32>
    %626 = vector.broadcast %625 : vector<1x128xf32> to vector<16x128xf32>
    %627 = arith.mulf %626, %616 : vector<16x128xf32>
    %628 = arith.subf %549, %627 : vector<16x128xf32>
    %629 = vector.extract_strided_slice %553 {offsets = [6, 0], sizes = [1, 128], strides = [1, 1]} : vector<16x128xf32> to vector<1x128xf32>
    %630 = vector.broadcast %629 : vector<1x128xf32> to vector<16x128xf32>
    %631 = arith.mulf %630, %616 : vector<16x128xf32>
    %632 = arith.subf %553, %631 : vector<16x128xf32>
    %633 = vector.extract_strided_slice %557 {offsets = [6, 0], sizes = [1, 128], strides = [1, 1]} : vector<16x128xf32> to vector<1x128xf32>
    %634 = vector.broadcast %633 : vector<1x128xf32> to vector<16x128xf32>
    %635 = arith.mulf %634, %616 : vector<16x128xf32>
    %636 = arith.subf %557, %635 : vector<16x128xf32>
    %637 = vector.extract_strided_slice %602 {offsets = [6, 0], sizes = [1, 128], strides = [1, 1]} : vector<16x128xf32> to vector<1x128xf32>
    %638 = vector.broadcast %637 : vector<1x128xf32> to vector<16x128xf32>
    %639 = arith.mulf %638, %616 : vector<16x128xf32>
    %640 = arith.subf %602, %639 : vector<16x128xf32>
    %641 = vector.extract_strided_slice %565 {offsets = [6, 0], sizes = [1, 128], strides = [1, 1]} : vector<16x128xf32> to vector<1x128xf32>
    %642 = vector.broadcast %641 : vector<1x128xf32> to vector<16x128xf32>
    %643 = arith.mulf %642, %616 : vector<16x128xf32>
    %644 = arith.subf %565, %643 : vector<16x128xf32>
    %645 = vector.extract_strided_slice %569 {offsets = [6, 0], sizes = [1, 128], strides = [1, 1]} : vector<16x128xf32> to vector<1x128xf32>
    %646 = vector.broadcast %645 : vector<1x128xf32> to vector<16x128xf32>
    %647 = arith.mulf %646, %616 : vector<16x128xf32>
    %648 = arith.subf %569, %647 : vector<16x128xf32>
    %649 = vector.extract_strided_slice %573 {offsets = [6, 0], sizes = [1, 128], strides = [1, 1]} : vector<16x128xf32> to vector<1x128xf32>
    %650 = vector.broadcast %649 : vector<1x128xf32> to vector<16x128xf32>
    %651 = arith.mulf %650, %616 : vector<16x128xf32>
    %652 = arith.subf %573, %651 : vector<16x128xf32>
    %653 = vector.extract_strided_slice %577 {offsets = [6, 0], sizes = [1, 128], strides = [1, 1]} : vector<16x128xf32> to vector<1x128xf32>
    %654 = vector.broadcast %653 : vector<1x128xf32> to vector<16x128xf32>
    %655 = arith.mulf %654, %616 : vector<16x128xf32>
    %656 = arith.subf %577, %655 : vector<16x128xf32>
    %657 = vector.extract_strided_slice %581 {offsets = [6, 0], sizes = [1, 128], strides = [1, 1]} : vector<16x128xf32> to vector<1x128xf32>
    %658 = vector.broadcast %657 : vector<1x128xf32> to vector<16x128xf32>
    %659 = arith.mulf %658, %616 : vector<16x128xf32>
    %660 = arith.subf %581, %659 : vector<16x128xf32>
    %661 = vector.extract_strided_slice %585 {offsets = [6, 0], sizes = [1, 128], strides = [1, 1]} : vector<16x128xf32> to vector<1x128xf32>
    %662 = vector.broadcast %661 : vector<1x128xf32> to vector<16x128xf32>
    %663 = arith.mulf %662, %616 : vector<16x128xf32>
    %664 = arith.subf %585, %663 : vector<16x128xf32>
    %665 = vector.extract_strided_slice %589 {offsets = [6, 0], sizes = [1, 128], strides = [1, 1]} : vector<16x128xf32> to vector<1x128xf32>
    %666 = vector.broadcast %665 : vector<1x128xf32> to vector<16x128xf32>
    %667 = arith.mulf %666, %616 : vector<16x128xf32>
    %668 = arith.subf %589, %667 : vector<16x128xf32>
    %669 = vector.extract_strided_slice %593 {offsets = [6, 0], sizes = [1, 128], strides = [1, 1]} : vector<16x128xf32> to vector<1x128xf32>
    %670 = vector.broadcast %669 : vector<1x128xf32> to vector<16x128xf32>
    %671 = arith.mulf %670, %616 : vector<16x128xf32>
    %672 = arith.subf %593, %671 : vector<16x128xf32>
    %673 = vector.extract_strided_slice %597 {offsets = [6, 0], sizes = [1, 128], strides = [1, 1]} : vector<16x128xf32> to vector<1x128xf32>
    %674 = vector.broadcast %673 : vector<1x128xf32> to vector<16x128xf32>
    %675 = arith.mulf %674, %616 : vector<16x128xf32>
    %676 = arith.subf %597, %675 : vector<16x128xf32>
    %677 = vector.shape_cast %609 : vector<16x1xi1> to vector<16x1xi1>
    %678 = vector.broadcast %677 : vector<16x1xi1> to vector<16x128xi1>
    %679 = vector.shape_cast %605 : vector<1x128xf32> to vector<1x128xf32>
    %680 = vector.broadcast %679 : vector<1x128xf32> to vector<16x128xf32>
    %681 = arith.select %678, %680, %607 : vector<16x128xi1>, vector<16x128xf32>
    %682 = vector.extract_strided_slice %644 {offsets = [7, 0], sizes = [1, 128], strides = [1, 1]} : vector<16x128xf32> to vector<1x128xf32>
    %cst_52 = arith.constant 1.000000e+00 : f32
    %683 = vector.broadcast %cst_52 : f32 to vector<1x128xf32>
    %684 = arith.divf %683, %682 : vector<1x128xf32>
    %685 = vector.broadcast %684 : vector<1x128xf32> to vector<16x128xf32>
    %686 = arith.mulf %644, %685 : vector<16x128xf32>
    %c7_i32_53 = arith.constant 7 : i32
    %687 = vector.broadcast %c7_i32_53 : i32 to vector<16x1xi32>
    %688 = arith.cmpi eq, %0, %687 : vector<16x1xi32>
    %cst_54 = arith.constant 1.000000e+00 : f32
    %689 = vector.broadcast %cst_54 : f32 to vector<1x128xf32>
    %690 = arith.addf %689, %684 : vector<1x128xf32>
    %691 = vector.shape_cast %688 : vector<16x1xi1> to vector<16x1xi1>
    %692 = vector.broadcast %691 : vector<16x1xi1> to vector<16x128xi1>
    %693 = vector.shape_cast %690 : vector<1x128xf32> to vector<1x128xf32>
    %694 = vector.broadcast %693 : vector<1x128xf32> to vector<16x128xf32>
    %695 = arith.select %692, %694, %686 : vector<16x128xi1>, vector<16x128xf32>
    %696 = vector.extract_strided_slice %620 {offsets = [7, 0], sizes = [1, 128], strides = [1, 1]} : vector<16x128xf32> to vector<1x128xf32>
    %697 = vector.broadcast %696 : vector<1x128xf32> to vector<16x128xf32>
    %698 = arith.mulf %697, %695 : vector<16x128xf32>
    %699 = arith.subf %620, %698 : vector<16x128xf32>
    %700 = vector.extract_strided_slice %624 {offsets = [7, 0], sizes = [1, 128], strides = [1, 1]} : vector<16x128xf32> to vector<1x128xf32>
    %701 = vector.broadcast %700 : vector<1x128xf32> to vector<16x128xf32>
    %702 = arith.mulf %701, %695 : vector<16x128xf32>
    %703 = arith.subf %624, %702 : vector<16x128xf32>
    %704 = vector.extract_strided_slice %628 {offsets = [7, 0], sizes = [1, 128], strides = [1, 1]} : vector<16x128xf32> to vector<1x128xf32>
    %705 = vector.broadcast %704 : vector<1x128xf32> to vector<16x128xf32>
    %706 = arith.mulf %705, %695 : vector<16x128xf32>
    %707 = arith.subf %628, %706 : vector<16x128xf32>
    %708 = vector.extract_strided_slice %632 {offsets = [7, 0], sizes = [1, 128], strides = [1, 1]} : vector<16x128xf32> to vector<1x128xf32>
    %709 = vector.broadcast %708 : vector<1x128xf32> to vector<16x128xf32>
    %710 = arith.mulf %709, %695 : vector<16x128xf32>
    %711 = arith.subf %632, %710 : vector<16x128xf32>
    %712 = vector.extract_strided_slice %636 {offsets = [7, 0], sizes = [1, 128], strides = [1, 1]} : vector<16x128xf32> to vector<1x128xf32>
    %713 = vector.broadcast %712 : vector<1x128xf32> to vector<16x128xf32>
    %714 = arith.mulf %713, %695 : vector<16x128xf32>
    %715 = arith.subf %636, %714 : vector<16x128xf32>
    %716 = vector.extract_strided_slice %640 {offsets = [7, 0], sizes = [1, 128], strides = [1, 1]} : vector<16x128xf32> to vector<1x128xf32>
    %717 = vector.broadcast %716 : vector<1x128xf32> to vector<16x128xf32>
    %718 = arith.mulf %717, %695 : vector<16x128xf32>
    %719 = arith.subf %640, %718 : vector<16x128xf32>
    %720 = vector.extract_strided_slice %681 {offsets = [7, 0], sizes = [1, 128], strides = [1, 1]} : vector<16x128xf32> to vector<1x128xf32>
    %721 = vector.broadcast %720 : vector<1x128xf32> to vector<16x128xf32>
    %722 = arith.mulf %721, %695 : vector<16x128xf32>
    %723 = arith.subf %681, %722 : vector<16x128xf32>
    %724 = vector.extract_strided_slice %648 {offsets = [7, 0], sizes = [1, 128], strides = [1, 1]} : vector<16x128xf32> to vector<1x128xf32>
    %725 = vector.broadcast %724 : vector<1x128xf32> to vector<16x128xf32>
    %726 = arith.mulf %725, %695 : vector<16x128xf32>
    %727 = arith.subf %648, %726 : vector<16x128xf32>
    %728 = vector.extract_strided_slice %652 {offsets = [7, 0], sizes = [1, 128], strides = [1, 1]} : vector<16x128xf32> to vector<1x128xf32>
    %729 = vector.broadcast %728 : vector<1x128xf32> to vector<16x128xf32>
    %730 = arith.mulf %729, %695 : vector<16x128xf32>
    %731 = arith.subf %652, %730 : vector<16x128xf32>
    %732 = vector.extract_strided_slice %656 {offsets = [7, 0], sizes = [1, 128], strides = [1, 1]} : vector<16x128xf32> to vector<1x128xf32>
    %733 = vector.broadcast %732 : vector<1x128xf32> to vector<16x128xf32>
    %734 = arith.mulf %733, %695 : vector<16x128xf32>
    %735 = arith.subf %656, %734 : vector<16x128xf32>
    %736 = vector.extract_strided_slice %660 {offsets = [7, 0], sizes = [1, 128], strides = [1, 1]} : vector<16x128xf32> to vector<1x128xf32>
    %737 = vector.broadcast %736 : vector<1x128xf32> to vector<16x128xf32>
    %738 = arith.mulf %737, %695 : vector<16x128xf32>
    %739 = arith.subf %660, %738 : vector<16x128xf32>
    %740 = vector.extract_strided_slice %664 {offsets = [7, 0], sizes = [1, 128], strides = [1, 1]} : vector<16x128xf32> to vector<1x128xf32>
    %741 = vector.broadcast %740 : vector<1x128xf32> to vector<16x128xf32>
    %742 = arith.mulf %741, %695 : vector<16x128xf32>
    %743 = arith.subf %664, %742 : vector<16x128xf32>
    %744 = vector.extract_strided_slice %668 {offsets = [7, 0], sizes = [1, 128], strides = [1, 1]} : vector<16x128xf32> to vector<1x128xf32>
    %745 = vector.broadcast %744 : vector<1x128xf32> to vector<16x128xf32>
    %746 = arith.mulf %745, %695 : vector<16x128xf32>
    %747 = arith.subf %668, %746 : vector<16x128xf32>
    %748 = vector.extract_strided_slice %672 {offsets = [7, 0], sizes = [1, 128], strides = [1, 1]} : vector<16x128xf32> to vector<1x128xf32>
    %749 = vector.broadcast %748 : vector<1x128xf32> to vector<16x128xf32>
    %750 = arith.mulf %749, %695 : vector<16x128xf32>
    %751 = arith.subf %672, %750 : vector<16x128xf32>
    %752 = vector.extract_strided_slice %676 {offsets = [7, 0], sizes = [1, 128], strides = [1, 1]} : vector<16x128xf32> to vector<1x128xf32>
    %753 = vector.broadcast %752 : vector<1x128xf32> to vector<16x128xf32>
    %754 = arith.mulf %753, %695 : vector<16x128xf32>
    %755 = arith.subf %676, %754 : vector<16x128xf32>
    %756 = vector.shape_cast %688 : vector<16x1xi1> to vector<16x1xi1>
    %757 = vector.broadcast %756 : vector<16x1xi1> to vector<16x128xi1>
    %758 = vector.shape_cast %684 : vector<1x128xf32> to vector<1x128xf32>
    %759 = vector.broadcast %758 : vector<1x128xf32> to vector<16x128xf32>
    %760 = arith.select %757, %759, %686 : vector<16x128xi1>, vector<16x128xf32>
    %761 = vector.extract_strided_slice %727 {offsets = [8, 0], sizes = [1, 128], strides = [1, 1]} : vector<16x128xf32> to vector<1x128xf32>
    %cst_55 = arith.constant 1.000000e+00 : f32
    %762 = vector.broadcast %cst_55 : f32 to vector<1x128xf32>
    %763 = arith.divf %762, %761 : vector<1x128xf32>
    %764 = vector.broadcast %763 : vector<1x128xf32> to vector<16x128xf32>
    %765 = arith.mulf %727, %764 : vector<16x128xf32>
    %c8_i32_56 = arith.constant 8 : i32
    %766 = vector.broadcast %c8_i32_56 : i32 to vector<16x1xi32>
    %767 = arith.cmpi eq, %0, %766 : vector<16x1xi32>
    %cst_57 = arith.constant 1.000000e+00 : f32
    %768 = vector.broadcast %cst_57 : f32 to vector<1x128xf32>
    %769 = arith.addf %768, %763 : vector<1x128xf32>
    %770 = vector.shape_cast %767 : vector<16x1xi1> to vector<16x1xi1>
    %771 = vector.broadcast %770 : vector<16x1xi1> to vector<16x128xi1>
    %772 = vector.shape_cast %769 : vector<1x128xf32> to vector<1x128xf32>
    %773 = vector.broadcast %772 : vector<1x128xf32> to vector<16x128xf32>
    %774 = arith.select %771, %773, %765 : vector<16x128xi1>, vector<16x128xf32>
    %775 = vector.extract_strided_slice %699 {offsets = [8, 0], sizes = [1, 128], strides = [1, 1]} : vector<16x128xf32> to vector<1x128xf32>
    %776 = vector.broadcast %775 : vector<1x128xf32> to vector<16x128xf32>
    %777 = arith.mulf %776, %774 : vector<16x128xf32>
    %778 = arith.subf %699, %777 : vector<16x128xf32>
    %779 = vector.extract_strided_slice %703 {offsets = [8, 0], sizes = [1, 128], strides = [1, 1]} : vector<16x128xf32> to vector<1x128xf32>
    %780 = vector.broadcast %779 : vector<1x128xf32> to vector<16x128xf32>
    %781 = arith.mulf %780, %774 : vector<16x128xf32>
    %782 = arith.subf %703, %781 : vector<16x128xf32>
    %783 = vector.extract_strided_slice %707 {offsets = [8, 0], sizes = [1, 128], strides = [1, 1]} : vector<16x128xf32> to vector<1x128xf32>
    %784 = vector.broadcast %783 : vector<1x128xf32> to vector<16x128xf32>
    %785 = arith.mulf %784, %774 : vector<16x128xf32>
    %786 = arith.subf %707, %785 : vector<16x128xf32>
    %787 = vector.extract_strided_slice %711 {offsets = [8, 0], sizes = [1, 128], strides = [1, 1]} : vector<16x128xf32> to vector<1x128xf32>
    %788 = vector.broadcast %787 : vector<1x128xf32> to vector<16x128xf32>
    %789 = arith.mulf %788, %774 : vector<16x128xf32>
    %790 = arith.subf %711, %789 : vector<16x128xf32>
    %791 = vector.extract_strided_slice %715 {offsets = [8, 0], sizes = [1, 128], strides = [1, 1]} : vector<16x128xf32> to vector<1x128xf32>
    %792 = vector.broadcast %791 : vector<1x128xf32> to vector<16x128xf32>
    %793 = arith.mulf %792, %774 : vector<16x128xf32>
    %794 = arith.subf %715, %793 : vector<16x128xf32>
    %795 = vector.extract_strided_slice %719 {offsets = [8, 0], sizes = [1, 128], strides = [1, 1]} : vector<16x128xf32> to vector<1x128xf32>
    %796 = vector.broadcast %795 : vector<1x128xf32> to vector<16x128xf32>
    %797 = arith.mulf %796, %774 : vector<16x128xf32>
    %798 = arith.subf %719, %797 : vector<16x128xf32>
    %799 = vector.extract_strided_slice %723 {offsets = [8, 0], sizes = [1, 128], strides = [1, 1]} : vector<16x128xf32> to vector<1x128xf32>
    %800 = vector.broadcast %799 : vector<1x128xf32> to vector<16x128xf32>
    %801 = arith.mulf %800, %774 : vector<16x128xf32>
    %802 = arith.subf %723, %801 : vector<16x128xf32>
    %803 = vector.extract_strided_slice %760 {offsets = [8, 0], sizes = [1, 128], strides = [1, 1]} : vector<16x128xf32> to vector<1x128xf32>
    %804 = vector.broadcast %803 : vector<1x128xf32> to vector<16x128xf32>
    %805 = arith.mulf %804, %774 : vector<16x128xf32>
    %806 = arith.subf %760, %805 : vector<16x128xf32>
    %807 = vector.extract_strided_slice %731 {offsets = [8, 0], sizes = [1, 128], strides = [1, 1]} : vector<16x128xf32> to vector<1x128xf32>
    %808 = vector.broadcast %807 : vector<1x128xf32> to vector<16x128xf32>
    %809 = arith.mulf %808, %774 : vector<16x128xf32>
    %810 = arith.subf %731, %809 : vector<16x128xf32>
    %811 = vector.extract_strided_slice %735 {offsets = [8, 0], sizes = [1, 128], strides = [1, 1]} : vector<16x128xf32> to vector<1x128xf32>
    %812 = vector.broadcast %811 : vector<1x128xf32> to vector<16x128xf32>
    %813 = arith.mulf %812, %774 : vector<16x128xf32>
    %814 = arith.subf %735, %813 : vector<16x128xf32>
    %815 = vector.extract_strided_slice %739 {offsets = [8, 0], sizes = [1, 128], strides = [1, 1]} : vector<16x128xf32> to vector<1x128xf32>
    %816 = vector.broadcast %815 : vector<1x128xf32> to vector<16x128xf32>
    %817 = arith.mulf %816, %774 : vector<16x128xf32>
    %818 = arith.subf %739, %817 : vector<16x128xf32>
    %819 = vector.extract_strided_slice %743 {offsets = [8, 0], sizes = [1, 128], strides = [1, 1]} : vector<16x128xf32> to vector<1x128xf32>
    %820 = vector.broadcast %819 : vector<1x128xf32> to vector<16x128xf32>
    %821 = arith.mulf %820, %774 : vector<16x128xf32>
    %822 = arith.subf %743, %821 : vector<16x128xf32>
    %823 = vector.extract_strided_slice %747 {offsets = [8, 0], sizes = [1, 128], strides = [1, 1]} : vector<16x128xf32> to vector<1x128xf32>
    %824 = vector.broadcast %823 : vector<1x128xf32> to vector<16x128xf32>
    %825 = arith.mulf %824, %774 : vector<16x128xf32>
    %826 = arith.subf %747, %825 : vector<16x128xf32>
    %827 = vector.extract_strided_slice %751 {offsets = [8, 0], sizes = [1, 128], strides = [1, 1]} : vector<16x128xf32> to vector<1x128xf32>
    %828 = vector.broadcast %827 : vector<1x128xf32> to vector<16x128xf32>
    %829 = arith.mulf %828, %774 : vector<16x128xf32>
    %830 = arith.subf %751, %829 : vector<16x128xf32>
    %831 = vector.extract_strided_slice %755 {offsets = [8, 0], sizes = [1, 128], strides = [1, 1]} : vector<16x128xf32> to vector<1x128xf32>
    %832 = vector.broadcast %831 : vector<1x128xf32> to vector<16x128xf32>
    %833 = arith.mulf %832, %774 : vector<16x128xf32>
    %834 = arith.subf %755, %833 : vector<16x128xf32>
    %835 = vector.shape_cast %767 : vector<16x1xi1> to vector<16x1xi1>
    %836 = vector.broadcast %835 : vector<16x1xi1> to vector<16x128xi1>
    %837 = vector.shape_cast %763 : vector<1x128xf32> to vector<1x128xf32>
    %838 = vector.broadcast %837 : vector<1x128xf32> to vector<16x128xf32>
    %839 = arith.select %836, %838, %765 : vector<16x128xi1>, vector<16x128xf32>
    %840 = vector.extract_strided_slice %810 {offsets = [9, 0], sizes = [1, 128], strides = [1, 1]} : vector<16x128xf32> to vector<1x128xf32>
    %cst_58 = arith.constant 1.000000e+00 : f32
    %841 = vector.broadcast %cst_58 : f32 to vector<1x128xf32>
    %842 = arith.divf %841, %840 : vector<1x128xf32>
    %843 = vector.broadcast %842 : vector<1x128xf32> to vector<16x128xf32>
    %844 = arith.mulf %810, %843 : vector<16x128xf32>
    %c9_i32_59 = arith.constant 9 : i32
    %845 = vector.broadcast %c9_i32_59 : i32 to vector<16x1xi32>
    %846 = arith.cmpi eq, %0, %845 : vector<16x1xi32>
    %cst_60 = arith.constant 1.000000e+00 : f32
    %847 = vector.broadcast %cst_60 : f32 to vector<1x128xf32>
    %848 = arith.addf %847, %842 : vector<1x128xf32>
    %849 = vector.shape_cast %846 : vector<16x1xi1> to vector<16x1xi1>
    %850 = vector.broadcast %849 : vector<16x1xi1> to vector<16x128xi1>
    %851 = vector.shape_cast %848 : vector<1x128xf32> to vector<1x128xf32>
    %852 = vector.broadcast %851 : vector<1x128xf32> to vector<16x128xf32>
    %853 = arith.select %850, %852, %844 : vector<16x128xi1>, vector<16x128xf32>
    %854 = vector.extract_strided_slice %778 {offsets = [9, 0], sizes = [1, 128], strides = [1, 1]} : vector<16x128xf32> to vector<1x128xf32>
    %855 = vector.broadcast %854 : vector<1x128xf32> to vector<16x128xf32>
    %856 = arith.mulf %855, %853 : vector<16x128xf32>
    %857 = arith.subf %778, %856 : vector<16x128xf32>
    %858 = vector.extract_strided_slice %782 {offsets = [9, 0], sizes = [1, 128], strides = [1, 1]} : vector<16x128xf32> to vector<1x128xf32>
    %859 = vector.broadcast %858 : vector<1x128xf32> to vector<16x128xf32>
    %860 = arith.mulf %859, %853 : vector<16x128xf32>
    %861 = arith.subf %782, %860 : vector<16x128xf32>
    %862 = vector.extract_strided_slice %786 {offsets = [9, 0], sizes = [1, 128], strides = [1, 1]} : vector<16x128xf32> to vector<1x128xf32>
    %863 = vector.broadcast %862 : vector<1x128xf32> to vector<16x128xf32>
    %864 = arith.mulf %863, %853 : vector<16x128xf32>
    %865 = arith.subf %786, %864 : vector<16x128xf32>
    %866 = vector.extract_strided_slice %790 {offsets = [9, 0], sizes = [1, 128], strides = [1, 1]} : vector<16x128xf32> to vector<1x128xf32>
    %867 = vector.broadcast %866 : vector<1x128xf32> to vector<16x128xf32>
    %868 = arith.mulf %867, %853 : vector<16x128xf32>
    %869 = arith.subf %790, %868 : vector<16x128xf32>
    %870 = vector.extract_strided_slice %794 {offsets = [9, 0], sizes = [1, 128], strides = [1, 1]} : vector<16x128xf32> to vector<1x128xf32>
    %871 = vector.broadcast %870 : vector<1x128xf32> to vector<16x128xf32>
    %872 = arith.mulf %871, %853 : vector<16x128xf32>
    %873 = arith.subf %794, %872 : vector<16x128xf32>
    %874 = vector.extract_strided_slice %798 {offsets = [9, 0], sizes = [1, 128], strides = [1, 1]} : vector<16x128xf32> to vector<1x128xf32>
    %875 = vector.broadcast %874 : vector<1x128xf32> to vector<16x128xf32>
    %876 = arith.mulf %875, %853 : vector<16x128xf32>
    %877 = arith.subf %798, %876 : vector<16x128xf32>
    %878 = vector.extract_strided_slice %802 {offsets = [9, 0], sizes = [1, 128], strides = [1, 1]} : vector<16x128xf32> to vector<1x128xf32>
    %879 = vector.broadcast %878 : vector<1x128xf32> to vector<16x128xf32>
    %880 = arith.mulf %879, %853 : vector<16x128xf32>
    %881 = arith.subf %802, %880 : vector<16x128xf32>
    %882 = vector.extract_strided_slice %806 {offsets = [9, 0], sizes = [1, 128], strides = [1, 1]} : vector<16x128xf32> to vector<1x128xf32>
    %883 = vector.broadcast %882 : vector<1x128xf32> to vector<16x128xf32>
    %884 = arith.mulf %883, %853 : vector<16x128xf32>
    %885 = arith.subf %806, %884 : vector<16x128xf32>
    %886 = vector.extract_strided_slice %839 {offsets = [9, 0], sizes = [1, 128], strides = [1, 1]} : vector<16x128xf32> to vector<1x128xf32>
    %887 = vector.broadcast %886 : vector<1x128xf32> to vector<16x128xf32>
    %888 = arith.mulf %887, %853 : vector<16x128xf32>
    %889 = arith.subf %839, %888 : vector<16x128xf32>
    %890 = vector.extract_strided_slice %814 {offsets = [9, 0], sizes = [1, 128], strides = [1, 1]} : vector<16x128xf32> to vector<1x128xf32>
    %891 = vector.broadcast %890 : vector<1x128xf32> to vector<16x128xf32>
    %892 = arith.mulf %891, %853 : vector<16x128xf32>
    %893 = arith.subf %814, %892 : vector<16x128xf32>
    %894 = vector.extract_strided_slice %818 {offsets = [9, 0], sizes = [1, 128], strides = [1, 1]} : vector<16x128xf32> to vector<1x128xf32>
    %895 = vector.broadcast %894 : vector<1x128xf32> to vector<16x128xf32>
    %896 = arith.mulf %895, %853 : vector<16x128xf32>
    %897 = arith.subf %818, %896 : vector<16x128xf32>
    %898 = vector.extract_strided_slice %822 {offsets = [9, 0], sizes = [1, 128], strides = [1, 1]} : vector<16x128xf32> to vector<1x128xf32>
    %899 = vector.broadcast %898 : vector<1x128xf32> to vector<16x128xf32>
    %900 = arith.mulf %899, %853 : vector<16x128xf32>
    %901 = arith.subf %822, %900 : vector<16x128xf32>
    %902 = vector.extract_strided_slice %826 {offsets = [9, 0], sizes = [1, 128], strides = [1, 1]} : vector<16x128xf32> to vector<1x128xf32>
    %903 = vector.broadcast %902 : vector<1x128xf32> to vector<16x128xf32>
    %904 = arith.mulf %903, %853 : vector<16x128xf32>
    %905 = arith.subf %826, %904 : vector<16x128xf32>
    %906 = vector.extract_strided_slice %830 {offsets = [9, 0], sizes = [1, 128], strides = [1, 1]} : vector<16x128xf32> to vector<1x128xf32>
    %907 = vector.broadcast %906 : vector<1x128xf32> to vector<16x128xf32>
    %908 = arith.mulf %907, %853 : vector<16x128xf32>
    %909 = arith.subf %830, %908 : vector<16x128xf32>
    %910 = vector.extract_strided_slice %834 {offsets = [9, 0], sizes = [1, 128], strides = [1, 1]} : vector<16x128xf32> to vector<1x128xf32>
    %911 = vector.broadcast %910 : vector<1x128xf32> to vector<16x128xf32>
    %912 = arith.mulf %911, %853 : vector<16x128xf32>
    %913 = arith.subf %834, %912 : vector<16x128xf32>
    %914 = vector.shape_cast %846 : vector<16x1xi1> to vector<16x1xi1>
    %915 = vector.broadcast %914 : vector<16x1xi1> to vector<16x128xi1>
    %916 = vector.shape_cast %842 : vector<1x128xf32> to vector<1x128xf32>
    %917 = vector.broadcast %916 : vector<1x128xf32> to vector<16x128xf32>
    %918 = arith.select %915, %917, %844 : vector<16x128xi1>, vector<16x128xf32>
    %919 = vector.extract_strided_slice %893 {offsets = [10, 0], sizes = [1, 128], strides = [1, 1]} : vector<16x128xf32> to vector<1x128xf32>
    %cst_61 = arith.constant 1.000000e+00 : f32
    %920 = vector.broadcast %cst_61 : f32 to vector<1x128xf32>
    %921 = arith.divf %920, %919 : vector<1x128xf32>
    %922 = vector.broadcast %921 : vector<1x128xf32> to vector<16x128xf32>
    %923 = arith.mulf %893, %922 : vector<16x128xf32>
    %c10_i32_62 = arith.constant 10 : i32
    %924 = vector.broadcast %c10_i32_62 : i32 to vector<16x1xi32>
    %925 = arith.cmpi eq, %0, %924 : vector<16x1xi32>
    %cst_63 = arith.constant 1.000000e+00 : f32
    %926 = vector.broadcast %cst_63 : f32 to vector<1x128xf32>
    %927 = arith.addf %926, %921 : vector<1x128xf32>
    %928 = vector.shape_cast %925 : vector<16x1xi1> to vector<16x1xi1>
    %929 = vector.broadcast %928 : vector<16x1xi1> to vector<16x128xi1>
    %930 = vector.shape_cast %927 : vector<1x128xf32> to vector<1x128xf32>
    %931 = vector.broadcast %930 : vector<1x128xf32> to vector<16x128xf32>
    %932 = arith.select %929, %931, %923 : vector<16x128xi1>, vector<16x128xf32>
    %933 = vector.extract_strided_slice %857 {offsets = [10, 0], sizes = [1, 128], strides = [1, 1]} : vector<16x128xf32> to vector<1x128xf32>
    %934 = vector.broadcast %933 : vector<1x128xf32> to vector<16x128xf32>
    %935 = arith.mulf %934, %932 : vector<16x128xf32>
    %936 = arith.subf %857, %935 : vector<16x128xf32>
    %937 = vector.extract_strided_slice %861 {offsets = [10, 0], sizes = [1, 128], strides = [1, 1]} : vector<16x128xf32> to vector<1x128xf32>
    %938 = vector.broadcast %937 : vector<1x128xf32> to vector<16x128xf32>
    %939 = arith.mulf %938, %932 : vector<16x128xf32>
    %940 = arith.subf %861, %939 : vector<16x128xf32>
    %941 = vector.extract_strided_slice %865 {offsets = [10, 0], sizes = [1, 128], strides = [1, 1]} : vector<16x128xf32> to vector<1x128xf32>
    %942 = vector.broadcast %941 : vector<1x128xf32> to vector<16x128xf32>
    %943 = arith.mulf %942, %932 : vector<16x128xf32>
    %944 = arith.subf %865, %943 : vector<16x128xf32>
    %945 = vector.extract_strided_slice %869 {offsets = [10, 0], sizes = [1, 128], strides = [1, 1]} : vector<16x128xf32> to vector<1x128xf32>
    %946 = vector.broadcast %945 : vector<1x128xf32> to vector<16x128xf32>
    %947 = arith.mulf %946, %932 : vector<16x128xf32>
    %948 = arith.subf %869, %947 : vector<16x128xf32>
    %949 = vector.extract_strided_slice %873 {offsets = [10, 0], sizes = [1, 128], strides = [1, 1]} : vector<16x128xf32> to vector<1x128xf32>
    %950 = vector.broadcast %949 : vector<1x128xf32> to vector<16x128xf32>
    %951 = arith.mulf %950, %932 : vector<16x128xf32>
    %952 = arith.subf %873, %951 : vector<16x128xf32>
    %953 = vector.extract_strided_slice %877 {offsets = [10, 0], sizes = [1, 128], strides = [1, 1]} : vector<16x128xf32> to vector<1x128xf32>
    %954 = vector.broadcast %953 : vector<1x128xf32> to vector<16x128xf32>
    %955 = arith.mulf %954, %932 : vector<16x128xf32>
    %956 = arith.subf %877, %955 : vector<16x128xf32>
    %957 = vector.extract_strided_slice %881 {offsets = [10, 0], sizes = [1, 128], strides = [1, 1]} : vector<16x128xf32> to vector<1x128xf32>
    %958 = vector.broadcast %957 : vector<1x128xf32> to vector<16x128xf32>
    %959 = arith.mulf %958, %932 : vector<16x128xf32>
    %960 = arith.subf %881, %959 : vector<16x128xf32>
    %961 = vector.extract_strided_slice %885 {offsets = [10, 0], sizes = [1, 128], strides = [1, 1]} : vector<16x128xf32> to vector<1x128xf32>
    %962 = vector.broadcast %961 : vector<1x128xf32> to vector<16x128xf32>
    %963 = arith.mulf %962, %932 : vector<16x128xf32>
    %964 = arith.subf %885, %963 : vector<16x128xf32>
    %965 = vector.extract_strided_slice %889 {offsets = [10, 0], sizes = [1, 128], strides = [1, 1]} : vector<16x128xf32> to vector<1x128xf32>
    %966 = vector.broadcast %965 : vector<1x128xf32> to vector<16x128xf32>
    %967 = arith.mulf %966, %932 : vector<16x128xf32>
    %968 = arith.subf %889, %967 : vector<16x128xf32>
    %969 = vector.extract_strided_slice %918 {offsets = [10, 0], sizes = [1, 128], strides = [1, 1]} : vector<16x128xf32> to vector<1x128xf32>
    %970 = vector.broadcast %969 : vector<1x128xf32> to vector<16x128xf32>
    %971 = arith.mulf %970, %932 : vector<16x128xf32>
    %972 = arith.subf %918, %971 : vector<16x128xf32>
    %973 = vector.extract_strided_slice %897 {offsets = [10, 0], sizes = [1, 128], strides = [1, 1]} : vector<16x128xf32> to vector<1x128xf32>
    %974 = vector.broadcast %973 : vector<1x128xf32> to vector<16x128xf32>
    %975 = arith.mulf %974, %932 : vector<16x128xf32>
    %976 = arith.subf %897, %975 : vector<16x128xf32>
    %977 = vector.extract_strided_slice %901 {offsets = [10, 0], sizes = [1, 128], strides = [1, 1]} : vector<16x128xf32> to vector<1x128xf32>
    %978 = vector.broadcast %977 : vector<1x128xf32> to vector<16x128xf32>
    %979 = arith.mulf %978, %932 : vector<16x128xf32>
    %980 = arith.subf %901, %979 : vector<16x128xf32>
    %981 = vector.extract_strided_slice %905 {offsets = [10, 0], sizes = [1, 128], strides = [1, 1]} : vector<16x128xf32> to vector<1x128xf32>
    %982 = vector.broadcast %981 : vector<1x128xf32> to vector<16x128xf32>
    %983 = arith.mulf %982, %932 : vector<16x128xf32>
    %984 = arith.subf %905, %983 : vector<16x128xf32>
    %985 = vector.extract_strided_slice %909 {offsets = [10, 0], sizes = [1, 128], strides = [1, 1]} : vector<16x128xf32> to vector<1x128xf32>
    %986 = vector.broadcast %985 : vector<1x128xf32> to vector<16x128xf32>
    %987 = arith.mulf %986, %932 : vector<16x128xf32>
    %988 = arith.subf %909, %987 : vector<16x128xf32>
    %989 = vector.extract_strided_slice %913 {offsets = [10, 0], sizes = [1, 128], strides = [1, 1]} : vector<16x128xf32> to vector<1x128xf32>
    %990 = vector.broadcast %989 : vector<1x128xf32> to vector<16x128xf32>
    %991 = arith.mulf %990, %932 : vector<16x128xf32>
    %992 = arith.subf %913, %991 : vector<16x128xf32>
    %993 = vector.shape_cast %925 : vector<16x1xi1> to vector<16x1xi1>
    %994 = vector.broadcast %993 : vector<16x1xi1> to vector<16x128xi1>
    %995 = vector.shape_cast %921 : vector<1x128xf32> to vector<1x128xf32>
    %996 = vector.broadcast %995 : vector<1x128xf32> to vector<16x128xf32>
    %997 = arith.select %994, %996, %923 : vector<16x128xi1>, vector<16x128xf32>
    %998 = vector.extract_strided_slice %976 {offsets = [11, 0], sizes = [1, 128], strides = [1, 1]} : vector<16x128xf32> to vector<1x128xf32>
    %cst_64 = arith.constant 1.000000e+00 : f32
    %999 = vector.broadcast %cst_64 : f32 to vector<1x128xf32>
    %1000 = arith.divf %999, %998 : vector<1x128xf32>
    %1001 = vector.broadcast %1000 : vector<1x128xf32> to vector<16x128xf32>
    %1002 = arith.mulf %976, %1001 : vector<16x128xf32>
    %c11_i32_65 = arith.constant 11 : i32
    %1003 = vector.broadcast %c11_i32_65 : i32 to vector<16x1xi32>
    %1004 = arith.cmpi eq, %0, %1003 : vector<16x1xi32>
    %cst_66 = arith.constant 1.000000e+00 : f32
    %1005 = vector.broadcast %cst_66 : f32 to vector<1x128xf32>
    %1006 = arith.addf %1005, %1000 : vector<1x128xf32>
    %1007 = vector.shape_cast %1004 : vector<16x1xi1> to vector<16x1xi1>
    %1008 = vector.broadcast %1007 : vector<16x1xi1> to vector<16x128xi1>
    %1009 = vector.shape_cast %1006 : vector<1x128xf32> to vector<1x128xf32>
    %1010 = vector.broadcast %1009 : vector<1x128xf32> to vector<16x128xf32>
    %1011 = arith.select %1008, %1010, %1002 : vector<16x128xi1>, vector<16x128xf32>
    %1012 = vector.extract_strided_slice %936 {offsets = [11, 0], sizes = [1, 128], strides = [1, 1]} : vector<16x128xf32> to vector<1x128xf32>
    %1013 = vector.broadcast %1012 : vector<1x128xf32> to vector<16x128xf32>
    %1014 = arith.mulf %1013, %1011 : vector<16x128xf32>
    %1015 = arith.subf %936, %1014 : vector<16x128xf32>
    %1016 = vector.extract_strided_slice %940 {offsets = [11, 0], sizes = [1, 128], strides = [1, 1]} : vector<16x128xf32> to vector<1x128xf32>
    %1017 = vector.broadcast %1016 : vector<1x128xf32> to vector<16x128xf32>
    %1018 = arith.mulf %1017, %1011 : vector<16x128xf32>
    %1019 = arith.subf %940, %1018 : vector<16x128xf32>
    %1020 = vector.extract_strided_slice %944 {offsets = [11, 0], sizes = [1, 128], strides = [1, 1]} : vector<16x128xf32> to vector<1x128xf32>
    %1021 = vector.broadcast %1020 : vector<1x128xf32> to vector<16x128xf32>
    %1022 = arith.mulf %1021, %1011 : vector<16x128xf32>
    %1023 = arith.subf %944, %1022 : vector<16x128xf32>
    %1024 = vector.extract_strided_slice %948 {offsets = [11, 0], sizes = [1, 128], strides = [1, 1]} : vector<16x128xf32> to vector<1x128xf32>
    %1025 = vector.broadcast %1024 : vector<1x128xf32> to vector<16x128xf32>
    %1026 = arith.mulf %1025, %1011 : vector<16x128xf32>
    %1027 = arith.subf %948, %1026 : vector<16x128xf32>
    %1028 = vector.extract_strided_slice %952 {offsets = [11, 0], sizes = [1, 128], strides = [1, 1]} : vector<16x128xf32> to vector<1x128xf32>
    %1029 = vector.broadcast %1028 : vector<1x128xf32> to vector<16x128xf32>
    %1030 = arith.mulf %1029, %1011 : vector<16x128xf32>
    %1031 = arith.subf %952, %1030 : vector<16x128xf32>
    %1032 = vector.extract_strided_slice %956 {offsets = [11, 0], sizes = [1, 128], strides = [1, 1]} : vector<16x128xf32> to vector<1x128xf32>
    %1033 = vector.broadcast %1032 : vector<1x128xf32> to vector<16x128xf32>
    %1034 = arith.mulf %1033, %1011 : vector<16x128xf32>
    %1035 = arith.subf %956, %1034 : vector<16x128xf32>
    %1036 = vector.extract_strided_slice %960 {offsets = [11, 0], sizes = [1, 128], strides = [1, 1]} : vector<16x128xf32> to vector<1x128xf32>
    %1037 = vector.broadcast %1036 : vector<1x128xf32> to vector<16x128xf32>
    %1038 = arith.mulf %1037, %1011 : vector<16x128xf32>
    %1039 = arith.subf %960, %1038 : vector<16x128xf32>
    %1040 = vector.extract_strided_slice %964 {offsets = [11, 0], sizes = [1, 128], strides = [1, 1]} : vector<16x128xf32> to vector<1x128xf32>
    %1041 = vector.broadcast %1040 : vector<1x128xf32> to vector<16x128xf32>
    %1042 = arith.mulf %1041, %1011 : vector<16x128xf32>
    %1043 = arith.subf %964, %1042 : vector<16x128xf32>
    %1044 = vector.extract_strided_slice %968 {offsets = [11, 0], sizes = [1, 128], strides = [1, 1]} : vector<16x128xf32> to vector<1x128xf32>
    %1045 = vector.broadcast %1044 : vector<1x128xf32> to vector<16x128xf32>
    %1046 = arith.mulf %1045, %1011 : vector<16x128xf32>
    %1047 = arith.subf %968, %1046 : vector<16x128xf32>
    %1048 = vector.extract_strided_slice %972 {offsets = [11, 0], sizes = [1, 128], strides = [1, 1]} : vector<16x128xf32> to vector<1x128xf32>
    %1049 = vector.broadcast %1048 : vector<1x128xf32> to vector<16x128xf32>
    %1050 = arith.mulf %1049, %1011 : vector<16x128xf32>
    %1051 = arith.subf %972, %1050 : vector<16x128xf32>
    %1052 = vector.extract_strided_slice %997 {offsets = [11, 0], sizes = [1, 128], strides = [1, 1]} : vector<16x128xf32> to vector<1x128xf32>
    %1053 = vector.broadcast %1052 : vector<1x128xf32> to vector<16x128xf32>
    %1054 = arith.mulf %1053, %1011 : vector<16x128xf32>
    %1055 = arith.subf %997, %1054 : vector<16x128xf32>
    %1056 = vector.extract_strided_slice %980 {offsets = [11, 0], sizes = [1, 128], strides = [1, 1]} : vector<16x128xf32> to vector<1x128xf32>
    %1057 = vector.broadcast %1056 : vector<1x128xf32> to vector<16x128xf32>
    %1058 = arith.mulf %1057, %1011 : vector<16x128xf32>
    %1059 = arith.subf %980, %1058 : vector<16x128xf32>
    %1060 = vector.extract_strided_slice %984 {offsets = [11, 0], sizes = [1, 128], strides = [1, 1]} : vector<16x128xf32> to vector<1x128xf32>
    %1061 = vector.broadcast %1060 : vector<1x128xf32> to vector<16x128xf32>
    %1062 = arith.mulf %1061, %1011 : vector<16x128xf32>
    %1063 = arith.subf %984, %1062 : vector<16x128xf32>
    %1064 = vector.extract_strided_slice %988 {offsets = [11, 0], sizes = [1, 128], strides = [1, 1]} : vector<16x128xf32> to vector<1x128xf32>
    %1065 = vector.broadcast %1064 : vector<1x128xf32> to vector<16x128xf32>
    %1066 = arith.mulf %1065, %1011 : vector<16x128xf32>
    %1067 = arith.subf %988, %1066 : vector<16x128xf32>
    %1068 = vector.extract_strided_slice %992 {offsets = [11, 0], sizes = [1, 128], strides = [1, 1]} : vector<16x128xf32> to vector<1x128xf32>
    %1069 = vector.broadcast %1068 : vector<1x128xf32> to vector<16x128xf32>
    %1070 = arith.mulf %1069, %1011 : vector<16x128xf32>
    %1071 = arith.subf %992, %1070 : vector<16x128xf32>
    %1072 = vector.shape_cast %1004 : vector<16x1xi1> to vector<16x1xi1>
    %1073 = vector.broadcast %1072 : vector<16x1xi1> to vector<16x128xi1>
    %1074 = vector.shape_cast %1000 : vector<1x128xf32> to vector<1x128xf32>
    %1075 = vector.broadcast %1074 : vector<1x128xf32> to vector<16x128xf32>
    %1076 = arith.select %1073, %1075, %1002 : vector<16x128xi1>, vector<16x128xf32>
    %1077 = vector.extract_strided_slice %1059 {offsets = [12, 0], sizes = [1, 128], strides = [1, 1]} : vector<16x128xf32> to vector<1x128xf32>
    %cst_67 = arith.constant 1.000000e+00 : f32
    %1078 = vector.broadcast %cst_67 : f32 to vector<1x128xf32>
    %1079 = arith.divf %1078, %1077 : vector<1x128xf32>
    %1080 = vector.broadcast %1079 : vector<1x128xf32> to vector<16x128xf32>
    %1081 = arith.mulf %1059, %1080 : vector<16x128xf32>
    %c12_i32_68 = arith.constant 12 : i32
    %1082 = vector.broadcast %c12_i32_68 : i32 to vector<16x1xi32>
    %1083 = arith.cmpi eq, %0, %1082 : vector<16x1xi32>
    %cst_69 = arith.constant 1.000000e+00 : f32
    %1084 = vector.broadcast %cst_69 : f32 to vector<1x128xf32>
    %1085 = arith.addf %1084, %1079 : vector<1x128xf32>
    %1086 = vector.shape_cast %1083 : vector<16x1xi1> to vector<16x1xi1>
    %1087 = vector.broadcast %1086 : vector<16x1xi1> to vector<16x128xi1>
    %1088 = vector.shape_cast %1085 : vector<1x128xf32> to vector<1x128xf32>
    %1089 = vector.broadcast %1088 : vector<1x128xf32> to vector<16x128xf32>
    %1090 = arith.select %1087, %1089, %1081 : vector<16x128xi1>, vector<16x128xf32>
    %1091 = vector.extract_strided_slice %1015 {offsets = [12, 0], sizes = [1, 128], strides = [1, 1]} : vector<16x128xf32> to vector<1x128xf32>
    %1092 = vector.broadcast %1091 : vector<1x128xf32> to vector<16x128xf32>
    %1093 = arith.mulf %1092, %1090 : vector<16x128xf32>
    %1094 = arith.subf %1015, %1093 : vector<16x128xf32>
    %1095 = vector.extract_strided_slice %1019 {offsets = [12, 0], sizes = [1, 128], strides = [1, 1]} : vector<16x128xf32> to vector<1x128xf32>
    %1096 = vector.broadcast %1095 : vector<1x128xf32> to vector<16x128xf32>
    %1097 = arith.mulf %1096, %1090 : vector<16x128xf32>
    %1098 = arith.subf %1019, %1097 : vector<16x128xf32>
    %1099 = vector.extract_strided_slice %1023 {offsets = [12, 0], sizes = [1, 128], strides = [1, 1]} : vector<16x128xf32> to vector<1x128xf32>
    %1100 = vector.broadcast %1099 : vector<1x128xf32> to vector<16x128xf32>
    %1101 = arith.mulf %1100, %1090 : vector<16x128xf32>
    %1102 = arith.subf %1023, %1101 : vector<16x128xf32>
    %1103 = vector.extract_strided_slice %1027 {offsets = [12, 0], sizes = [1, 128], strides = [1, 1]} : vector<16x128xf32> to vector<1x128xf32>
    %1104 = vector.broadcast %1103 : vector<1x128xf32> to vector<16x128xf32>
    %1105 = arith.mulf %1104, %1090 : vector<16x128xf32>
    %1106 = arith.subf %1027, %1105 : vector<16x128xf32>
    %1107 = vector.extract_strided_slice %1031 {offsets = [12, 0], sizes = [1, 128], strides = [1, 1]} : vector<16x128xf32> to vector<1x128xf32>
    %1108 = vector.broadcast %1107 : vector<1x128xf32> to vector<16x128xf32>
    %1109 = arith.mulf %1108, %1090 : vector<16x128xf32>
    %1110 = arith.subf %1031, %1109 : vector<16x128xf32>
    %1111 = vector.extract_strided_slice %1035 {offsets = [12, 0], sizes = [1, 128], strides = [1, 1]} : vector<16x128xf32> to vector<1x128xf32>
    %1112 = vector.broadcast %1111 : vector<1x128xf32> to vector<16x128xf32>
    %1113 = arith.mulf %1112, %1090 : vector<16x128xf32>
    %1114 = arith.subf %1035, %1113 : vector<16x128xf32>
    %1115 = vector.extract_strided_slice %1039 {offsets = [12, 0], sizes = [1, 128], strides = [1, 1]} : vector<16x128xf32> to vector<1x128xf32>
    %1116 = vector.broadcast %1115 : vector<1x128xf32> to vector<16x128xf32>
    %1117 = arith.mulf %1116, %1090 : vector<16x128xf32>
    %1118 = arith.subf %1039, %1117 : vector<16x128xf32>
    %1119 = vector.extract_strided_slice %1043 {offsets = [12, 0], sizes = [1, 128], strides = [1, 1]} : vector<16x128xf32> to vector<1x128xf32>
    %1120 = vector.broadcast %1119 : vector<1x128xf32> to vector<16x128xf32>
    %1121 = arith.mulf %1120, %1090 : vector<16x128xf32>
    %1122 = arith.subf %1043, %1121 : vector<16x128xf32>
    %1123 = vector.extract_strided_slice %1047 {offsets = [12, 0], sizes = [1, 128], strides = [1, 1]} : vector<16x128xf32> to vector<1x128xf32>
    %1124 = vector.broadcast %1123 : vector<1x128xf32> to vector<16x128xf32>
    %1125 = arith.mulf %1124, %1090 : vector<16x128xf32>
    %1126 = arith.subf %1047, %1125 : vector<16x128xf32>
    %1127 = vector.extract_strided_slice %1051 {offsets = [12, 0], sizes = [1, 128], strides = [1, 1]} : vector<16x128xf32> to vector<1x128xf32>
    %1128 = vector.broadcast %1127 : vector<1x128xf32> to vector<16x128xf32>
    %1129 = arith.mulf %1128, %1090 : vector<16x128xf32>
    %1130 = arith.subf %1051, %1129 : vector<16x128xf32>
    %1131 = vector.extract_strided_slice %1055 {offsets = [12, 0], sizes = [1, 128], strides = [1, 1]} : vector<16x128xf32> to vector<1x128xf32>
    %1132 = vector.broadcast %1131 : vector<1x128xf32> to vector<16x128xf32>
    %1133 = arith.mulf %1132, %1090 : vector<16x128xf32>
    %1134 = arith.subf %1055, %1133 : vector<16x128xf32>
    %1135 = vector.extract_strided_slice %1076 {offsets = [12, 0], sizes = [1, 128], strides = [1, 1]} : vector<16x128xf32> to vector<1x128xf32>
    %1136 = vector.broadcast %1135 : vector<1x128xf32> to vector<16x128xf32>
    %1137 = arith.mulf %1136, %1090 : vector<16x128xf32>
    %1138 = arith.subf %1076, %1137 : vector<16x128xf32>
    %1139 = vector.extract_strided_slice %1063 {offsets = [12, 0], sizes = [1, 128], strides = [1, 1]} : vector<16x128xf32> to vector<1x128xf32>
    %1140 = vector.broadcast %1139 : vector<1x128xf32> to vector<16x128xf32>
    %1141 = arith.mulf %1140, %1090 : vector<16x128xf32>
    %1142 = arith.subf %1063, %1141 : vector<16x128xf32>
    %1143 = vector.extract_strided_slice %1067 {offsets = [12, 0], sizes = [1, 128], strides = [1, 1]} : vector<16x128xf32> to vector<1x128xf32>
    %1144 = vector.broadcast %1143 : vector<1x128xf32> to vector<16x128xf32>
    %1145 = arith.mulf %1144, %1090 : vector<16x128xf32>
    %1146 = arith.subf %1067, %1145 : vector<16x128xf32>
    %1147 = vector.extract_strided_slice %1071 {offsets = [12, 0], sizes = [1, 128], strides = [1, 1]} : vector<16x128xf32> to vector<1x128xf32>
    %1148 = vector.broadcast %1147 : vector<1x128xf32> to vector<16x128xf32>
    %1149 = arith.mulf %1148, %1090 : vector<16x128xf32>
    %1150 = arith.subf %1071, %1149 : vector<16x128xf32>
    %1151 = vector.shape_cast %1083 : vector<16x1xi1> to vector<16x1xi1>
    %1152 = vector.broadcast %1151 : vector<16x1xi1> to vector<16x128xi1>
    %1153 = vector.shape_cast %1079 : vector<1x128xf32> to vector<1x128xf32>
    %1154 = vector.broadcast %1153 : vector<1x128xf32> to vector<16x128xf32>
    %1155 = arith.select %1152, %1154, %1081 : vector<16x128xi1>, vector<16x128xf32>
    %1156 = vector.extract_strided_slice %1142 {offsets = [13, 0], sizes = [1, 128], strides = [1, 1]} : vector<16x128xf32> to vector<1x128xf32>
    %cst_70 = arith.constant 1.000000e+00 : f32
    %1157 = vector.broadcast %cst_70 : f32 to vector<1x128xf32>
    %1158 = arith.divf %1157, %1156 : vector<1x128xf32>
    %1159 = vector.broadcast %1158 : vector<1x128xf32> to vector<16x128xf32>
    %1160 = arith.mulf %1142, %1159 : vector<16x128xf32>
    %c13_i32_71 = arith.constant 13 : i32
    %1161 = vector.broadcast %c13_i32_71 : i32 to vector<16x1xi32>
    %1162 = arith.cmpi eq, %0, %1161 : vector<16x1xi32>
    %cst_72 = arith.constant 1.000000e+00 : f32
    %1163 = vector.broadcast %cst_72 : f32 to vector<1x128xf32>
    %1164 = arith.addf %1163, %1158 : vector<1x128xf32>
    %1165 = vector.shape_cast %1162 : vector<16x1xi1> to vector<16x1xi1>
    %1166 = vector.broadcast %1165 : vector<16x1xi1> to vector<16x128xi1>
    %1167 = vector.shape_cast %1164 : vector<1x128xf32> to vector<1x128xf32>
    %1168 = vector.broadcast %1167 : vector<1x128xf32> to vector<16x128xf32>
    %1169 = arith.select %1166, %1168, %1160 : vector<16x128xi1>, vector<16x128xf32>
    %1170 = vector.extract_strided_slice %1094 {offsets = [13, 0], sizes = [1, 128], strides = [1, 1]} : vector<16x128xf32> to vector<1x128xf32>
    %1171 = vector.broadcast %1170 : vector<1x128xf32> to vector<16x128xf32>
    %1172 = arith.mulf %1171, %1169 : vector<16x128xf32>
    %1173 = arith.subf %1094, %1172 : vector<16x128xf32>
    %1174 = vector.extract_strided_slice %1098 {offsets = [13, 0], sizes = [1, 128], strides = [1, 1]} : vector<16x128xf32> to vector<1x128xf32>
    %1175 = vector.broadcast %1174 : vector<1x128xf32> to vector<16x128xf32>
    %1176 = arith.mulf %1175, %1169 : vector<16x128xf32>
    %1177 = arith.subf %1098, %1176 : vector<16x128xf32>
    %1178 = vector.extract_strided_slice %1102 {offsets = [13, 0], sizes = [1, 128], strides = [1, 1]} : vector<16x128xf32> to vector<1x128xf32>
    %1179 = vector.broadcast %1178 : vector<1x128xf32> to vector<16x128xf32>
    %1180 = arith.mulf %1179, %1169 : vector<16x128xf32>
    %1181 = arith.subf %1102, %1180 : vector<16x128xf32>
    %1182 = vector.extract_strided_slice %1106 {offsets = [13, 0], sizes = [1, 128], strides = [1, 1]} : vector<16x128xf32> to vector<1x128xf32>
    %1183 = vector.broadcast %1182 : vector<1x128xf32> to vector<16x128xf32>
    %1184 = arith.mulf %1183, %1169 : vector<16x128xf32>
    %1185 = arith.subf %1106, %1184 : vector<16x128xf32>
    %1186 = vector.extract_strided_slice %1110 {offsets = [13, 0], sizes = [1, 128], strides = [1, 1]} : vector<16x128xf32> to vector<1x128xf32>
    %1187 = vector.broadcast %1186 : vector<1x128xf32> to vector<16x128xf32>
    %1188 = arith.mulf %1187, %1169 : vector<16x128xf32>
    %1189 = arith.subf %1110, %1188 : vector<16x128xf32>
    %1190 = vector.extract_strided_slice %1114 {offsets = [13, 0], sizes = [1, 128], strides = [1, 1]} : vector<16x128xf32> to vector<1x128xf32>
    %1191 = vector.broadcast %1190 : vector<1x128xf32> to vector<16x128xf32>
    %1192 = arith.mulf %1191, %1169 : vector<16x128xf32>
    %1193 = arith.subf %1114, %1192 : vector<16x128xf32>
    %1194 = vector.extract_strided_slice %1118 {offsets = [13, 0], sizes = [1, 128], strides = [1, 1]} : vector<16x128xf32> to vector<1x128xf32>
    %1195 = vector.broadcast %1194 : vector<1x128xf32> to vector<16x128xf32>
    %1196 = arith.mulf %1195, %1169 : vector<16x128xf32>
    %1197 = arith.subf %1118, %1196 : vector<16x128xf32>
    %1198 = vector.extract_strided_slice %1122 {offsets = [13, 0], sizes = [1, 128], strides = [1, 1]} : vector<16x128xf32> to vector<1x128xf32>
    %1199 = vector.broadcast %1198 : vector<1x128xf32> to vector<16x128xf32>
    %1200 = arith.mulf %1199, %1169 : vector<16x128xf32>
    %1201 = arith.subf %1122, %1200 : vector<16x128xf32>
    %1202 = vector.extract_strided_slice %1126 {offsets = [13, 0], sizes = [1, 128], strides = [1, 1]} : vector<16x128xf32> to vector<1x128xf32>
    %1203 = vector.broadcast %1202 : vector<1x128xf32> to vector<16x128xf32>
    %1204 = arith.mulf %1203, %1169 : vector<16x128xf32>
    %1205 = arith.subf %1126, %1204 : vector<16x128xf32>
    %1206 = vector.extract_strided_slice %1130 {offsets = [13, 0], sizes = [1, 128], strides = [1, 1]} : vector<16x128xf32> to vector<1x128xf32>
    %1207 = vector.broadcast %1206 : vector<1x128xf32> to vector<16x128xf32>
    %1208 = arith.mulf %1207, %1169 : vector<16x128xf32>
    %1209 = arith.subf %1130, %1208 : vector<16x128xf32>
    %1210 = vector.extract_strided_slice %1134 {offsets = [13, 0], sizes = [1, 128], strides = [1, 1]} : vector<16x128xf32> to vector<1x128xf32>
    %1211 = vector.broadcast %1210 : vector<1x128xf32> to vector<16x128xf32>
    %1212 = arith.mulf %1211, %1169 : vector<16x128xf32>
    %1213 = arith.subf %1134, %1212 : vector<16x128xf32>
    %1214 = vector.extract_strided_slice %1138 {offsets = [13, 0], sizes = [1, 128], strides = [1, 1]} : vector<16x128xf32> to vector<1x128xf32>
    %1215 = vector.broadcast %1214 : vector<1x128xf32> to vector<16x128xf32>
    %1216 = arith.mulf %1215, %1169 : vector<16x128xf32>
    %1217 = arith.subf %1138, %1216 : vector<16x128xf32>
    %1218 = vector.extract_strided_slice %1155 {offsets = [13, 0], sizes = [1, 128], strides = [1, 1]} : vector<16x128xf32> to vector<1x128xf32>
    %1219 = vector.broadcast %1218 : vector<1x128xf32> to vector<16x128xf32>
    %1220 = arith.mulf %1219, %1169 : vector<16x128xf32>
    %1221 = arith.subf %1155, %1220 : vector<16x128xf32>
    %1222 = vector.extract_strided_slice %1146 {offsets = [13, 0], sizes = [1, 128], strides = [1, 1]} : vector<16x128xf32> to vector<1x128xf32>
    %1223 = vector.broadcast %1222 : vector<1x128xf32> to vector<16x128xf32>
    %1224 = arith.mulf %1223, %1169 : vector<16x128xf32>
    %1225 = arith.subf %1146, %1224 : vector<16x128xf32>
    %1226 = vector.extract_strided_slice %1150 {offsets = [13, 0], sizes = [1, 128], strides = [1, 1]} : vector<16x128xf32> to vector<1x128xf32>
    %1227 = vector.broadcast %1226 : vector<1x128xf32> to vector<16x128xf32>
    %1228 = arith.mulf %1227, %1169 : vector<16x128xf32>
    %1229 = arith.subf %1150, %1228 : vector<16x128xf32>
    %1230 = vector.shape_cast %1162 : vector<16x1xi1> to vector<16x1xi1>
    %1231 = vector.broadcast %1230 : vector<16x1xi1> to vector<16x128xi1>
    %1232 = vector.shape_cast %1158 : vector<1x128xf32> to vector<1x128xf32>
    %1233 = vector.broadcast %1232 : vector<1x128xf32> to vector<16x128xf32>
    %1234 = arith.select %1231, %1233, %1160 : vector<16x128xi1>, vector<16x128xf32>
    %1235 = vector.extract_strided_slice %1225 {offsets = [14, 0], sizes = [1, 128], strides = [1, 1]} : vector<16x128xf32> to vector<1x128xf32>
    %cst_73 = arith.constant 1.000000e+00 : f32
    %1236 = vector.broadcast %cst_73 : f32 to vector<1x128xf32>
    %1237 = arith.divf %1236, %1235 : vector<1x128xf32>
    %1238 = vector.broadcast %1237 : vector<1x128xf32> to vector<16x128xf32>
    %1239 = arith.mulf %1225, %1238 : vector<16x128xf32>
    %c14_i32_74 = arith.constant 14 : i32
    %1240 = vector.broadcast %c14_i32_74 : i32 to vector<16x1xi32>
    %1241 = arith.cmpi eq, %0, %1240 : vector<16x1xi32>
    %cst_75 = arith.constant 1.000000e+00 : f32
    %1242 = vector.broadcast %cst_75 : f32 to vector<1x128xf32>
    %1243 = arith.addf %1242, %1237 : vector<1x128xf32>
    %1244 = vector.shape_cast %1241 : vector<16x1xi1> to vector<16x1xi1>
    %1245 = vector.broadcast %1244 : vector<16x1xi1> to vector<16x128xi1>
    %1246 = vector.shape_cast %1243 : vector<1x128xf32> to vector<1x128xf32>
    %1247 = vector.broadcast %1246 : vector<1x128xf32> to vector<16x128xf32>
    %1248 = arith.select %1245, %1247, %1239 : vector<16x128xi1>, vector<16x128xf32>
    %1249 = vector.extract_strided_slice %1173 {offsets = [14, 0], sizes = [1, 128], strides = [1, 1]} : vector<16x128xf32> to vector<1x128xf32>
    %1250 = vector.broadcast %1249 : vector<1x128xf32> to vector<16x128xf32>
    %1251 = arith.mulf %1250, %1248 : vector<16x128xf32>
    %1252 = arith.subf %1173, %1251 : vector<16x128xf32>
    %1253 = vector.extract_strided_slice %1177 {offsets = [14, 0], sizes = [1, 128], strides = [1, 1]} : vector<16x128xf32> to vector<1x128xf32>
    %1254 = vector.broadcast %1253 : vector<1x128xf32> to vector<16x128xf32>
    %1255 = arith.mulf %1254, %1248 : vector<16x128xf32>
    %1256 = arith.subf %1177, %1255 : vector<16x128xf32>
    %1257 = vector.extract_strided_slice %1181 {offsets = [14, 0], sizes = [1, 128], strides = [1, 1]} : vector<16x128xf32> to vector<1x128xf32>
    %1258 = vector.broadcast %1257 : vector<1x128xf32> to vector<16x128xf32>
    %1259 = arith.mulf %1258, %1248 : vector<16x128xf32>
    %1260 = arith.subf %1181, %1259 : vector<16x128xf32>
    %1261 = vector.extract_strided_slice %1185 {offsets = [14, 0], sizes = [1, 128], strides = [1, 1]} : vector<16x128xf32> to vector<1x128xf32>
    %1262 = vector.broadcast %1261 : vector<1x128xf32> to vector<16x128xf32>
    %1263 = arith.mulf %1262, %1248 : vector<16x128xf32>
    %1264 = arith.subf %1185, %1263 : vector<16x128xf32>
    %1265 = vector.extract_strided_slice %1189 {offsets = [14, 0], sizes = [1, 128], strides = [1, 1]} : vector<16x128xf32> to vector<1x128xf32>
    %1266 = vector.broadcast %1265 : vector<1x128xf32> to vector<16x128xf32>
    %1267 = arith.mulf %1266, %1248 : vector<16x128xf32>
    %1268 = arith.subf %1189, %1267 : vector<16x128xf32>
    %1269 = vector.extract_strided_slice %1193 {offsets = [14, 0], sizes = [1, 128], strides = [1, 1]} : vector<16x128xf32> to vector<1x128xf32>
    %1270 = vector.broadcast %1269 : vector<1x128xf32> to vector<16x128xf32>
    %1271 = arith.mulf %1270, %1248 : vector<16x128xf32>
    %1272 = arith.subf %1193, %1271 : vector<16x128xf32>
    %1273 = vector.extract_strided_slice %1197 {offsets = [14, 0], sizes = [1, 128], strides = [1, 1]} : vector<16x128xf32> to vector<1x128xf32>
    %1274 = vector.broadcast %1273 : vector<1x128xf32> to vector<16x128xf32>
    %1275 = arith.mulf %1274, %1248 : vector<16x128xf32>
    %1276 = arith.subf %1197, %1275 : vector<16x128xf32>
    %1277 = vector.extract_strided_slice %1201 {offsets = [14, 0], sizes = [1, 128], strides = [1, 1]} : vector<16x128xf32> to vector<1x128xf32>
    %1278 = vector.broadcast %1277 : vector<1x128xf32> to vector<16x128xf32>
    %1279 = arith.mulf %1278, %1248 : vector<16x128xf32>
    %1280 = arith.subf %1201, %1279 : vector<16x128xf32>
    %1281 = vector.extract_strided_slice %1205 {offsets = [14, 0], sizes = [1, 128], strides = [1, 1]} : vector<16x128xf32> to vector<1x128xf32>
    %1282 = vector.broadcast %1281 : vector<1x128xf32> to vector<16x128xf32>
    %1283 = arith.mulf %1282, %1248 : vector<16x128xf32>
    %1284 = arith.subf %1205, %1283 : vector<16x128xf32>
    %1285 = vector.extract_strided_slice %1209 {offsets = [14, 0], sizes = [1, 128], strides = [1, 1]} : vector<16x128xf32> to vector<1x128xf32>
    %1286 = vector.broadcast %1285 : vector<1x128xf32> to vector<16x128xf32>
    %1287 = arith.mulf %1286, %1248 : vector<16x128xf32>
    %1288 = arith.subf %1209, %1287 : vector<16x128xf32>
    %1289 = vector.extract_strided_slice %1213 {offsets = [14, 0], sizes = [1, 128], strides = [1, 1]} : vector<16x128xf32> to vector<1x128xf32>
    %1290 = vector.broadcast %1289 : vector<1x128xf32> to vector<16x128xf32>
    %1291 = arith.mulf %1290, %1248 : vector<16x128xf32>
    %1292 = arith.subf %1213, %1291 : vector<16x128xf32>
    %1293 = vector.extract_strided_slice %1217 {offsets = [14, 0], sizes = [1, 128], strides = [1, 1]} : vector<16x128xf32> to vector<1x128xf32>
    %1294 = vector.broadcast %1293 : vector<1x128xf32> to vector<16x128xf32>
    %1295 = arith.mulf %1294, %1248 : vector<16x128xf32>
    %1296 = arith.subf %1217, %1295 : vector<16x128xf32>
    %1297 = vector.extract_strided_slice %1221 {offsets = [14, 0], sizes = [1, 128], strides = [1, 1]} : vector<16x128xf32> to vector<1x128xf32>
    %1298 = vector.broadcast %1297 : vector<1x128xf32> to vector<16x128xf32>
    %1299 = arith.mulf %1298, %1248 : vector<16x128xf32>
    %1300 = arith.subf %1221, %1299 : vector<16x128xf32>
    %1301 = vector.extract_strided_slice %1234 {offsets = [14, 0], sizes = [1, 128], strides = [1, 1]} : vector<16x128xf32> to vector<1x128xf32>
    %1302 = vector.broadcast %1301 : vector<1x128xf32> to vector<16x128xf32>
    %1303 = arith.mulf %1302, %1248 : vector<16x128xf32>
    %1304 = arith.subf %1234, %1303 : vector<16x128xf32>
    %1305 = vector.extract_strided_slice %1229 {offsets = [14, 0], sizes = [1, 128], strides = [1, 1]} : vector<16x128xf32> to vector<1x128xf32>
    %1306 = vector.broadcast %1305 : vector<1x128xf32> to vector<16x128xf32>
    %1307 = arith.mulf %1306, %1248 : vector<16x128xf32>
    %1308 = arith.subf %1229, %1307 : vector<16x128xf32>
    %1309 = vector.shape_cast %1241 : vector<16x1xi1> to vector<16x1xi1>
    %1310 = vector.broadcast %1309 : vector<16x1xi1> to vector<16x128xi1>
    %1311 = vector.shape_cast %1237 : vector<1x128xf32> to vector<1x128xf32>
    %1312 = vector.broadcast %1311 : vector<1x128xf32> to vector<16x128xf32>
    %1313 = arith.select %1310, %1312, %1239 : vector<16x128xi1>, vector<16x128xf32>
    %1314 = vector.extract_strided_slice %1308 {offsets = [15, 0], sizes = [1, 128], strides = [1, 1]} : vector<16x128xf32> to vector<1x128xf32>
    %cst_76 = arith.constant 1.000000e+00 : f32
    %1315 = vector.broadcast %cst_76 : f32 to vector<1x128xf32>
    %1316 = arith.divf %1315, %1314 : vector<1x128xf32>
    %1317 = vector.broadcast %1316 : vector<1x128xf32> to vector<16x128xf32>
    %1318 = arith.mulf %1308, %1317 : vector<16x128xf32>
    %c15_i32_77 = arith.constant 15 : i32
    %1319 = vector.broadcast %c15_i32_77 : i32 to vector<16x1xi32>
    %1320 = arith.cmpi eq, %0, %1319 : vector<16x1xi32>
    %cst_78 = arith.constant 1.000000e+00 : f32
    %1321 = vector.broadcast %cst_78 : f32 to vector<1x128xf32>
    %1322 = arith.addf %1321, %1316 : vector<1x128xf32>
    %1323 = vector.shape_cast %1320 : vector<16x1xi1> to vector<16x1xi1>
    %1324 = vector.broadcast %1323 : vector<16x1xi1> to vector<16x128xi1>
    %1325 = vector.shape_cast %1322 : vector<1x128xf32> to vector<1x128xf32>
    %1326 = vector.broadcast %1325 : vector<1x128xf32> to vector<16x128xf32>
    %1327 = arith.select %1324, %1326, %1318 : vector<16x128xi1>, vector<16x128xf32>
    %1328 = vector.extract_strided_slice %1252 {offsets = [15, 0], sizes = [1, 128], strides = [1, 1]} : vector<16x128xf32> to vector<1x128xf32>
    %1329 = vector.broadcast %1328 : vector<1x128xf32> to vector<16x128xf32>
    %1330 = arith.mulf %1329, %1327 : vector<16x128xf32>
    %1331 = arith.subf %1252, %1330 : vector<16x128xf32>
    %1332 = vector.extract_strided_slice %1256 {offsets = [15, 0], sizes = [1, 128], strides = [1, 1]} : vector<16x128xf32> to vector<1x128xf32>
    %1333 = vector.broadcast %1332 : vector<1x128xf32> to vector<16x128xf32>
    %1334 = arith.mulf %1333, %1327 : vector<16x128xf32>
    %1335 = arith.subf %1256, %1334 : vector<16x128xf32>
    %1336 = vector.extract_strided_slice %1260 {offsets = [15, 0], sizes = [1, 128], strides = [1, 1]} : vector<16x128xf32> to vector<1x128xf32>
    %1337 = vector.broadcast %1336 : vector<1x128xf32> to vector<16x128xf32>
    %1338 = arith.mulf %1337, %1327 : vector<16x128xf32>
    %1339 = arith.subf %1260, %1338 : vector<16x128xf32>
    %1340 = vector.extract_strided_slice %1264 {offsets = [15, 0], sizes = [1, 128], strides = [1, 1]} : vector<16x128xf32> to vector<1x128xf32>
    %1341 = vector.broadcast %1340 : vector<1x128xf32> to vector<16x128xf32>
    %1342 = arith.mulf %1341, %1327 : vector<16x128xf32>
    %1343 = arith.subf %1264, %1342 : vector<16x128xf32>
    %1344 = vector.extract_strided_slice %1268 {offsets = [15, 0], sizes = [1, 128], strides = [1, 1]} : vector<16x128xf32> to vector<1x128xf32>
    %1345 = vector.broadcast %1344 : vector<1x128xf32> to vector<16x128xf32>
    %1346 = arith.mulf %1345, %1327 : vector<16x128xf32>
    %1347 = arith.subf %1268, %1346 : vector<16x128xf32>
    %1348 = vector.extract_strided_slice %1272 {offsets = [15, 0], sizes = [1, 128], strides = [1, 1]} : vector<16x128xf32> to vector<1x128xf32>
    %1349 = vector.broadcast %1348 : vector<1x128xf32> to vector<16x128xf32>
    %1350 = arith.mulf %1349, %1327 : vector<16x128xf32>
    %1351 = arith.subf %1272, %1350 : vector<16x128xf32>
    %1352 = vector.extract_strided_slice %1276 {offsets = [15, 0], sizes = [1, 128], strides = [1, 1]} : vector<16x128xf32> to vector<1x128xf32>
    %1353 = vector.broadcast %1352 : vector<1x128xf32> to vector<16x128xf32>
    %1354 = arith.mulf %1353, %1327 : vector<16x128xf32>
    %1355 = arith.subf %1276, %1354 : vector<16x128xf32>
    %1356 = vector.extract_strided_slice %1280 {offsets = [15, 0], sizes = [1, 128], strides = [1, 1]} : vector<16x128xf32> to vector<1x128xf32>
    %1357 = vector.broadcast %1356 : vector<1x128xf32> to vector<16x128xf32>
    %1358 = arith.mulf %1357, %1327 : vector<16x128xf32>
    %1359 = arith.subf %1280, %1358 : vector<16x128xf32>
    %1360 = vector.extract_strided_slice %1284 {offsets = [15, 0], sizes = [1, 128], strides = [1, 1]} : vector<16x128xf32> to vector<1x128xf32>
    %1361 = vector.broadcast %1360 : vector<1x128xf32> to vector<16x128xf32>
    %1362 = arith.mulf %1361, %1327 : vector<16x128xf32>
    %1363 = arith.subf %1284, %1362 : vector<16x128xf32>
    %1364 = vector.extract_strided_slice %1288 {offsets = [15, 0], sizes = [1, 128], strides = [1, 1]} : vector<16x128xf32> to vector<1x128xf32>
    %1365 = vector.broadcast %1364 : vector<1x128xf32> to vector<16x128xf32>
    %1366 = arith.mulf %1365, %1327 : vector<16x128xf32>
    %1367 = arith.subf %1288, %1366 : vector<16x128xf32>
    %1368 = vector.extract_strided_slice %1292 {offsets = [15, 0], sizes = [1, 128], strides = [1, 1]} : vector<16x128xf32> to vector<1x128xf32>
    %1369 = vector.broadcast %1368 : vector<1x128xf32> to vector<16x128xf32>
    %1370 = arith.mulf %1369, %1327 : vector<16x128xf32>
    %1371 = arith.subf %1292, %1370 : vector<16x128xf32>
    %1372 = vector.extract_strided_slice %1296 {offsets = [15, 0], sizes = [1, 128], strides = [1, 1]} : vector<16x128xf32> to vector<1x128xf32>
    %1373 = vector.broadcast %1372 : vector<1x128xf32> to vector<16x128xf32>
    %1374 = arith.mulf %1373, %1327 : vector<16x128xf32>
    %1375 = arith.subf %1296, %1374 : vector<16x128xf32>
    %1376 = vector.extract_strided_slice %1300 {offsets = [15, 0], sizes = [1, 128], strides = [1, 1]} : vector<16x128xf32> to vector<1x128xf32>
    %1377 = vector.broadcast %1376 : vector<1x128xf32> to vector<16x128xf32>
    %1378 = arith.mulf %1377, %1327 : vector<16x128xf32>
    %1379 = arith.subf %1300, %1378 : vector<16x128xf32>
    %1380 = vector.extract_strided_slice %1304 {offsets = [15, 0], sizes = [1, 128], strides = [1, 1]} : vector<16x128xf32> to vector<1x128xf32>
    %1381 = vector.broadcast %1380 : vector<1x128xf32> to vector<16x128xf32>
    %1382 = arith.mulf %1381, %1327 : vector<16x128xf32>
    %1383 = arith.subf %1304, %1382 : vector<16x128xf32>
    %1384 = vector.extract_strided_slice %1313 {offsets = [15, 0], sizes = [1, 128], strides = [1, 1]} : vector<16x128xf32> to vector<1x128xf32>
    %1385 = vector.broadcast %1384 : vector<1x128xf32> to vector<16x128xf32>
    %1386 = arith.mulf %1385, %1327 : vector<16x128xf32>
    %1387 = arith.subf %1313, %1386 : vector<16x128xf32>
    %1388 = vector.shape_cast %1320 : vector<16x1xi1> to vector<16x1xi1>
    %1389 = vector.broadcast %1388 : vector<16x1xi1> to vector<16x128xi1>
    %1390 = vector.shape_cast %1316 : vector<1x128xf32> to vector<1x128xf32>
    %1391 = vector.broadcast %1390 : vector<1x128xf32> to vector<16x128xf32>
    %1392 = arith.select %1389, %1391, %1318 : vector<16x128xi1>, vector<16x128xf32>
    %cst_79 = arith.constant 2.000000e+00 : f32
    %1393 = vector.broadcast %cst_79 : f32 to vector<16x128xf32>
    %1394 = arith.mulf %1393, %1331 : vector<16x128xf32>
    %1395 = vector.broadcast %4 : vector<16x1xf32> to vector<16x128xf32>
    %1396 = arith.subf %1394, %1395 : vector<16x128xf32>
    %c0_80 = arith.constant 0 : index
    %c0_81 = arith.constant 0 : index
    %c0_82 = arith.constant 0 : index
    %1397 = vector.load %arg2[%c0_80, %c0_81, %c0_82] : memref<16x16x128xf32, #tpu.memory_space<vmem>>, vector<1x16x128xf32>
    %1398 = vector.shape_cast %1397 : vector<1x16x128xf32> to vector<16x128xf32>
    %1399 = vector.shape_cast %1396 : vector<16x128xf32> to vector<1x16x128xf32>
    tpu.vector_store %arg2[%c0_80, %c0_81, %c0_82], %1399 {strides = array<i32>} : memref<16x16x128xf32, #tpu.memory_space<vmem>>, vector<1x16x128xf32>,
    %cst_83 = arith.constant 2.000000e+00 : f32
    %1400 = vector.broadcast %cst_83 : f32 to vector<16x128xf32>
    %1401 = arith.mulf %1400, %1335 : vector<16x128xf32>
    %1402 = vector.broadcast %8 : vector<16x1xf32> to vector<16x128xf32>
    %1403 = arith.subf %1401, %1402 : vector<16x128xf32>
    %c1_84 = arith.constant 1 : index
    %c0_85 = arith.constant 0 : index
    %c0_86 = arith.constant 0 : index
    %1404 = vector.load %arg2[%c1_84, %c0_85, %c0_86] : memref<16x16x128xf32, #tpu.memory_space<vmem>>, vector<1x16x128xf32>
    %1405 = vector.shape_cast %1404 : vector<1x16x128xf32> to vector<16x128xf32>
    %1406 = vector.shape_cast %1403 : vector<16x128xf32> to vector<1x16x128xf32>
    tpu.vector_store %arg2[%c1_84, %c0_85, %c0_86], %1406 {strides = array<i32>} : memref<16x16x128xf32, #tpu.memory_space<vmem>>, vector<1x16x128xf32>,
    %cst_87 = arith.constant 2.000000e+00 : f32
    %1407 = vector.broadcast %cst_87 : f32 to vector<16x128xf32>
    %1408 = arith.mulf %1407, %1339 : vector<16x128xf32>
    %1409 = vector.broadcast %12 : vector<16x1xf32> to vector<16x128xf32>
    %1410 = arith.subf %1408, %1409 : vector<16x128xf32>
    %c2_88 = arith.constant 2 : index
    %c0_89 = arith.constant 0 : index
    %c0_90 = arith.constant 0 : index
    %1411 = vector.load %arg2[%c2_88, %c0_89, %c0_90] : memref<16x16x128xf32, #tpu.memory_space<vmem>>, vector<1x16x128xf32>
    %1412 = vector.shape_cast %1411 : vector<1x16x128xf32> to vector<16x128xf32>
    %1413 = vector.shape_cast %1410 : vector<16x128xf32> to vector<1x16x128xf32>
    tpu.vector_store %arg2[%c2_88, %c0_89, %c0_90], %1413 {strides = array<i32>} : memref<16x16x128xf32, #tpu.memory_space<vmem>>, vector<1x16x128xf32>,
    %cst_91 = arith.constant 2.000000e+00 : f32
    %1414 = vector.broadcast %cst_91 : f32 to vector<16x128xf32>
    %1415 = arith.mulf %1414, %1343 : vector<16x128xf32>
    %1416 = vector.broadcast %16 : vector<16x1xf32> to vector<16x128xf32>
    %1417 = arith.subf %1415, %1416 : vector<16x128xf32>
    %c3_92 = arith.constant 3 : index
    %c0_93 = arith.constant 0 : index
    %c0_94 = arith.constant 0 : index
    %1418 = vector.load %arg2[%c3_92, %c0_93, %c0_94] : memref<16x16x128xf32, #tpu.memory_space<vmem>>, vector<1x16x128xf32>
    %1419 = vector.shape_cast %1418 : vector<1x16x128xf32> to vector<16x128xf32>
    %1420 = vector.shape_cast %1417 : vector<16x128xf32> to vector<1x16x128xf32>
    tpu.vector_store %arg2[%c3_92, %c0_93, %c0_94], %1420 {strides = array<i32>} : memref<16x16x128xf32, #tpu.memory_space<vmem>>, vector<1x16x128xf32>,
    %cst_95 = arith.constant 2.000000e+00 : f32
    %1421 = vector.broadcast %cst_95 : f32 to vector<16x128xf32>
    %1422 = arith.mulf %1421, %1347 : vector<16x128xf32>
    %1423 = vector.broadcast %20 : vector<16x1xf32> to vector<16x128xf32>
    %1424 = arith.subf %1422, %1423 : vector<16x128xf32>
    %c4_96 = arith.constant 4 : index
    %c0_97 = arith.constant 0 : index
    %c0_98 = arith.constant 0 : index
    %1425 = vector.load %arg2[%c4_96, %c0_97, %c0_98] : memref<16x16x128xf32, #tpu.memory_space<vmem>>, vector<1x16x128xf32>
    %1426 = vector.shape_cast %1425 : vector<1x16x128xf32> to vector<16x128xf32>
    %1427 = vector.shape_cast %1424 : vector<16x128xf32> to vector<1x16x128xf32>
    tpu.vector_store %arg2[%c4_96, %c0_97, %c0_98], %1427 {strides = array<i32>} : memref<16x16x128xf32, #tpu.memory_space<vmem>>, vector<1x16x128xf32>,
    %cst_99 = arith.constant 2.000000e+00 : f32
    %1428 = vector.broadcast %cst_99 : f32 to vector<16x128xf32>
    %1429 = arith.mulf %1428, %1351 : vector<16x128xf32>
    %1430 = vector.broadcast %24 : vector<16x1xf32> to vector<16x128xf32>
    %1431 = arith.subf %1429, %1430 : vector<16x128xf32>
    %c5_100 = arith.constant 5 : index
    %c0_101 = arith.constant 0 : index
    %c0_102 = arith.constant 0 : index
    %1432 = vector.load %arg2[%c5_100, %c0_101, %c0_102] : memref<16x16x128xf32, #tpu.memory_space<vmem>>, vector<1x16x128xf32>
    %1433 = vector.shape_cast %1432 : vector<1x16x128xf32> to vector<16x128xf32>
    %1434 = vector.shape_cast %1431 : vector<16x128xf32> to vector<1x16x128xf32>
    tpu.vector_store %arg2[%c5_100, %c0_101, %c0_102], %1434 {strides = array<i32>} : memref<16x16x128xf32, #tpu.memory_space<vmem>>, vector<1x16x128xf32>,
    %cst_103 = arith.constant 2.000000e+00 : f32
    %1435 = vector.broadcast %cst_103 : f32 to vector<16x128xf32>
    %1436 = arith.mulf %1435, %1355 : vector<16x128xf32>
    %1437 = vector.broadcast %28 : vector<16x1xf32> to vector<16x128xf32>
    %1438 = arith.subf %1436, %1437 : vector<16x128xf32>
    %c6_104 = arith.constant 6 : index
    %c0_105 = arith.constant 0 : index
    %c0_106 = arith.constant 0 : index
    %1439 = vector.load %arg2[%c6_104, %c0_105, %c0_106] : memref<16x16x128xf32, #tpu.memory_space<vmem>>, vector<1x16x128xf32>
    %1440 = vector.shape_cast %1439 : vector<1x16x128xf32> to vector<16x128xf32>
    %1441 = vector.shape_cast %1438 : vector<16x128xf32> to vector<1x16x128xf32>
    tpu.vector_store %arg2[%c6_104, %c0_105, %c0_106], %1441 {strides = array<i32>} : memref<16x16x128xf32, #tpu.memory_space<vmem>>, vector<1x16x128xf32>,
    %cst_107 = arith.constant 2.000000e+00 : f32
    %1442 = vector.broadcast %cst_107 : f32 to vector<16x128xf32>
    %1443 = arith.mulf %1442, %1359 : vector<16x128xf32>
    %1444 = vector.broadcast %32 : vector<16x1xf32> to vector<16x128xf32>
    %1445 = arith.subf %1443, %1444 : vector<16x128xf32>
    %c7_108 = arith.constant 7 : index
    %c0_109 = arith.constant 0 : index
    %c0_110 = arith.constant 0 : index
    %1446 = vector.load %arg2[%c7_108, %c0_109, %c0_110] : memref<16x16x128xf32, #tpu.memory_space<vmem>>, vector<1x16x128xf32>
    %1447 = vector.shape_cast %1446 : vector<1x16x128xf32> to vector<16x128xf32>
    %1448 = vector.shape_cast %1445 : vector<16x128xf32> to vector<1x16x128xf32>
    tpu.vector_store %arg2[%c7_108, %c0_109, %c0_110], %1448 {strides = array<i32>} : memref<16x16x128xf32, #tpu.memory_space<vmem>>, vector<1x16x128xf32>,
    %cst_111 = arith.constant 2.000000e+00 : f32
    %1449 = vector.broadcast %cst_111 : f32 to vector<16x128xf32>
    %1450 = arith.mulf %1449, %1363 : vector<16x128xf32>
    %1451 = vector.broadcast %36 : vector<16x1xf32> to vector<16x128xf32>
    %1452 = arith.subf %1450, %1451 : vector<16x128xf32>
    %c8_112 = arith.constant 8 : index
    %c0_113 = arith.constant 0 : index
    %c0_114 = arith.constant 0 : index
    %1453 = vector.load %arg2[%c8_112, %c0_113, %c0_114] : memref<16x16x128xf32, #tpu.memory_space<vmem>>, vector<1x16x128xf32>
    %1454 = vector.shape_cast %1453 : vector<1x16x128xf32> to vector<16x128xf32>
    %1455 = vector.shape_cast %1452 : vector<16x128xf32> to vector<1x16x128xf32>
    tpu.vector_store %arg2[%c8_112, %c0_113, %c0_114], %1455 {strides = array<i32>} : memref<16x16x128xf32, #tpu.memory_space<vmem>>, vector<1x16x128xf32>,
    %cst_115 = arith.constant 2.000000e+00 : f32
    %1456 = vector.broadcast %cst_115 : f32 to vector<16x128xf32>
    %1457 = arith.mulf %1456, %1367 : vector<16x128xf32>
    %1458 = vector.broadcast %40 : vector<16x1xf32> to vector<16x128xf32>
    %1459 = arith.subf %1457, %1458 : vector<16x128xf32>
    %c9_116 = arith.constant 9 : index
    %c0_117 = arith.constant 0 : index
    %c0_118 = arith.constant 0 : index
    %1460 = vector.load %arg2[%c9_116, %c0_117, %c0_118] : memref<16x16x128xf32, #tpu.memory_space<vmem>>, vector<1x16x128xf32>
    %1461 = vector.shape_cast %1460 : vector<1x16x128xf32> to vector<16x128xf32>
    %1462 = vector.shape_cast %1459 : vector<16x128xf32> to vector<1x16x128xf32>
    tpu.vector_store %arg2[%c9_116, %c0_117, %c0_118], %1462 {strides = array<i32>} : memref<16x16x128xf32, #tpu.memory_space<vmem>>, vector<1x16x128xf32>,
    %cst_119 = arith.constant 2.000000e+00 : f32
    %1463 = vector.broadcast %cst_119 : f32 to vector<16x128xf32>
    %1464 = arith.mulf %1463, %1371 : vector<16x128xf32>
    %1465 = vector.broadcast %44 : vector<16x1xf32> to vector<16x128xf32>
    %1466 = arith.subf %1464, %1465 : vector<16x128xf32>
    %c10_120 = arith.constant 10 : index
    %c0_121 = arith.constant 0 : index
    %c0_122 = arith.constant 0 : index
    %1467 = vector.load %arg2[%c10_120, %c0_121, %c0_122] : memref<16x16x128xf32, #tpu.memory_space<vmem>>, vector<1x16x128xf32>
    %1468 = vector.shape_cast %1467 : vector<1x16x128xf32> to vector<16x128xf32>
    %1469 = vector.shape_cast %1466 : vector<16x128xf32> to vector<1x16x128xf32>
    tpu.vector_store %arg2[%c10_120, %c0_121, %c0_122], %1469 {strides = array<i32>} : memref<16x16x128xf32, #tpu.memory_space<vmem>>, vector<1x16x128xf32>,
    %cst_123 = arith.constant 2.000000e+00 : f32
    %1470 = vector.broadcast %cst_123 : f32 to vector<16x128xf32>
    %1471 = arith.mulf %1470, %1375 : vector<16x128xf32>
    %1472 = vector.broadcast %48 : vector<16x1xf32> to vector<16x128xf32>
    %1473 = arith.subf %1471, %1472 : vector<16x128xf32>
    %c11_124 = arith.constant 11 : index
    %c0_125 = arith.constant 0 : index
    %c0_126 = arith.constant 0 : index
    %1474 = vector.load %arg2[%c11_124, %c0_125, %c0_126] : memref<16x16x128xf32, #tpu.memory_space<vmem>>, vector<1x16x128xf32>
    %1475 = vector.shape_cast %1474 : vector<1x16x128xf32> to vector<16x128xf32>
    %1476 = vector.shape_cast %1473 : vector<16x128xf32> to vector<1x16x128xf32>
    tpu.vector_store %arg2[%c11_124, %c0_125, %c0_126], %1476 {strides = array<i32>} : memref<16x16x128xf32, #tpu.memory_space<vmem>>, vector<1x16x128xf32>,
    %cst_127 = arith.constant 2.000000e+00 : f32
    %1477 = vector.broadcast %cst_127 : f32 to vector<16x128xf32>
    %1478 = arith.mulf %1477, %1379 : vector<16x128xf32>
    %1479 = vector.broadcast %52 : vector<16x1xf32> to vector<16x128xf32>
    %1480 = arith.subf %1478, %1479 : vector<16x128xf32>
    %c12_128 = arith.constant 12 : index
    %c0_129 = arith.constant 0 : index
    %c0_130 = arith.constant 0 : index
    %1481 = vector.load %arg2[%c12_128, %c0_129, %c0_130] : memref<16x16x128xf32, #tpu.memory_space<vmem>>, vector<1x16x128xf32>
    %1482 = vector.shape_cast %1481 : vector<1x16x128xf32> to vector<16x128xf32>
    %1483 = vector.shape_cast %1480 : vector<16x128xf32> to vector<1x16x128xf32>
    tpu.vector_store %arg2[%c12_128, %c0_129, %c0_130], %1483 {strides = array<i32>} : memref<16x16x128xf32, #tpu.memory_space<vmem>>, vector<1x16x128xf32>,
    %cst_131 = arith.constant 2.000000e+00 : f32
    %1484 = vector.broadcast %cst_131 : f32 to vector<16x128xf32>
    %1485 = arith.mulf %1484, %1383 : vector<16x128xf32>
    %1486 = vector.broadcast %56 : vector<16x1xf32> to vector<16x128xf32>
    %1487 = arith.subf %1485, %1486 : vector<16x128xf32>
    %c13_132 = arith.constant 13 : index
    %c0_133 = arith.constant 0 : index
    %c0_134 = arith.constant 0 : index
    %1488 = vector.load %arg2[%c13_132, %c0_133, %c0_134] : memref<16x16x128xf32, #tpu.memory_space<vmem>>, vector<1x16x128xf32>
    %1489 = vector.shape_cast %1488 : vector<1x16x128xf32> to vector<16x128xf32>
    %1490 = vector.shape_cast %1487 : vector<16x128xf32> to vector<1x16x128xf32>
    tpu.vector_store %arg2[%c13_132, %c0_133, %c0_134], %1490 {strides = array<i32>} : memref<16x16x128xf32, #tpu.memory_space<vmem>>, vector<1x16x128xf32>,
    %cst_135 = arith.constant 2.000000e+00 : f32
    %1491 = vector.broadcast %cst_135 : f32 to vector<16x128xf32>
    %1492 = arith.mulf %1491, %1387 : vector<16x128xf32>
    %1493 = vector.broadcast %60 : vector<16x1xf32> to vector<16x128xf32>
    %1494 = arith.subf %1492, %1493 : vector<16x128xf32>
    %c14_136 = arith.constant 14 : index
    %c0_137 = arith.constant 0 : index
    %c0_138 = arith.constant 0 : index
    %1495 = vector.load %arg2[%c14_136, %c0_137, %c0_138] : memref<16x16x128xf32, #tpu.memory_space<vmem>>, vector<1x16x128xf32>
    %1496 = vector.shape_cast %1495 : vector<1x16x128xf32> to vector<16x128xf32>
    %1497 = vector.shape_cast %1494 : vector<16x128xf32> to vector<1x16x128xf32>
    tpu.vector_store %arg2[%c14_136, %c0_137, %c0_138], %1497 {strides = array<i32>} : memref<16x16x128xf32, #tpu.memory_space<vmem>>, vector<1x16x128xf32>,
    %cst_139 = arith.constant 2.000000e+00 : f32
    %1498 = vector.broadcast %cst_139 : f32 to vector<16x128xf32>
    %1499 = arith.mulf %1498, %1392 : vector<16x128xf32>
    %1500 = vector.broadcast %64 : vector<16x1xf32> to vector<16x128xf32>
    %1501 = arith.subf %1499, %1500 : vector<16x128xf32>
    %c15_140 = arith.constant 15 : index
    %c0_141 = arith.constant 0 : index
    %c0_142 = arith.constant 0 : index
    %1502 = vector.load %arg2[%c15_140, %c0_141, %c0_142] : memref<16x16x128xf32, #tpu.memory_space<vmem>>, vector<1x16x128xf32>
    %1503 = vector.shape_cast %1502 : vector<1x16x128xf32> to vector<16x128xf32>
    %1504 = vector.shape_cast %1501 : vector<16x128xf32> to vector<1x16x128xf32>
    tpu.vector_store %arg2[%c15_140, %c0_141, %c0_142], %1504 {strides = array<i32>} : memref<16x16x128xf32, #tpu.memory_space<vmem>>, vector<1x16x128xf32>,
    return
  }
  func.func @transform_0(%arg0: i32) -> (i32, i32, i32) {
    %c0_i32 = arith.constant 0 : i32
    %c0_i32_0 = arith.constant 0 : i32
    %c0_i32_1 = arith.constant 0 : i32
    return %c0_i32, %c0_i32_0, %arg0 : i32, i32, i32
  }
  func.func @transform_1(%arg0: i32) -> (i32, i32, i32) {
    %c0_i32 = arith.constant 0 : i32
    %c0_i32_0 = arith.constant 0 : i32
    %c0_i32_1 = arith.constant 0 : i32
    return %c0_i32, %c0_i32_0, %arg0 : i32, i32, i32
  }
}

</mosaic_0001>

<bundles_post_ra>
// kernel: tpu_custom_call.1
= control target key start
LH: loop header
LB: loop body
LE: loop exit
PB: predicated region body
PF: predicated region fallthrough
CT: control target
= control target key end

     0   :  { %6 = vsyncpa [#allocation3], 0  ;;  %s6565_s0 = inlined_call_operand.hbm [shape: f32[16,16,256], index: 0, kind: input, shape index: {}]   ;;  %s6566_s1 = inlined_call_operand.hbm [shape: f32[16,16,256], index: 1, kind: output, shape index: {}]  }
   0x1   :  { %8 = vsyncpa [#allocation3 + $0x1], 0 }
   0x2   :  { %9 = vsyncpa [#allocation4], 0 }
   0x3   :  { %11 = vsyncpa [#allocation4 + $0x1], 0  ;;  %s3023_s6 = smov 0   ;;  %s3025_s7 = smov 0  }
   0x4   :  { %s3027_s8 = smov 0   ;;  %s3029_s9 = smov 0  }
   0x5 LB: > { %s3044_s10 = sadd.s32 4294967295, %s3002_s9   ;;  %s2733_s11 = sadd.s32 4294967294, %s3002_s9   ;;  %s3002_s9 = sphi %s3029_s9, %s7057_s9   ;;  %s2998_s8 = sphi %s3027_s8, %s7056_s8   ;;  %s2994_s7 = sphi %s3025_s7, %s7055_s7   ;;  %s2990_s6 = sphi %s3023_s6, %s7054_s6  }
   0x6   : > { %s3048_s12 = sadd.s32 1, %s3002_s9   ;;  %s24_s13 = sadd.s32 1, %s2998_s8 }
   0x7   : > { %s21_s14 = ssub.s32 %s3002_s9, %s3048_s12  ;;  %p31_p0 = scmp.ne.s32.totalorder %s2998_s8, %s2994_s7 }
   0x8   : > { %p22_p1 = scmp.eq.s32.totalorder %s21_s14, 0  ;;  %p32_p2 = scmp.eq.s32.totalorder %s3002_s9, 0 }
   0x9   : > { %p37_p3 = scmp.ne.s32.totalorder %s2994_s7, %s2990_s6  ;;  %p38_p4 = scmp.eq.s32.totalorder %s3044_s10, 0 }
   0xa   : > { %s3060_s15 = scalar_select %p22_p1, %s2998_s8, %s24_s13  }
   0xb   : > { %p3062_p5 = por %p32_p2, %p31_p0  ;;  %p3066_p6 = por %p38_p4, %p37_p3 }
   0xc   : > { %p61_p7 = scmp.eq.s32.totalorder %s3044_s10, 1  ;;  %p67_p8 = scmp.eq.s32.totalorder %s2733_s11, 1 }
   0xd   : > { %p2833_p10 = scmp.lt.s32.totalorder %s3002_s9, 2  ;;  %s87_s20 = sand.u32 1, %s2998_s8  }
   0xe   : > { %p3073_p11 = por %p61_p7, %p31_p0  ;;  %p3077_p12 = por %p67_p8, %p37_p3 }
   0xf   : > { %s2737_s21 = sshll.u32 %s3002_s9, 7  ;;  %s2736_s22 = sshll.u32 %s87_s20, 8 }
  0x10   : > { %s6707_s18 = scalar_select %p3073_p11, 1, 0 }
  0x11   : > { %s6708_s19 = scalar_select %p3077_p12, 1, 0 }
  0x12   : > { %s3086_s25 = scalar_lea.hbm %s6565_s0, %s2737_s21  ;;  %s91_s26 = scalar_lea.vmem [#allocation2], %s2736_s22 }
  0x13   : > { %s97_s27 = sshll.u32 %s91_s26, 4  ;;  %p3090_p13 = pnand %p2833_p10, %p3062_p5  ;;  %s3094_s27 = int_to_ptr.vmem [resolvable:$true] %s97_s27 }
  0x14   : > { %s3097_s29 = scalar_lea.sflag [#allocation3], %s87_s20  ;;  %s2906_s30 = scalar_lea.hbm %s3086_s25, 4096 }
  0x15   : > { %p2907_p1 = scmp.ne.s32.totalorder %s3086_s25, %s2906_s30  ;;  %p2908_p2 = pneg %p3090_p13 }
  0x16   : > { %s2911_s4 = scalar_lea.hbm %s6565_s0, 8192  ;;  %p2912_p5 = scmp.lt.u32.totalorder %s3086_s25, %s6565_s0 }
  0x17   : > { %p2909_p3 = pnand %p2908_p2, %p2907_p1  ;;  %p2913_p7 = scmp.lt.u32.totalorder %s2911_s4, %s2906_s30 }
  0x18   : > { %p2915_p10 = scmp.lt.u32.totalorder %s2906_s30, %s3086_s25 }
  0x19   : > { %p2910_p4 = pneg %p2909_p3  ;;  %p2914_p8 = por %p2913_p7, %p2912_p5 }
  0x1b   : > { %p2916_p9 = por %p2915_p10, %p2914_p8 }
  0x1d   : > { %p2917_p0 = pnand %p2916_p9, %p2910_p4 }
  0x1f   : > { %2920 = shalt.err (!%p2917_p0)
}
  0x20   : > { %s2921_s13 = scalar_lea.vmem %s3094_s27, 4096  ;;  %s3004_s14 = smov [#allocation2]  }
  0x21   : > { %p2922_p1 = scmp.ne.s32.totalorder %s3094_s27, %s2921_s13  ;;  %s2926_s16 = sshll.u32 %s3004_s14, 4  ;;  %s2927_s16 = int_to_ptr.vmem [resolvable:$false] %s2926_s16 }
  0x22   : > { %s2928_s20 = scalar_lea.vmem %s2927_s16, 8192  ;;  %p2929_p11 = scmp.lt.s32.totalorder %s3094_s27, %s2927_s16 }
  0x23   : > { %p2924_p3 = pnand %p2922_p1, %p2908_p2  ;;  %p2930_p5 = scmp.lt.s32.totalorder %s2928_s20, %s2921_s13 }
  0x25   : > { %p2925_p12 = pneg %p2924_p3  ;;  %p2931_p7 = por %p2930_p5, %p2929_p11 }
  0x27   : > { %p2932_p8 = pnand %p2931_p7, %p2925_p12 }
  0x29   : > { %2935 = shalt.err (!%p2932_p8)
}
  0x2a   : > { %s3005_s21 = smov 256   ;;  %s3006_s22 = smov 128  }
  0x2b   : > { %s3007_s23 = smov 8   ;;  %p105_p9 = scmp.lt.s32.totalorder %s3002_s9, 3 }
  0x2c   : > { %2828 = dma.hbm_to_vmem [thread:$0]  (!%p3090_p13), %s3086_s25, 4096, %s3094_s27, %s3097_s29, %s3005_s21, %s3006_s22, %s3007_s23  }
  0x2d   : > { %p6710_p0 = scmp.ge.s32.totalorder %s3002_s9, 1 }
  0x2f   : > { %p106_p2 = pnand %p6710_p0, %p105_p9 }
  0x31   : > { %109 = sbr.rel (%p106_p2) target bundleno = 475 (0x1db), region = 24 }
  0x38   : > { %s3129_s24 = sand.u32 1, %s2994_s7  }
  0x39   : > { %s2739_s26 = sshll.u32 %s3129_s24, 8  ;;  %s112_s30 = scalar_lea.sflag [#allocation3], %s3129_s24 }
  0x3a   : > { %s3135_s2 = scalar_lea.vmem [#allocation2], %s2739_s26 }
  0x3b   : > { %2981 = dma.done.wait (%p3066_p6), %s112_s30, 4096  }
  0x3c   : > { %2983 = vsyncadd (%p3066_p6), %s112_s30, 4294963200  ;;  %v134_v0 = vlaneseq  ;;  %v6568_v2 = vmov 0.0   ;;  %v233_v4 = vld [vmem:[%s3135_s2] sm:$0xff]  ;;  %v234_v6 = vld [vmem:[%s3135_s2 + $0x8] sm:$0xff]  ;;  %s6372_s17 = scalar_lea.vmem [#allocation5], %s2739_s26  ;;  %s2818_s25 = sshll.u32 %s3044_s10, 7 }
  0x3d   : > { %v2757_v10 = vld [vmem:[%s3135_s2 + $0x10] sm:$0xff]  ;;  %v2759_v11 = vld [vmem:[%s3135_s2 + $0x20] sm:$0xff]  ;;  %v236_v17 = vsub.f32 0.0, %v234_v6  ;;  %v3233_v32 = vld [vmem:[%s3135_s2 + $0x18] sm:$0xff]  ;;  %s2660_s27 = sshll.u32 %s6372_s17, 4  ;;  %s6511_s29 = scalar_lea.hbm %s6566_s1, %s2818_s25  ;;  %s6515_s27 = int_to_ptr.vmem [resolvable:$true] %s2660_s27 }
  0x3e   : > { %v3141_v1 = vshrl.u32 %v134_v0, 7  ;;  %v2761_v12 = vld [vmem:[%s3135_s2 + $0x30] sm:$0xff]  ;;  %v2763_v16 = vld [vmem:[%s3135_s2 + $0x40] sm:$0xff]  ;;  %v3236_v33 = vld [vmem:[%s3135_s2 + $0x28] sm:$0xff]  ;;  %v241_v59 = vsub.f32 0.0, %v3233_v32  ;;  %s2648_s3 = scalar_lea.sflag [#allocation4], %s3129_s24 }
  0x3f   : > { %v3239_v34 = vld [vmem:[%s3135_s2 + $0x38] sm:$0xff]  ;;  %v3268_v41 = vld [vmem:[%s3135_s2 + $0x48] sm:$0xff]  ;;  %v2767_v42 = vld [vmem:[%s3135_s2 + $0x60] sm:$0xff]  ;;  %v246_v60 = vsub.f32 0.0, %v3236_v33  ;;  %s2936_s4 = scalar_lea.vmem %s6515_s27, 4096  ;;  %p7051_p11 = scmp.ne.s32.totalorder %s6707_s18, 0 }
  0x40   : > { %6711 = vst [vmem:[#allocation8_spill] sm:$0xff] %v3141_v1  ;;  %vm137_vm0 = vcmp.eq.s32.totalorder %v3141_v1, 0  ;;  %vm143_vm1 = vcmp.eq.s32.totalorder %v3141_v1, 1  ;;  %vm149_vm2 = vcmp.eq.s32.totalorder %v3141_v1, 2  ;;  %vm155_vm3 = vcmp.eq.s32.totalorder %v3141_v1, 3  ;;  %v3272_v43 = vld [vmem:[%s3135_s2 + $0x68] sm:$0xff]  ;;  %p2937_p6 = scmp.ne.s32.totalorder %s6515_s27, %s2936_s4 }
  0x41   : > { %v3147_v3 = vsel %vm137_vm0, 1.0, %v6568_v2  ;;  %vm161_vm4 = vcmp.eq.s32.totalorder %v3141_v1, 4  ;;  %v3159_v7 = vsel %vm143_vm1, 1.0, %v6568_v2  ;;  %v3164_v8 = vsel %vm149_vm2, 1.0, %v6568_v2  ;;  %v2769_v47 = vld [vmem:[%s3135_s2 + $0x70] sm:$0xff]  ;;  %v3291_v48 = vld [vmem:[%s3135_s2 + $0x78] sm:$0xff] }
  0x42   : > { %6712 = vst [vmem:[#allocation9_spill] sm:$0xff] %v3147_v3  ;;  %v235_v5 = vsub.f32 %v3147_v3, %v233_v4  ;;  %6713 = vst [vmem:[#allocation10_spill] sm:$0xff] %v3159_v7  ;;  %v3169_v9 = vsel %vm155_vm3, 1.0, %v6568_v2  ;;  %v3175_v13 = vadd.s32 8, %v3141_v1  ;;  %vm173_vm5 = vcmp.eq.s32.totalorder %v3141_v1, 6  ;;  %v3294_v49 = vld [vmem:[%s3135_s2 + $0x80] sm:$0xff]  ;;  %p2938_p12 = pnand %p2937_p6, %p7051_p11 }
  0x43   : > { %6714 = vst [vmem:[#allocation11_spill] sm:$0xff] %v3164_v8  ;;  %6715 = vst [vmem:[#allocation12_spill] sm:$0xff] %v3169_v9  ;;  %v3179_v14 = vsub.s32 0, %v3141_v1  ;;  %v3184_v15 = vsel %vm161_vm4, 1.0, %v6568_v2  ;;  %v3188_v18 = vsub.f32 %v3159_v7, %v2757_v10  ;;  %v3191_v19 = vsub.f32 %v3164_v8, %v2759_v11  ;;  %v3316_v54 = vld [vmem:[%s3135_s2 + $0x88] sm:$0xff]  ;;  %v3319_v55 = vld [vmem:[%s3135_s2 + $0x90] sm:$0xff] }
  0x44   : > { %2874 = vrcp.f32 %v235_v5  ;;  %6716 = vst [vmem:[#allocation13_spill] sm:$0xff] %v3175_v13  ;;  %6718 = vst [vmem:[#allocation15_spill] sm:$0xff] %v3184_v15  ;;  %v3194_v20 = vsub.f32 %v3169_v9, %v2761_v12  ;;  %v3199_v22 = vsel %vm173_vm5, 1.0, %v6568_v2  ;;  %vm179_vm6 = vcmp.eq.s32.totalorder %v3141_v1, 7  ;;  %v3322_v56 = vld [vmem:[%s3135_s2 + $0x98] sm:$0xff]  ;;  %v3337_v61 = vld [vmem:[%s3135_s2 + $0xa0] sm:$0xff]  ;;  %p2939_p13 = pneg %p2938_p12 }
  0x45   : > { %6717 = vst [vmem:[#allocation14_spill] sm:$0xff] %v3179_v14  ;;  %6719 = vst [vmem:[#allocation16_spill] sm:$0xff] %v3199_v22  ;;  %vm186_vm7 = vcmp.eq.s32.totalorder %v3175_v13, 8  ;;  %v3204_v23 = vsub.f32 %v3184_v15, %v2763_v16  ;;  %vm192_vm8 = vcmp.eq.s32.totalorder %v3175_v13, 9  ;;  %vm198_vm9 = vcmp.eq.s32.totalorder %v3175_v13, 10  ;;  %v3340_v62 = vld [vmem:[%s3135_s2 + $0xa8] sm:$0xff] }
  0x46   : > { %vm204_vm10 = vcmp.eq.s32.totalorder %v3175_v13, 11  ;;  %vm210_vm11 = vcmp.eq.s32.totalorder %v3175_v13, 12  ;;  %v332_v27 = vrot.slane %v3188_v18, %v3179_v14  ;;  %v3220_v28 = vrot.slane %v3191_v19, %v3179_v14  ;;  %v3343_v63 = vld [vmem:[%s3135_s2 + $0xb0] sm:$0xff]  ;;  %v3350_v10 = vld [vmem:[%s3135_s2 + $0xb8] sm:$0xff]  ;;  %v3353_v11 = vld [vmem:[%s3135_s2 + $0xc0] sm:$0xff]  ;;  %s3009_s5 = smov [#allocation5]  }
  0x47   : > { %v3224_v29 = vrot.slane %v3194_v20, %v3179_v14  ;;  %vm216_vm12 = vcmp.eq.s32.totalorder %v3175_v13, 13  ;;  %vm222_vm13 = vcmp.eq.s32.totalorder %v3175_v13, 14  ;;  %v3254_v38 = vrot.slane %v3204_v23, %v3179_v14  ;;  %v3356_v12 = vld [vmem:[%s3135_s2 + $0xc8] sm:$0xff]  ;;  %v3370_v32 = vld [vmem:[%s3135_s2 + $0xe0] sm:$0xff]  ;;  %s2940_s11 = sshll.u32 %s3009_s5, 4  ;;  %s2941_s11 = int_to_ptr.vmem [resolvable:$false] %s2940_s11 }
  0x48   : > { %v3259_v39 = vsel %vm179_vm6, 1.0, %v6568_v2  ;;  %v3264_v40 = vsel %vm186_vm7, 1.0, %v6568_v2  ;;  %vm228_vm14 = vcmp.eq.s32.totalorder %v3175_v13, 15  ;;  %v3277_v44 = vsel %vm192_vm8, 1.0, %v6568_v2  ;;  %s2942_s13 = scalar_lea.vmem %s2941_s11, 8192  ;;  %p2943_p4 = scmp.lt.s32.totalorder %s6515_s27, %s2941_s11 }
  0x49   : > { %6720 = vst [vmem:[#allocation17_spill] sm:$0xff] %v3259_v39  ;;  %6721 = vst [vmem:[#allocation18_spill] sm:$0xff] %v3264_v40  ;;  %v3282_v45 = vsel %vm198_vm9, 1.0, %v6568_v2  ;;  %v3287_v46 = vsel %vm204_vm10, 1.0, %v6568_v2  ;;  %v3303_v51 = vsel %vm210_vm11, 1.0, %v6568_v2  ;;  %v3308_v52 = vsel %vm216_vm12, 1.0, %v6568_v2  ;;  %p2944_p10 = scmp.lt.s32.totalorder %s2942_s13, %s2936_s4 }
  0x4a   : > { %6722 = vst [vmem:[#allocation19_spill] sm:$0xff] %v3277_v44  ;;  %6723 = vst [vmem:[#allocation20_spill] sm:$0xff] %v3282_v45  ;;  %v3313_v53 = vsel %vm222_vm13, 1.0, %v6568_v2  ;;  %v3332_v58 = vsel %vm228_vm14, 1.0, %v6568_v2  ;;  %v251_v0 = vsub.f32 0.0, %v3239_v34  ;;  %v256_v4 = vsub.f32 0.0, %v3268_v41 }
  0x4b   : > { %6724 = vst [vmem:[#allocation21_spill] sm:$0xff] %v3287_v46  ;;  %6725 = vst [vmem:[#allocation22_spill] sm:$0xff] %v3303_v51  ;;  %v3359_v16 = vsub.f32 %v3259_v39, %v2769_v47  ;;  %v276_v34 = vsub.f32 %v3264_v40, %v3316_v54  ;;  %v280_v41 = vsub.f32 0.0, %v3319_v55  ;;  %v3380_v2 = vld [vmem:[%s3135_s2 + $0xe8] sm:$0xff]  ;;  %v286_v6 = vsub.f32 %v3282_v45, %v3340_v62  ;;  %v3392_v55 = vld [vmem:[%s3135_s2 + $0xf8] sm:$0xff]  ;;  %p2945_p1 = por %p2944_p10, %p2943_p4 }
  0x4c   : > { %6726 = vst [vmem:[#allocation23_spill] sm:$0xff] %v3308_v52  ;;  %6727 = vst [vmem:[#allocation24_spill] sm:$0xff] %v3313_v53  ;;  %v6732_v39 = vsub.f32 0.0, %v3353_v11  ;;  %vm167_vm15 = vcmp.eq.s32.totalorder %v3141_v1, 5 }
  0x4d   : > { %6728 = vst [vmem:[#allocation25_spill] sm:$0xff] %v3332_v58  ;;  %v380_v47 = vrot.slane %v3359_v16, %v3179_v14  ;;  %p2946_p3 = pnand %p2945_p1, %p2939_p13 }
  0x4e   : > { %v2875_v21 = vpop.eup %2874 }
  0x4f   : > { %v3207_v24 = vrot.slane %v2875_v21, %v3179_v14  ;;  %v320_v25 = vadd.f32 1.0, %v2875_v21  ;;  %v290_v21 = vsub.f32 0.0, %v3343_v63 }
  0x51   : > { %v3214_v26 = vmul.f32 %v3207_v24, %v236_v17  ;;  %v3229_v30 = vmul.f32 %v3207_v24, %v235_v5  ;;  %v326_v31 = vrot.slane %v320_v25, %v3179_v14  ;;  %v265_v5 = vsub.f32 %v3199_v22, %v2767_v42  ;;  %v3364_v25 = vld [vmem:[%s3135_s2 + $0xd0] sm:$0xff] }
  0x52   : > { %v281_v42 = vsub.f32 %v3277_v44, %v3322_v56  ;;  %v3383_v17 = vld [vmem:[%s3135_s2 + $0xf0] sm:$0xff]  ;;  %v6729_v44 = vsub.f32 0.0, %v3294_v49  ;;  %v412_v56 = vrot.slane %v290_v21, %v3179_v14  ;;  %v420_v22 = vrot.slane %v6732_v39, %v3179_v14 }
  0x53   : > { %v3242_v35 = vmul.f32 %v332_v27, %v3214_v26  ;;  %v3246_v36 = vmul.f32 %v3220_v28, %v3214_v26  ;;  %v3250_v37 = vmul.f32 %v3224_v29, %v3214_v26  ;;  %v3298_v50 = vmul.f32 %v3254_v38, %v3214_v26 }
  0x54   : > { %v3327_v57 = vsel %vm137_vm0, %v326_v31, %v3229_v30  ;;  %v3367_v31 = vld [vmem:[%s3135_s2 + $0xd8] sm:$0xff]  ;;  %v372_v54 = vrot.slane %v265_v5, %v3179_v14  ;;  %v388_v40 = vrot.slane %v6729_v44, %v3179_v14  ;;  %v6733_v15 = vsub.f32 0.0, %v3364_v25 }
  0x55   : > { %v333_v33 = vmul.f32 %v332_v27, %v3327_v57  ;;  %v291_v27 = vsub.f32 %v3287_v46, %v3350_v10  ;;  %v3415_v46 = vsub.s32 1, %v3141_v1  ;;  %v341_v62 = vmul.f32 %v3220_v28, %v3327_v57 }
  0x56   : > { %v349_v45 = vmul.f32 %v3224_v29, %v3327_v57  ;;  %v357_v44 = vmul.f32 %v3254_v38, %v3327_v57  ;;  %v3435_v28 = vsel %vm137_vm0, %v3207_v24, %v3229_v30  ;;  %v428_v9 = vrot.slane %v6733_v15, %v3179_v14 }
  0x57   : > { %v3404_v10 = vsub.f32 %v3188_v18, %v333_v33  ;;  %6730 = vst [vmem:[#allocation26_spill] sm:$0xff] %v3415_v46  ;;  %v396_v18 = vrot.slane %v280_v41, %v3179_v14  ;;  %v6731_v33 = vsub.f32 0.0, %v3337_v61  ;;  %v6734_v29 = vsub.f32 0.0, %v3370_v32 }
  0x58   : > { %v336_v39 = vsub.f32 %v241_v59, %v3242_v35  ;;  %v3447_v8 = vsub.f32 %v246_v60, %v3246_v36  ;;  %v3450_v24 = vsub.f32 %v251_v0, %v3250_v37  ;;  %v6735_v30 = vsub.f32 0.0, %v3383_v17 }
  0x59   : > { %v404_v63 = vrot.slane %v6731_v33, %v3179_v14  ;;  %v373_v33 = vmul.f32 %v372_v54, %v3327_v57  ;;  %v436_v38 = vrot.slane %v6734_v29, %v3179_v14  ;;  %2876 = vrcp.f32 %v3404_v10 }
  0x5a   : > { %v444_v7 = vrot.slane %v6735_v30, %v3179_v14  ;;  %v3456_v15 = vsub.f32 %v3191_v19, %v341_v62  ;;  %v374_v3 = vmul.f32 %v372_v54, %v3214_v26  ;;  %v381_v29 = vmul.f32 %v380_v47, %v3327_v57 }
  0x5b   : > { %v382_v13 = vmul.f32 %v380_v47, %v3214_v26  ;;  %v3462_v35 = vsub.f32 %v3194_v20, %v349_v45  ;;  %v3465_v36 = vsub.f32 %v3204_v23, %v357_v44  ;;  %v389_v37 = vmul.f32 %v388_v40, %v3327_v57 }
  0x5c   : > { %v390_v59 = vmul.f32 %v388_v40, %v3214_v26  ;;  %v3470_v60 = vsub.f32 %v256_v4, %v3298_v50  ;;  %v3472_v19 = vsub.f32 %v265_v5, %v373_v33  ;;  %v397_v0 = vmul.f32 %v396_v18, %v3327_v57 }
  0x5d   : > { %v398_v54 = vmul.f32 %v396_v18, %v3214_v26  ;;  %v405_v47 = vmul.f32 %v404_v63, %v3327_v57  ;;  %v406_v20 = vmul.f32 %v404_v63, %v3214_v26  ;;  %v413_v23 = vmul.f32 %v412_v56, %v3327_v57 }
  0x5e   : > { %v414_v45 = vmul.f32 %v412_v56, %v3214_v26  ;;  %v6736_v62 = vsub.f32 0.0, %v3272_v43  ;;  %v3485_v50 = vsub.f32 %v3359_v16, %v381_v29  ;;  %v6737_v4 = vsub.f32 0.0, %v3291_v48 }
  0x5f   : > { %v421_v18 = vmul.f32 %v420_v22, %v3327_v57  ;;  %v6738_v44 = vsub.f32 0.0, %v3294_v49  ;;  %v3496_v33 = vsub.f32 %v276_v34, %v390_v59  ;;  %v422_v56 = vmul.f32 %v420_v22, %v3214_v26 }
  0x60   : > { %v3482_v40 = vsub.f32 %v6736_v62, %v374_v3  ;;  %v3489_v5 = vsub.f32 %v6737_v4, %v382_v13  ;;  %v429_v3 = vmul.f32 %v428_v9, %v3327_v57  ;;  %v3500_v43 = vsub.f32 %v280_v41, %v397_v0 }
  0x61   : > { %v3494_v63 = vsub.f32 %v6738_v44, %v389_v37  ;;  %v3502_v16 = vsub.f32 %v281_v42, %v398_v54  ;;  %v430_v48 = vmul.f32 %v428_v9, %v3214_v26  ;;  %v437_v13 = vmul.f32 %v436_v38, %v3327_v57 }
  0x62   : > { %v6739_v30 = vsub.f32 0.0, %v3337_v61  ;;  %v3510_v49 = vsub.f32 %v286_v6, %v406_v20  ;;  %v3512_v34 = vsub.f32 %v290_v21, %v413_v23  ;;  %v3514_v37 = vsub.f32 %v291_v27, %v414_v45 }
  0x63   : > { %v2877_v22 = vpop.eup %2876  ;;  %v6740_v41 = vsub.f32 0.0, %v3353_v11  ;;  %v438_v42 = vmul.f32 %v436_v38, %v3214_v26  ;;  %v445_v9 = vmul.f32 %v444_v7, %v3327_v57  ;;  %v446_v0 = vmul.f32 %v444_v7, %v3214_v26 }
  0x64   : > { %v3508_v29 = vsub.f32 %v6739_v30, %v405_v47  ;;  %v6741_v61 = vsub.f32 %v3303_v51, %v3356_v12  ;;  %v6742_v21 = vsub.f32 0.0, %v3364_v25  ;;  %v3533_v54 = vrot.slane %v2877_v22, %v3415_v46 }
  0x65   : > { %v3518_v59 = vsub.f32 %v6740_v41, %v421_v18  ;;  %v459_v11 = vadd.f32 1.0, %v2877_v22  ;;  %v6744_v38 = vsub.f32 %v3308_v52, %v3367_v31  ;;  %v6745_v7 = vsub.f32 0.0, %v3370_v32 }
  0x66   : > { %v3526_v6 = vsub.f32 %v6741_v61, %v422_v56  ;;  %v3530_v27 = vsub.f32 %v6742_v21, %v429_v3  ;;  %6743 = vst [vmem:[#allocation27_spill] sm:$0xff] %v3533_v54  ;;  %v471_v12 = vrot.slane %v3435_v28, %v3415_v46  ;;  %v479_v25 = vrot.slane %v3456_v15, %v3415_v46 }
  0x67   : > { %v3538_v47 = vsub.f32 %v6744_v38, %v430_v48  ;;  %v3542_v20 = vsub.f32 %v6745_v7, %v437_v13  ;;  %v3550_v23 = vmul.f32 %v3533_v54, %v3404_v10  ;;  %v3553_v45 = vmul.f32 %v3533_v54, %v336_v39 }
  0x68   : > { %v465_v31 = vrot.slane %v459_v11, %v3415_v46  ;;  %v3558_v32 = vrot.slane %v3462_v35, %v3415_v46  ;;  %v6748_v62 = vsub.f32 %v3313_v53, %v3380_v2  ;;  %v6749_v18 = vsub.f32 0.0, %v3383_v17 }
  0x69   : > { %6746 = vst [vmem:[#allocation28_spill] sm:$0xff] %v3550_v23  ;;  %6747 = vst [vmem:[#allocation29_spill] sm:$0xff] %v3553_v45  ;;  %v6750_v10 = vsub.f32 %v3332_v58, %v3392_v55  ;;  %v3576_v56 = vrot.slane %v3465_v36, %v3415_v46  ;;  %v3584_v2 = vmul.f32 %v471_v12, %v3553_v45 }
  0x6a   : > { %v3563_v4 = vsub.f32 %v6748_v62, %v438_v42  ;;  %v3567_v44 = vsub.f32 %v6749_v18, %v445_v9  ;;  %v3581_v3 = vsel %vm143_vm1, %v465_v31, %v3550_v23  ;;  %v3587_v17 = vmul.f32 %v479_v25, %v3553_v45 }
  0x6b   : > { %v3572_v39 = vsub.f32 %v6750_v10, %v446_v0  ;;  %v3591_v55 = vmul.f32 %v3558_v32, %v3553_v45  ;;  %v472_v48 = vmul.f32 %v471_v12, %v3581_v3  ;;  %v480_v13 = vmul.f32 %v479_v25, %v3581_v3 }
  0x6c   : > { %v519_v30 = vrot.slane %v3485_v50, %v3415_v46  ;;  %v527_v22 = vrot.slane %v3494_v63, %v3415_v46  ;;  %v3607_v0 = vmul.f32 %v3576_v56, %v3553_v45  ;;  %v511_v21 = vrot.slane %v3472_v19, %v3415_v46 }
  0x6d   : > { %v3610_v61 = vsub.f32 %v3435_v28, %v472_v48  ;;  %v535_v11 = vrot.slane %v3500_v43, %v3415_v46  ;;  %v543_v38 = vrot.slane %v3508_v29, %v3415_v46  ;;  %v551_v12 = vrot.slane %v3512_v34, %v3415_v46 }
  0x6e   : > { %v559_v25 = vrot.slane %v3518_v59, %v3415_v46  ;;  %v567_v28 = vrot.slane %v3530_v27, %v3415_v46  ;;  %v3627_v31 = vmul.f32 %v511_v21, %v3553_v45  ;;  %v520_v62 = vmul.f32 %v519_v30, %v3581_v3 }
  0x6f   : > { %v3631_v18 = vmul.f32 %v519_v30, %v3553_v45  ;;  %v528_v10 = vmul.f32 %v527_v22, %v3581_v3  ;;  %v482_v48 = vsub.f32 %v3456_v15, %v480_v13  ;;  %v3636_v7 = vmul.f32 %v527_v22, %v3553_v45 }
  0x70   : > { %v575_v9 = vrot.slane %v3542_v20, %v3415_v46  ;;  %v583_v41 = vrot.slane %v3567_v44, %v3415_v46  ;;  %v3645_v58 = vsub.f32 %v3485_v50, %v520_v62  ;;  %v536_v22 = vmul.f32 %v535_v11, %v3581_v3 }
  0x71   : > { %v3650_v15 = vsub.f32 %v3494_v63, %v528_v10  ;;  %v3656_v51 = vmul.f32 %v535_v11, %v3553_v45  ;;  %v544_v52 = vmul.f32 %v543_v38, %v3581_v3  ;;  %v3660_v42 = vmul.f32 %v543_v38, %v3553_v45 }
  0x72   : > { %v552_v50 = vmul.f32 %v551_v12, %v3581_v3  ;;  %v3664_v62 = vmul.f32 %v551_v12, %v3553_v45  ;;  %v560_v63 = vmul.f32 %v559_v25, %v3581_v3  ;;  %v3668_v10 = vsub.f32 %v3500_v43, %v536_v22 }
  0x73   : > { %v539_v13 = vsub.f32 %v3502_v16, %v3656_v51  ;;  %v3673_v11 = vsub.f32 %v3508_v29, %v544_v52  ;;  %v3676_v30 = vmul.f32 %v559_v25, %v3553_v45  ;;  %v568_v52 = vmul.f32 %v567_v28, %v3581_v3 }
  0x74   : > { %v3681_v12 = vsub.f32 %v3512_v34, %v552_v50  ;;  %v3686_v43 = vsub.f32 %v3518_v59, %v560_v63  ;;  %v3692_v16 = vmul.f32 %v567_v28, %v3553_v45  ;;  %v576_v29 = vmul.f32 %v575_v9, %v3581_v3 }
  0x75   : > { %v3696_v25 = vmul.f32 %v575_v9, %v3553_v45  ;;  %v584_v34 = vmul.f32 %v583_v41, %v3581_v3  ;;  %v3700_v22 = vmul.f32 %v583_v41, %v3553_v45  ;;  %2878 = vrcp.f32 %v482_v48 }
  0x76   : > { %v3703_v59 = vsub.f32 %v3530_v27, %v568_v52  ;;  %v571_v50 = vsub.f32 %v3538_v47, %v3692_v16  ;;  %v3708_v28 = vsub.f32 %v3542_v20, %v576_v29  ;;  %v488_v27 = vmul.f32 %v3558_v32, %v3581_v3 }
  0x77   : > { %v579_v9 = vsub.f32 %v3563_v4, %v3696_v25  ;;  %v3713_v63 = vsub.f32 %v3567_v44, %v584_v34  ;;  %v587_v41 = vsub.f32 %v3572_v39, %v3700_v22  ;;  %v3720_v52 = vsub.s32 2, %v3141_v1  ;;  %v2765_v25 = vld [vmem:[%s3135_s2 + $0x50] sm:$0xff] }
  0x78   : > { %v512_v47 = vmul.f32 %v511_v21, %v3581_v3  ;;  %v490_v20 = vsub.f32 %v3462_v35, %v488_v27  ;;  %v6753_v29 = vmov 0.0   ;;  %v6756_v35 = vsub.f32 %v3447_v8, %v3587_v17 }
  0x79   : > { %6751 = vst [vmem:[#allocation30_spill] sm:$0xff] %v3720_v52  ;;  %v3731_v39 = vsel %vm167_vm15, 1.0, %v6753_v29  ;;  %v610_v21 = vrot.slane %v3610_v61, %v3720_v52  ;;  %v6758_v8 = vsub.f32 %v3214_v26, %v3584_v2  ;;  %v666_v53 = vrot.slane %v3650_v15, %v3720_v52 }
  0x7a   : > { %6754 = vst [vmem:[#allocation32_spill] sm:$0xff] %v3731_v39  ;;  %v3734_v32 = vsub.f32 %v3472_v19, %v512_v47  ;;  %v260_v29 = vsub.f32 %v3731_v39, %v2765_v25  ;;  %v658_v25 = vrot.slane %v3645_v58, %v3720_v52  ;;  %v674_v2 = vrot.slane %v3668_v10, %v3720_v52 }
  0x7b   : > { %v6777_v23 = vsub.f32 %v3470_v60, %v3607_v0 }
  0x7c   : > { %v650_v51 = vrot.slane %v3734_v32, %v3720_v52 }
  0x7f   : > { %v2879_v16 = vpop.eup %2878 }
  0x80   : > { %v3726_v4 = vrot.slane %v2879_v16, %v3720_v52  ;;  %v598_v44 = vadd.f32 1.0, %v2879_v16  ;;  %v626_v16 = vrot.slane %v490_v20, %v3720_v52 }
  0x82   : > { %6752 = vst [vmem:[#allocation31_spill] sm:$0xff] %v3726_v4  ;;  %v3740_v34 = vmul.f32 %v3726_v4, %v482_v48  ;;  %v3746_v22 = vmul.f32 %v3726_v4, %v6756_v35  ;;  %v604_v27 = vrot.slane %v598_v44, %v3720_v52  ;;  %v6759_v44 = vsub.f32 %v3450_v24, %v3591_v55 }
  0x84   : > { %6755 = vst [vmem:[#allocation33_spill] sm:$0xff] %v3740_v34  ;;  %v612_v19 = vmul.f32 %v610_v21, %v3746_v22  ;;  %v628_v47 = vmul.f32 %v626_v16, %v3746_v22  ;;  %v3756_v48 = vsel %vm149_vm2, %v604_v27, %v3740_v34  ;;  %v652_v27 = vmul.f32 %v650_v51, %v3746_v22 }
  0x85   : > { %6757 = vst [vmem:[#allocation34_spill] sm:$0xff] %v3756_v48  ;;  %v627_v24 = vmul.f32 %v626_v16, %v3756_v48  ;;  %v660_v55 = vmul.f32 %v658_v25, %v3746_v22  ;;  %v676_v39 = vmul.f32 %v674_v2, %v3746_v22  ;;  %v6761_v16 = vsub.f32 %v3489_v5, %v3631_v18 }
  0x86   : > { %v3761_v17 = vsub.f32 %v6758_v8, %v612_v19  ;;  %v630_v35 = vsub.f32 %v6759_v44, %v628_v47  ;;  %v3776_v19 = vrot.slane %v260_v29, %v3179_v14  ;;  %v668_v47 = vmul.f32 %v666_v53, %v3746_v22 }
  0x87   : > { %v496_v8 = vmul.f32 %v3576_v56, %v3581_v3  ;;  %v6760_v44 = vsub.f32 %v3482_v40, %v3627_v31  ;;  %v682_v14 = vrot.slane %v3673_v11, %v3720_v52  ;;  %v3794_v4 = vsub.f32 %v6761_v16, %v660_v55 }
  0x88   : > { %v6762_v34 = vsub.f32 %v3496_v33, %v3636_v7  ;;  %v690_v40 = vrot.slane %v3681_v12, %v3720_v52  ;;  %v698_v56 = vrot.slane %v3686_v43, %v3720_v52  ;;  %v3805_v31 = vsub.f32 %v539_v13, %v676_v39 }
  0x89   : > { %v3786_v38 = vsub.f32 %v6760_v44, %v652_v27  ;;  %v684_v27 = vmul.f32 %v682_v14, %v3746_v22  ;;  %v706_v5 = vrot.slane %v3703_v59, %v3720_v52  ;;  %v365_v18 = vmul.f32 %v3776_v19, %v3327_v57 }
  0x8a   : > { %v3799_v54 = vsub.f32 %v6762_v34, %v668_v47  ;;  %v629_v55 = vsub.f32 %v490_v20, %v627_v24  ;;  %v692_v33 = vmul.f32 %v690_v40, %v3746_v22  ;;  %v700_v7 = vmul.f32 %v698_v56, %v3746_v22 }
  0x8b   : > { %v6763_v34 = vsub.f32 %v3510_v49, %v3660_v42  ;;  %v708_v13 = vmul.f32 %v706_v5, %v3746_v22  ;;  %v714_v39 = vrot.slane %v3708_v28, %v3720_v52  ;;  %v498_v44 = vsub.f32 %v3465_v36, %v496_v8 }
  0x8c   : > { %v6764_v57 = vsub.f32 %v3514_v37, %v3664_v62  ;;  %v6765_v24 = vsub.f32 %v3526_v6, %v3676_v30  ;;  %v722_v49 = vrot.slane %v3713_v63, %v3720_v52  ;;  %2880 = vrcp.f32 %v629_v55 }
  0x8d   : > { %v3817_v47 = vsub.f32 %v6763_v34, %v684_v27  ;;  %v3835_v42 = vsub.f32 %v571_v50, %v708_v13  ;;  %v716_v27 = vmul.f32 %v714_v39, %v3746_v22  ;;  %v367_v34 = vsub.f32 %v260_v29, %v365_v18 }
  0x8e   : > { %v3826_v20 = vsub.f32 %v6764_v57, %v692_v33  ;;  %v3831_v16 = vsub.f32 %v6765_v24, %v700_v7  ;;  %v724_v36 = vmul.f32 %v722_v49, %v3746_v22  ;;  %v3842_v37 = vrot.slane %v498_v44, %v3720_v52 }
  0x8f   : > { %6766 = vst [vmem:[#allocation35_spill] sm:$0xff] %v3835_v42  ;;  %v3839_v8 = vsub.f32 %v579_v9, %v716_v27  ;;  %v3847_v6 = vrot.slane %v367_v34, %v3415_v46  ;;  %v611_v30 = vmul.f32 %v610_v21, %v3756_v48  ;;  %v651_v29 = vmul.f32 %v650_v51, %v3756_v48 }
  0x90   : > { %v3844_v62 = vsub.f32 %v587_v41, %v724_v36  ;;  %v635_v50 = vmul.f32 %v3842_v37, %v3756_v48  ;;  %v3854_v18 = vsub.s32 3, %v3141_v1  ;;  %v659_v33 = vmul.f32 %v658_v25, %v3756_v48 }
  0x91   : > { %6767 = vst [vmem:[#allocation36_spill] sm:$0xff] %v3839_v8  ;;  %v504_v9 = vmul.f32 %v3847_v6, %v3581_v3  ;;  %v3860_v41 = vsub.f32 %v3610_v61, %v611_v30  ;;  %v667_v21 = vmul.f32 %v666_v53, %v3756_v48  ;;  %v675_v57 = vmul.f32 %v674_v2, %v3756_v48 }
  0x92   : > { %6768 = vst [vmem:[#allocation37_spill] sm:$0xff] %v3854_v18  ;;  %v637_v13 = vsub.f32 %v498_v44, %v635_v50  ;;  %v3865_v24 = vsub.f32 %v3734_v32, %v651_v29  ;;  %v683_v51 = vmul.f32 %v682_v14, %v3756_v48  ;;  %v3872_v25 = vsub.f32 %v3645_v58, %v659_v33 }
  0x93   : > { %v506_v36 = vsub.f32 %v367_v34, %v504_v9  ;;  %v691_v61 = vmul.f32 %v690_v40, %v3756_v48  ;;  %v699_v44 = vmul.f32 %v698_v56, %v3756_v48  ;;  %v749_v2 = vrot.slane %v3860_v41, %v3854_v18 }
  0x94   : > { %v3886_v34 = vsub.f32 %v3650_v15, %v667_v21  ;;  %v3889_v58 = vsub.f32 %v3668_v10, %v675_v57  ;;  %v707_v40 = vmul.f32 %v706_v5, %v3756_v48  ;;  %v715_v56 = vmul.f32 %v714_v39, %v3756_v48 }
  0x95   : > { %v773_v30 = vrot.slane %v637_v13, %v3854_v18  ;;  %v789_v50 = vrot.slane %v3865_v24, %v3854_v18  ;;  %v3903_v15 = vrot.slane %v506_v36, %v3720_v52  ;;  %v3906_v10 = vsub.f32 %v3681_v12, %v691_v61 }
  0x96   : > { %v2881_v7 = vpop.eup %2880  ;;  %v3909_v5 = vsub.f32 %v3686_v43, %v699_v44  ;;  %v723_v39 = vmul.f32 %v722_v49, %v3756_v48  ;;  %v797_v12 = vrot.slane %v3872_v25, %v3854_v18  ;;  %v3925_v33 = vsub.f32 %v3703_v59, %v707_v40 }
  0x97   : > { %v3869_v27 = vrot.slane %v2881_v7, %v3854_v18  ;;  %v737_v3 = vadd.f32 1.0, %v2881_v7  ;;  %6772 = vst [vmem:[#allocation41_spill] sm:$0xff] %v3903_v15  ;;  %v3928_v43 = vsub.f32 %v3708_v28, %v715_v56  ;;  %v805_v7 = vrot.slane %v3886_v34, %v3854_v18 }
  0x98   : > { %v813_v49 = vrot.slane %v3889_v58, %v3854_v18  ;;  %v643_v28 = vmul.f32 %v3903_v15, %v3756_v48  ;;  %v3951_v44 = vsub.f32 %v3713_v63, %v723_v39  ;;  %v829_v56 = vrot.slane %v3906_v10, %v3854_v18 }
  0x99   : > { %6769 = vst [vmem:[#allocation38_spill] sm:$0xff] %v3869_v27  ;;  %v3877_v53 = vmul.f32 %v3869_v27, %v629_v55  ;;  %v3880_v32 = vmul.f32 %v3869_v27, %v630_v35  ;;  %v743_v14 = vrot.slane %v737_v3, %v3854_v18  ;;  %v3894_v55 = vsub.f32 %v3673_v11, %v683_v51 }
  0x9a   : > { %v837_v46 = vrot.slane %v3909_v5, %v3854_v18  ;;  %v845_v63 = vrot.slane %v3925_v33, %v3854_v18  ;;  %v645_v48 = vsub.f32 %v506_v36, %v643_v28  ;;  %v636_v28 = vmul.f32 %v3842_v37, %v3746_v22  ;;  %v2766_v37 = vld [vmem:[%s3135_s2 + $0x58] sm:$0xff] }
  0x9b   : > { %6770 = vst [vmem:[#allocation39_spill] sm:$0xff] %v3877_v53  ;;  %6771 = vst [vmem:[#allocation40_spill] sm:$0xff] %v3880_v32  ;;  %v3897_v35 = vmul.f32 %v749_v2, %v3880_v32  ;;  %v3914_v11 = vsel %vm155_vm3, %v743_v14, %v3877_v53  ;;  %v3920_v9 = vmul.f32 %v789_v50, %v3880_v32 }
  0x9c   : > { %v774_v21 = vmul.f32 %v773_v30, %v3914_v11  ;;  %v3938_v51 = vmul.f32 %v797_v12, %v3880_v32  ;;  %v821_v59 = vrot.slane %v3894_v55, %v3854_v18  ;;  %v3945_v3 = vmul.f32 %v805_v7, %v3880_v32 }
  0x9d   : > { %v3948_v61 = vmul.f32 %v813_v49, %v3880_v32  ;;  %v3971_v27 = vmul.f32 %v829_v56, %v3880_v32  ;;  %v853_v53 = vrot.slane %v3928_v43, %v3854_v18  ;;  %v3976_v57 = vmul.f32 %v837_v46, %v3880_v32 }
  0x9e   : > { %v3956_v40 = vmul.f32 %v821_v59, %v3880_v32  ;;  %v776_v39 = vsub.f32 %v637_v13, %v774_v21  ;;  %v3979_v29 = vmul.f32 %v845_v63, %v3880_v32  ;;  %v861_v21 = vrot.slane %v3951_v44, %v3854_v18 }
  0x9f   : > { %6773 = vst [vmem:[#allocation42_spill] sm:$0xff] %v3971_v27  ;;  %v3984_v13 = vmul.f32 %v853_v53, %v3880_v32  ;;  %v4000_v52 = vrot.slane %v645_v48, %v3854_v18  ;;  %v750_v14 = vmul.f32 %v749_v2, %v3914_v11  ;;  %v775_v15 = vmul.f32 %v773_v30, %v3880_v32 }
  0xa0   : > { %6774 = vst [vmem:[#allocation43_spill] sm:$0xff] %v3979_v29  ;;  %v3995_v36 = vmul.f32 %v861_v21, %v3880_v32  ;;  %2882 = vrcp.f32 %v776_v39  ;;  %v638_v29 = vsub.f32 %v6777_v23, %v636_v28  ;;  %v798_v18 = vmul.f32 %v797_v12, %v3914_v11 }
  0xa1   : > { %6775 = vst [vmem:[#allocation44_spill] sm:$0xff] %v3984_v13  ;;  %6776 = vst [vmem:[#allocation45_spill] sm:$0xff] %v4000_v52  ;;  %v790_v13 = vmul.f32 %v789_v50, %v3914_v11  ;;  %v782_v8 = vmul.f32 %v4000_v52, %v3914_v11  ;;  %v806_v42 = vmul.f32 %v805_v7, %v3914_v11  ;;  %v4016_v27 = vsub.s32 4, %v3141_v1 }
  0xa2   : > { %v4019_v2 = vsub.f32 %v3860_v41, %v750_v14  ;;  %v814_v60 = vmul.f32 %v813_v49, %v3914_v11  ;;  %v777_v23 = vsub.f32 %v638_v29, %v775_v15  ;;  %v261_v50 = vsub.f32 0.0, %v2766_v37 }
  0xa3   : > { %6778 = vst [vmem:[#allocation46_spill] sm:$0xff] %v4016_v27  ;;  %v4023_v0 = vsub.f32 %v3865_v24, %v790_v13  ;;  %v784_v28 = vsub.f32 %v645_v48, %v782_v8  ;;  %v822_v52 = vmul.f32 %v821_v59, %v3914_v11  ;;  %v830_v12 = vmul.f32 %v829_v56, %v3914_v11 }
  0xa4   : > { %v4028_v7 = vsub.f32 %v3872_v25, %v798_v18  ;;  %v4031_v32 = vsub.f32 %v3886_v34, %v806_v42  ;;  %v4037_v24 = vsub.f32 %v3889_v58, %v814_v60  ;;  %v838_v29 = vmul.f32 %v837_v46, %v3914_v11 }
  0xa5   : > { %v846_v48 = vmul.f32 %v845_v63, %v3914_v11  ;;  %v888_v8 = vrot.slane %v4019_v2, %v4016_v27  ;;  %v928_v34 = vrot.slane %v4023_v0, %v4016_v27  ;;  %v4053_v58 = vsub.f32 %v3894_v55, %v822_v52 }
  0xa6   : > { %v4056_v46 = vsub.f32 %v3906_v10, %v830_v12  ;;  %v854_v49 = vmul.f32 %v853_v53, %v3914_v11  ;;  %v862_v59 = vmul.f32 %v861_v21, %v3914_v11  ;;  %v920_v56 = vrot.slane %v784_v28, %v4016_v27 }
  0xa7   : > { %v366_v52 = vmul.f32 %v3776_v19, %v3214_v26  ;;  %v4068_v55 = vsub.f32 %v3909_v5, %v838_v29  ;;  %v4071_v10 = vsub.f32 %v3925_v33, %v846_v48  ;;  %v6783_v13 = vsub.f32 %v3761_v17, %v3897_v35 }
  0xa8   : > { %v6784_v37 = vsub.f32 %v3786_v38, %v3920_v9  ;;  %v944_v5 = vrot.slane %v4031_v32, %v4016_v27  ;;  %v4092_v33 = vsub.f32 %v3928_v43, %v854_v49  ;;  %v4095_v60 = vsub.f32 %v3951_v44, %v862_v59 }
  0xa9   : > { %v952_v17 = vrot.slane %v4037_v24, %v4016_v27  ;;  %v960_v35 = vrot.slane %v4053_v58, %v4016_v27  ;;  %v6785_v9 = vsub.f32 %v3794_v4, %v3938_v51  ;;  %v968_v43 = vrot.slane %v4056_v46, %v4016_v27 }
  0xaa   : > { %v2883_v30 = vpop.eup %2882  ;;  %v368_v44 = vsub.f32 %v261_v50, %v366_v52  ;;  %v505_v12 = vmul.f32 %v3847_v6, %v3553_v45  ;;  %v6786_v48 = vsub.f32 %v3799_v54, %v3945_v3  ;;  %v976_v51 = vrot.slane %v4068_v55, %v4016_v27 }
  0xab   : > { %v4034_v41 = vrot.slane %v2883_v30, %v4016_v27  ;;  %v876_v15 = vadd.f32 1.0, %v2883_v30  ;;  %v6787_v50 = vsub.f32 %v3805_v31, %v3948_v61  ;;  %v6788_v6 = vsub.f32 %v3817_v47, %v3956_v40  ;;  %v6791_v40 = vld [vmem:[#allocation41_spill] sm:$0xff] }
  0xac   : > { %v984_v54 = vrot.slane %v4071_v10, %v4016_v27  ;;  %v992_v3 = vrot.slane %v4092_v33, %v4016_v27  ;;  %v1000_v61 = vrot.slane %v4095_v60, %v4016_v27  ;;  %v507_v47 = vsub.f32 %v368_v44, %v505_v12  ;;  %v6796_v44 = vld [vmem:[#allocation36_spill] sm:$0xff] }
  0xad   : > { %6779 = vst [vmem:[#allocation47_spill] sm:$0xff] %v4034_v41  ;;  %v4044_v18 = vmul.f32 %v4034_v41, %v776_v39  ;;  %v4047_v42 = vmul.f32 %v4034_v41, %v777_v23  ;;  %v882_v25 = vrot.slane %v876_v15, %v4016_v27  ;;  %v936_v39 = vrot.slane %v4028_v7, %v4016_v27  ;;  %v6797_v12 = vld [vmem:[#allocation44_spill] sm:$0xff] }
  0xaf   : > { %6780 = vst [vmem:[#allocation48_spill] sm:$0xff] %v4044_v18  ;;  %6781 = vst [vmem:[#allocation49_spill] sm:$0xff] %v4047_v42  ;;  %v890_v14 = vmul.f32 %v888_v8, %v4047_v42  ;;  %v930_v63 = vmul.f32 %v928_v34, %v4047_v42  ;;  %v4076_v53 = vsel %vm161_vm4, %v882_v25, %v4044_v18 }
  0xb0   : > { %6782 = vst [vmem:[#allocation50_spill] sm:$0xff] %v4076_v53  ;;  %v938_v19 = vmul.f32 %v936_v39, %v4047_v42  ;;  %v921_v38 = vmul.f32 %v920_v56, %v4076_v53  ;;  %v946_v30 = vmul.f32 %v944_v5, %v4047_v42  ;;  %v954_v15 = vmul.f32 %v952_v17, %v4047_v42 }
  0xb1   : > { %v4081_v21 = vsub.f32 %v6783_v13, %v890_v14  ;;  %v4086_v26 = vsub.f32 %v6784_v37, %v930_v63  ;;  %v962_v29 = vmul.f32 %v960_v35, %v4047_v42  ;;  %v970_v4 = vmul.f32 %v968_v43, %v4047_v42  ;;  %v6789_v63 = vld [vmem:[#allocation42_spill] sm:$0xff] }
  0xb2   : > { %v4105_v23 = vsub.f32 %v6785_v9, %v938_v19  ;;  %v4117_v25 = vsub.f32 %v6786_v48, %v946_v30  ;;  %v4125_v49 = vsub.f32 %v6787_v50, %v954_v15  ;;  %v923_v14 = vsub.f32 %v784_v28, %v921_v38  ;;  %v6793_v30 = vld [vmem:[#allocation35_spill] sm:$0xff] }
  0xb3   : > { %v4130_v59 = vsub.f32 %v6788_v6, %v962_v29  ;;  %v6790_v52 = vsub.f32 %v3826_v20, %v6789_v63  ;;  %v978_v31 = vmul.f32 %v976_v51, %v4047_v42  ;;  %v644_v37 = vmul.f32 %v6791_v40, %v3746_v22  ;;  %v6794_v15 = vld [vmem:[#allocation43_spill] sm:$0xff] }
  0xb4   : > { %v986_v19 = vmul.f32 %v984_v54, %v4047_v42  ;;  %v994_v9 = vmul.f32 %v992_v3, %v4047_v42  ;;  %v6792_v28 = vsub.f32 %v3831_v16, %v3976_v57  ;;  %v1002_v20 = vmul.f32 %v1000_v61, %v4047_v42  ;;  %v6800_v57 = vld [vmem:[#allocation40_spill] sm:$0xff] }
  0xb5   : > { %v4139_v13 = vsub.f32 %v6790_v52, %v970_v4  ;;  %v6795_v29 = vsub.f32 %v6793_v30, %v6794_v15  ;;  %v6798_v4 = vsub.f32 %v6796_v44, %v6797_v12  ;;  %v6799_v6 = vsub.f32 %v3844_v62, %v3995_v36  ;;  %v6801_v52 = vld [vmem:[#allocation45_spill] sm:$0xff] }
  0xb6   : > { %v4151_v38 = vsub.f32 %v6792_v28, %v978_v31  ;;  %2884 = vrcp.f32 %v923_v14  ;;  %v646_v16 = vsub.f32 %v507_v47, %v644_v37  ;;  %v783_v31 = vmul.f32 %v6801_v52, %v6800_v57 }
  0xb7   : > { %v4157_v48 = vsub.f32 %v6795_v29, %v986_v19  ;;  %v4162_v50 = vsub.f32 %v6798_v4, %v994_v9  ;;  %v4167_v63 = vsub.f32 %v6799_v6, %v1002_v20  ;;  %v889_v40 = vmul.f32 %v888_v8, %v4076_v53 }
  0xb8   : > { %v929_v19 = vmul.f32 %v928_v34, %v4076_v53  ;;  %v785_v28 = vsub.f32 %v646_v16, %v783_v31  ;;  %v922_v30 = vmul.f32 %v920_v56, %v4047_v42  ;;  %v937_v9 = vmul.f32 %v936_v39, %v4076_v53 }
  0xb9   : > { %v945_v15 = vmul.f32 %v944_v5, %v4076_v53  ;;  %v953_v62 = vmul.f32 %v952_v17, %v4076_v53  ;;  %v961_v36 = vmul.f32 %v960_v35, %v4076_v53  ;;  %v969_v47 = vmul.f32 %v968_v43, %v4076_v53 }
  0xba   : > { %v4180_v37 = vsub.s32 5, %v3141_v1  ;;  %v891_v8 = vsub.f32 %v4019_v2, %v889_v40  ;;  %v931_v34 = vsub.f32 %v4023_v0, %v929_v19  ;;  %v977_v20 = vmul.f32 %v976_v51, %v4076_v53 }
  0xbb   : > { %v985_v56 = vmul.f32 %v984_v54, %v4076_v53  ;;  %v924_v39 = vsub.f32 %v785_v28, %v922_v30  ;;  %v4187_v5 = vsub.f32 %v4028_v7, %v937_v9  ;;  %v4190_v35 = vsub.f32 %v4031_v32, %v945_v15 }
  0xbc   : > { %6802 = vst [vmem:[#allocation42_spill] sm:$0xff] %v4180_v37  ;;  %v4193_v43 = vsub.f32 %v4037_v24, %v953_v62  ;;  %v993_v29 = vmul.f32 %v992_v3, %v4076_v53  ;;  %v1001_v2 = vmul.f32 %v1000_v61, %v4076_v53  ;;  %v4198_v0 = vsub.f32 %v4053_v58, %v961_v36 }
  0xbd   : > { %v971_v51 = vsub.f32 %v4056_v46, %v969_v47  ;;  %v979_v44 = vsub.f32 %v4068_v55, %v977_v20  ;;  %v987_v32 = vsub.f32 %v4071_v10, %v985_v56  ;;  %v1027_v24 = vrot.slane %v891_v8, %v4180_v37 }
  0xbe   : > { %v1067_v12 = vrot.slane %v931_v34, %v4180_v37  ;;  %v1075_v61 = vrot.slane %v4187_v5, %v4180_v37  ;;  %v995_v4 = vsub.f32 %v4092_v33, %v993_v29  ;;  %v1003_v55 = vsub.f32 %v4095_v60, %v1001_v2 }
  0xbf   : > { %v1083_v10 = vrot.slane %v4190_v35, %v4180_v37  ;;  %v1091_v6 = vrot.slane %v4193_v43, %v4180_v37  ;;  %v1107_v40 = vrot.slane %v971_v51, %v4180_v37  ;;  %v1115_v19 = vrot.slane %v979_v44, %v4180_v37 }
  0xc0   : > { %v2885_v17 = vpop.eup %2884  ;;  %v1099_v36 = vrot.slane %v4198_v0, %v4180_v37  ;;  %v1123_v47 = vrot.slane %v987_v32, %v4180_v37  ;;  %v1131_v20 = vrot.slane %v995_v4, %v4180_v37  ;;  %v1139_v29 = vrot.slane %v1003_v55, %v4180_v37 }
  0xc1   : > { %v4202_v54 = vrot.slane %v2885_v17, %v4180_v37  ;;  %v1015_v7 = vadd.f32 1.0, %v2885_v17 }
  0xc3   : > { %6803 = vst [vmem:[#allocation41_spill] sm:$0xff] %v4202_v54  ;;  %v4209_v3 = vmul.f32 %v4202_v54, %v923_v14  ;;  %v4212_v58 = vmul.f32 %v4202_v54, %v924_v39  ;;  %v1021_v46 = vrot.slane %v1015_v7, %v4180_v37 }
  0xc5   : > { %6804 = vst [vmem:[#allocation35_spill] sm:$0xff] %v4209_v3  ;;  %6805 = vst [vmem:[#allocation43_spill] sm:$0xff] %v4212_v58  ;;  %v4226_v14 = vsel %vm167_vm15, %v1021_v46, %v4209_v3  ;;  %v4229_v16 = vmul.f32 %v1027_v24, %v4212_v58  ;;  %v4232_v52 = vmul.f32 %v1067_v12, %v4212_v58 }
  0xc6   : > { %6806 = vst [vmem:[#allocation36_spill] sm:$0xff] %v4226_v14  ;;  %v4235_v33 = vmul.f32 %v1075_v61, %v4212_v58  ;;  %v1028_v60 = vmul.f32 %v1027_v24, %v4226_v14  ;;  %v1068_v31 = vmul.f32 %v1067_v12, %v4226_v14  ;;  %v4248_v15 = vmul.f32 %v1083_v10, %v4212_v58 }
  0xc7   : > { %v4259_v17 = vmul.f32 %v1091_v6, %v4212_v58  ;;  %v4263_v2 = vmul.f32 %v1099_v36, %v4212_v58  ;;  %v4267_v7 = vmul.f32 %v1107_v40, %v4212_v58  ;;  %v1116_v24 = vmul.f32 %v1115_v19, %v4226_v14 }
  0xc8   : > { %v4250_v62 = vsub.f32 %v891_v8, %v1028_v60  ;;  %v1070_v56 = vsub.f32 %v931_v34, %v1068_v31  ;;  %v1108_v8 = vmul.f32 %v1107_v40, %v4226_v14  ;;  %v1076_v34 = vmul.f32 %v1075_v61, %v4226_v14  ;;  %v6808_v61 = vld [vmem:[#allocation27_spill] sm:$0xff] }
  0xc9   : > { %v1084_v12 = vmul.f32 %v1083_v10, %v4226_v14  ;;  %v4275_v60 = vmul.f32 %v1115_v19, %v4212_v58  ;;  %v4283_v9 = vsub.f32 %v979_v44, %v1116_v24  ;;  %v1124_v10 = vmul.f32 %v1123_v47, %v4226_v14 }
  0xca   : > { %v4279_v39 = vsub.f32 %v971_v51, %v1108_v8  ;;  %v4289_v46 = vmul.f32 %v1123_v47, %v4212_v58  ;;  %v1132_v19 = vmul.f32 %v1131_v20, %v4226_v14  ;;  %v4293_v28 = vmul.f32 %v1131_v20, %v4212_v58  ;;  %v6817_v20 = vld [vmem:[#allocation39_spill] sm:$0xff] }
  0xcb   : > { %v1140_v51 = vmul.f32 %v1139_v29, %v4226_v14  ;;  %v4297_v8 = vmul.f32 %v1139_v29, %v4212_v58  ;;  %2886 = vrcp.f32 %v1070_v56  ;;  %v1092_v44 = vmul.f32 %v1091_v6, %v4226_v14 }
  0xcc   : > { %v4300_v24 = vsub.f32 %v987_v32, %v1124_v10  ;;  %v4304_v47 = vsub.f32 %v995_v4, %v1132_v19  ;;  %v1100_v40 = vmul.f32 %v1099_v36, %v4226_v14  ;;  %v1078_v30 = vsub.f32 %v4187_v5, %v1076_v34  ;;  %v6807_v10 = vld [vmem:[#allocation28_spill] sm:$0xff]  ;;  %v6809_v36 = vld [vmem:[#allocation33_spill] sm:$0xff]  ;;  %v6810_v19 = vld [vmem:[#allocation31_spill] sm:$0xff] }
  0xcd   : > { %v4309_v31 = vsub.f32 %v1003_v55, %v1140_v51  ;;  %v1086_v32 = vsub.f32 %v4190_v35, %v1084_v12  ;;  %v1094_v6 = vsub.f32 %v4193_v43, %v1092_v44  ;;  %v588_v4 = vsel %vm143_vm1, %v6808_v61, %v6807_v10  ;;  %v6812_v5 = vld [vmem:[#allocation30_spill] sm:$0xff]  ;;  %v6813_v35 = vld [vmem:[#allocation37_spill] sm:$0xff] }
  0xce   : > { %v727_v55 = vsel %vm149_vm2, %v6810_v19, %v6809_v36  ;;  %v1102_v51 = vsub.f32 %v4198_v0, %v1100_v40  ;;  %v4326_v29 = vsub.s32 6, %v3141_v1  ;;  %v4329_v34 = vrot.slane %v588_v4, %v6812_v5  ;;  %v6816_v44 = vld [vmem:[#allocation34_spill] sm:$0xff] }
  0xcf   : > { %v4332_v43 = vrot.slane %v727_v55, %v6813_v35  ;;  %v4337_v61 = vsub.s32 7, %v3141_v1  ;;  %v6818_v5 = vld [vmem:[#allocation38_spill] sm:$0xff]  ;;  %v6828_v1 = vsub.f32 %v4117_v25, %v4248_v15 }
  0xd0   : > { %6811 = vst [vmem:[#allocation44_spill] sm:$0xff] %v4326_v29  ;;  %v1166_v12 = vrot.slane %v4250_v62, %v4326_v29  ;;  %v619_v10 = vmul.f32 %v4329_v34, %v6816_v44  ;;  %v1214_v40 = vrot.slane %v1078_v30, %v4326_v29  ;;  %v1222_v36 = vrot.slane %v1086_v32, %v4326_v29 }
  0xd1   : > { %6814 = vst [vmem:[#allocation40_spill] sm:$0xff] %v4332_v43  ;;  %6815 = vst [vmem:[#allocation45_spill] sm:$0xff] %v4337_v61  ;;  %v766_v0 = vmul.f32 %v4332_v43, %v3914_v11  ;;  %v1230_v19 = vrot.slane %v1094_v6, %v4326_v29  ;;  %v866_v58 = vsel %vm155_vm3, %v6818_v5, %v6817_v20 }
  0xd2   : > { %v1238_v54 = vrot.slane %v1102_v51, %v4326_v29  ;;  %v4351_v3 = vsub.f32 %v588_v4, %v619_v10  ;;  %v4356_v41 = vrot.slane %v866_v58, %v4016_v27  ;;  %v1246_v45 = vrot.slane %v4279_v39, %v4326_v29 }
  0xd3   : > { %v4353_v44 = vsub.f32 %v727_v55, %v766_v0  ;;  %v1254_v20 = vrot.slane %v4283_v9, %v4326_v29  ;;  %v1262_v5 = vrot.slane %v4300_v24, %v4326_v29  ;;  %v6823_v0 = vsub.f32 %v4086_v26, %v4232_v52 }
  0xd4   : > { %6820 = vst [vmem:[#allocation27_spill] sm:$0xff] %v4356_v41  ;;  %v4369_v4 = vrot.slane %v4351_v3, %v6813_v35  ;;  %v1270_v35 = vrot.slane %v4304_v47, %v4326_v29 }
  0xd5   : > { %v2887_v14 = vpop.eup %2886  ;;  %6819 = vst [vmem:[#allocation28_spill] sm:$0xff] %v4353_v44  ;;  %v4373_v55 = vrot.slane %v4353_v44, %v4016_v27  ;;  %v1278_v27 = vrot.slane %v4309_v31, %v4326_v29 }
  0xd6   : > { %v4359_v18 = vrot.slane %v2887_v14, %v4326_v29  ;;  %v1154_v37 = vadd.f32 1.0, %v2887_v14  ;;  %v913_v14 = vmul.f32 %v4356_v41, %v4076_v53  ;;  %v758_v41 = vmul.f32 %v4369_v4, %v3914_v11 }
  0xd8   : > { %6821 = vst [vmem:[#allocation33_spill] sm:$0xff] %v4359_v18  ;;  %v4378_v10 = vmul.f32 %v4359_v18, %v1070_v56  ;;  %v4384_v42 = vmul.f32 %v4359_v18, %v6823_v0  ;;  %v1160_v43 = vrot.slane %v1154_v37, %v4326_v29  ;;  %v905_v56 = vmul.f32 %v4373_v55, %v4076_v53 }
  0xd9   : > { %v4395_v44 = vsub.f32 %v866_v58, %v913_v14  ;;  %v6826_v14 = vsub.f32 %v4081_v21, %v4229_v16 }
  0xda   : > { %6822 = vst [vmem:[#allocation31_spill] sm:$0xff] %v4378_v10  ;;  %6824 = vst [vmem:[#allocation34_spill] sm:$0xff] %v4384_v42  ;;  %v4400_v26 = vsel %vm173_vm5, %v1160_v43, %v4378_v10  ;;  %v1168_v37 = vmul.f32 %v1166_v12, %v4384_v42  ;;  %v1216_v52 = vmul.f32 %v1214_v40, %v4384_v42 }
  0xdb   : > { %6825 = vst [vmem:[#allocation39_spill] sm:$0xff] %v4395_v44  ;;  %v1224_v0 = vmul.f32 %v1222_v36, %v4384_v42  ;;  %v1167_v18 = vmul.f32 %v1166_v12, %v4400_v26  ;;  %v1215_v11 = vmul.f32 %v1214_v40, %v4400_v26  ;;  %v1223_v29 = vmul.f32 %v1222_v36, %v4400_v26 }
  0xdc   : > { %v1231_v58 = vmul.f32 %v1230_v19, %v4400_v26  ;;  %v4412_v53 = vsub.f32 %v6826_v14, %v1168_v37  ;;  %v6827_v43 = vsub.f32 %v4105_v23, %v4235_v33  ;;  %v1232_v40 = vmul.f32 %v1230_v19, %v4384_v42 }
  0xdd   : > { %v4422_v12 = vsub.f32 %v6828_v1, %v1224_v0  ;;  %v4426_v36 = vsub.f32 %v4250_v62, %v1167_v18  ;;  %v4428_v44 = vsub.f32 %v1078_v30, %v1215_v11  ;;  %v4430_v21 = vsub.f32 %v1086_v32, %v1223_v29 }
  0xde   : > { %v4417_v10 = vsub.f32 %v6827_v43, %v1216_v52  ;;  %v4432_v16 = vsub.f32 %v1094_v6, %v1231_v58  ;;  %v6829_v23 = vsub.f32 %v4125_v49, %v4259_v17  ;;  %v1239_v25 = vmul.f32 %v1238_v54, %v4400_v26  ;;  %v6837_v43 = vld [vmem:[#allocation40_spill] sm:$0xff] }
  0xdf   : > { %v1240_v1 = vmul.f32 %v1238_v54, %v4384_v42  ;;  %v1247_v15 = vmul.f32 %v1246_v45, %v4400_v26  ;;  %v1248_v18 = vmul.f32 %v1246_v45, %v4384_v42  ;;  %v1255_v30 = vmul.f32 %v1254_v20, %v4400_v26 }
  0xe0   : > { %v4437_v33 = vsub.f32 %v6829_v23, %v1232_v40  ;;  %v1256_v62 = vmul.f32 %v1254_v20, %v4384_v42  ;;  %v1263_v29 = vmul.f32 %v1262_v5, %v4400_v26  ;;  %v4446_v32 = vsub.f32 %v1102_v51, %v1239_v25  ;;  %v6838_v23 = vld [vmem:[#allocation49_spill] sm:$0xff] }
  0xe1   : > { %v6830_v49 = vsub.f32 %v4130_v59, %v4263_v2  ;;  %v4454_v6 = vsub.f32 %v4279_v39, %v1247_v15  ;;  %v1264_v54 = vmul.f32 %v1262_v5, %v4384_v42  ;;  %v6831_v45 = vsub.f32 %v4139_v13, %v4267_v7 }
  0xe2   : > { %v4463_v20 = vsub.f32 %v4283_v9, %v1255_v30  ;;  %v6832_v51 = vsub.f32 %v4151_v38, %v4275_v60  ;;  %v4471_v59 = vsub.f32 %v4300_v24, %v1263_v29  ;;  %v6833_v39 = vsub.f32 %v4157_v48, %v4289_v46 }
  0xe3   : > { %v4451_v17 = vsub.f32 %v6830_v49, %v1240_v1  ;;  %v4460_v19 = vsub.f32 %v6831_v45, %v1248_v18  ;;  %v1271_v13 = vmul.f32 %v1270_v35, %v4400_v26  ;;  %v1272_v7 = vmul.f32 %v1270_v35, %v4384_v42  ;;  %v6839_v1 = vld [vmem:[#allocation29_spill] sm:$0xff]  ;;  %v6840_v18 = vld [vmem:[#allocation28_spill] sm:$0xff]  ;;  %v6842_v49 = vld [vmem:[#allocation42_spill] sm:$0xff] }
  0xe4   : > { %v4468_v37 = vsub.f32 %v6832_v51, %v1256_v62  ;;  %v4476_v2 = vsub.f32 %v6833_v39, %v1264_v54  ;;  %v1279_v9 = vmul.f32 %v1278_v27, %v4400_v26  ;;  %v1280_v5 = vmul.f32 %v1278_v27, %v4384_v42  ;;  %v6841_v62 = vld [vmem:[#allocation27_spill] sm:$0xff]  ;;  %v6844_v45 = vld [vmem:[#allocation46_spill] sm:$0xff] }
  0xe5   : > { %2888 = vrcp.f32 %v4428_v44  ;;  %v4485_v38 = vrot.slane %v4426_v36, %v4337_v61  ;;  %v4489_v60 = vrot.slane %v4430_v21, %v4337_v61  ;;  %v4492_v48 = vsub.f32 %v4304_v47, %v1271_v13  ;;  %v6846_v51 = vld [vmem:[#allocation47_spill] sm:$0xff] }
  0xe6   : > { %v6834_v46 = vsub.f32 %v4162_v50, %v4293_v28  ;;  %v4500_v27 = vsub.f32 %v4309_v31, %v1279_v9  ;;  %v1369_v35 = vrot.slane %v4432_v16, %v4337_v61  ;;  %v6836_v52 = vsub.f32 %v4167_v63, %v4297_v8 }
  0xe7   : > { %v4511_v47 = vrot.slane %v4446_v32, %v4337_v61  ;;  %v4515_v50 = vrot.slane %v4454_v6, %v4337_v61  ;;  %v4519_v28 = vrot.slane %v4463_v20, %v4337_v61  ;;  %v4523_v31 = vrot.slane %v4471_v59, %v4337_v61 }
  0xe8   : > { %v4497_v24 = vsub.f32 %v6834_v46, %v1272_v7  ;;  %6835 = vst [vmem:[#allocation38_spill] sm:$0xff] %v4500_v27  ;;  %v4507_v0 = vsub.f32 %v6836_v52, %v1280_v5  ;;  %v4527_v63 = vrot.slane %v4492_v48, %v4337_v61  ;;  %v4531_v8 = vrot.slane %v4500_v27, %v4337_v61  ;;  %v6849_v7 = vld [vmem:[#allocation41_spill] sm:$0xff]  ;;  %v6850_v52 = vld [vmem:[#allocation36_spill] sm:$0xff] }
  0xe9   : > { %v620_v11 = vmul.f32 %v4329_v34, %v3746_v22  ;;  %v759_v58 = vmul.f32 %v4369_v4, %v6800_v57  ;;  %v760_v14 = vsub.f32 %v4351_v3, %v758_v41  ;;  %v767_v40 = vmul.f32 %v6837_v43, %v6800_v57  ;;  %v6843_v34 = vld [vmem:[#allocation39_spill] sm:$0xff]  ;;  %v6845_v3 = vld [vmem:[#allocation48_spill] sm:$0xff] }
  0xea   : > { %v906_v25 = vmul.f32 %v4373_v55, %v6838_v23  ;;  %v907_v30 = vsub.f32 %v6840_v18, %v905_v56  ;;  %v914_v29 = vmul.f32 %v6841_v62, %v6838_v23  ;;  %v1051_v54 = vrot.slane %v6843_v34, %v6842_v49  ;;  %v6848_v55 = vld [vmem:[#allocation35_spill] sm:$0xff] }
  0xeb   : > { %v622_v15 = vsub.f32 %v6839_v1, %v620_v11  ;;  %v896_v4 = vrot.slane %v760_v14, %v6844_v45  ;;  %v769_v41 = vsub.f32 %v3746_v22, %v767_v40  ;;  %v4554_v13 = vsel %vm161_vm4, %v6846_v51, %v6845_v3  ;;  %v6851_v11 = vld [vmem:[#allocation50_spill] sm:$0xff]  ;;  %v6852_v18 = vld [vmem:[#allocation43_spill] sm:$0xff] }
  0xec   : > { %v4560_v56 = vsel %vm167_vm15, %v6849_v7, %v6848_v55  ;;  %v1043_v5 = vrot.slane %v907_v30, %v6842_v49  ;;  %v916_v46 = vsub.f32 %v6800_v57, %v914_v29  ;;  %v1052_v22 = vmul.f32 %v1051_v54, %v6850_v52 }
  0xed   : > { %v4562_v9 = vsub.f32 %v622_v15, %v759_v58  ;;  %v897_v43 = vmul.f32 %v896_v4, %v6851_v11  ;;  %v4569_v40 = vmul.f32 %v896_v4, %v6838_v23  ;;  %v4571_v1 = vsub.f32 %v769_v41, %v906_v25 }
  0xee   : > { %v1053_v62 = vmul.f32 %v1051_v54, %v6852_v18  ;;  %v1044_v3 = vmul.f32 %v1043_v5, %v6850_v52  ;;  %v4576_v58 = vmul.f32 %v1043_v5, %v6852_v18  ;;  %v4579_v15 = vsub.f32 %v6843_v34, %v1052_v22  ;;  %v6853_v54 = vld [vmem:[#allocation44_spill] sm:$0xff] }
  0xef   : > { %v1059_v57 = vrot.slane %v4554_v13, %v6842_v49  ;;  %v2889_v29 = vpop.eup %2888  ;;  %v4583_v51 = vsub.f32 %v760_v14, %v897_v43  ;;  %v4591_v41 = vrot.slane %v4560_v56, %v6853_v54 }
  0xf0   : > { %v4587_v4 = vsub.f32 %v916_v46, %v1053_v62  ;;  %v4594_v55 = vrot.slane %v2889_v29, %v4337_v61  ;;  %v1293_v34 = vadd.f32 1.0, %v2889_v29  ;;  %v4596_v7 = vsub.f32 %v907_v30, %v1044_v3 }
  0xf1   : > { %v1035_v14 = vrot.slane %v4583_v51, %v6842_v49  ;;  %v1190_v46 = vrot.slane %v4579_v15, %v6853_v54  ;;  %v4605_v22 = vmul.f32 %v1059_v57, %v6850_v52  ;;  %v4608_v11 = vmul.f32 %v1059_v57, %v6852_v18 }
  0xf2   : > { %6854 = vst [vmem:[#allocation40_spill] sm:$0xff] %v4594_v55  ;;  %v4612_v43 = vmul.f32 %v4594_v55, %v4428_v44  ;;  %v4616_v30 = vmul.f32 %v4594_v55, %v4417_v10  ;;  %v1299_v62 = vrot.slane %v1293_v34, %v4337_v61  ;;  %v1182_v3 = vrot.slane %v4596_v7, %v6853_v54 }
  0xf3   : > { %v1036_v29 = vmul.f32 %v1035_v14, %v6850_v52  ;;  %v1037_v5 = vmul.f32 %v1035_v14, %v6852_v18  ;;  %v1191_v57 = vmul.f32 %v1190_v46, %v4400_v26  ;;  %v4625_v25 = vmul.f32 %v1190_v46, %v4384_v42 }
  0xf4   : > { %6855 = vst [vmem:[#allocation49_spill] sm:$0xff] %v4612_v43  ;;  %v4630_v44 = vsel %vm179_vm6, %v1299_v62, %v4612_v43  ;;  %v1307_v10 = vmul.f32 %v4485_v38, %v4616_v30  ;;  %v1363_v34 = vmul.f32 %v4489_v60, %v4616_v30  ;;  %v1371_v52 = vmul.f32 %v1369_v35, %v4616_v30 }
  0xf5   : > { %6856 = vst [vmem:[#allocation29_spill] sm:$0xff] %v4630_v44  ;;  %v4639_v14 = vmul.f32 %v4485_v38, %v4630_v44  ;;  %v4643_v46 = vmul.f32 %v4489_v60, %v4630_v44  ;;  %v4646_v49 = vmul.f32 %v1369_v35, %v4630_v44  ;;  %v4650_v62 = vmul.f32 %v4511_v47, %v4630_v44 }
  0xf6   : > { %v4653_v45 = vsub.f32 %v4412_v53, %v1307_v10  ;;  %v4656_v55 = vsub.f32 %v4422_v12, %v1363_v34  ;;  %v4659_v38 = vsub.f32 %v4437_v33, %v1371_v52  ;;  %v1379_v60 = vmul.f32 %v4511_v47, %v4616_v30 }
  0xf7   : > { %v4676_v33 = vmul.f32 %v4515_v50, %v4630_v44  ;;  %v1387_v47 = vmul.f32 %v4515_v50, %v4616_v30  ;;  %v4682_v10 = vmul.f32 %v4519_v28, %v4630_v44  ;;  %v1395_v34 = vmul.f32 %v4519_v28, %v4616_v30 }
  0xf8   : > { %v4672_v12 = vsub.f32 %v4451_v17, %v1379_v60  ;;  %v4688_v52 = vmul.f32 %v4523_v31, %v4630_v44  ;;  %v1403_v17 = vmul.f32 %v4523_v31, %v4616_v30  ;;  %v4694_v60 = vmul.f32 %v4527_v63, %v4630_v44 }
  0xf9   : > { %v4699_v53 = vsub.f32 %v4460_v19, %v1387_v47  ;;  %v1411_v39 = vmul.f32 %v4527_v63, %v4616_v30  ;;  %v4706_v35 = vsub.f32 %v4468_v37, %v1395_v34  ;;  %v4720_v47 = vmul.f32 %v4531_v8, %v4630_v44  ;;  %v6860_v63 = vld [vmem:[#allocation14_spill] sm:$0xff] }
  0xfa   : > { %6857 = vst [vmem:[#allocation28_spill] sm:$0xff] %v4694_v60  ;;  %v4711_v43 = vsub.f32 %v4476_v2, %v1403_v17  ;;  %v1419_v37 = vmul.f32 %v4531_v8, %v4616_v30  ;;  %2890 = vrcp.f32 %v4656_v55  ;;  %v1444_v34 = vrot.slane %v4653_v45, %v6860_v63 }
  0xfb   : > { %v4716_v19 = vsub.f32 %v4497_v24, %v1411_v39  ;;  %6859 = vst [vmem:[#allocation39_spill] sm:$0xff] %v4720_v47  ;;  %v1508_v2 = vrot.slane %v4659_v38, %v6860_v63  ;;  %v1516_v17 = vrot.slane %v4672_v12, %v6860_v63  ;;  %v4733_v24 = vrot.slane %v4699_v53, %v6860_v63 }
  0xfc   : > { %v4738_v8 = vsub.f32 %v4507_v0, %v1419_v37  ;;  %v4742_v50 = vrot.slane %v4706_v35, %v6860_v63  ;;  %v4746_v31 = vrot.slane %v4711_v43, %v6860_v63  ;;  %v1038_v44 = vsub.f32 %v4583_v51, %v1036_v29 }
  0xfd   : > { %6858 = vst [vmem:[#allocation27_spill] sm:$0xff] %v4716_v19  ;;  %v4750_v28 = vrot.slane %v4716_v19, %v6860_v63  ;;  %v6861_v39 = vsub.f32 %v4562_v9, %v4569_v40  ;;  %v1183_v0 = vmul.f32 %v1182_v3, %v4400_v26  ;;  %v1184_v27 = vmul.f32 %v1182_v3, %v4384_v42 }
  0xfe   : > { %v4761_v37 = vrot.slane %v4738_v8, %v6860_v63  ;;  %v4765_v60 = vsub.f32 %v4579_v15, %v1191_v57  ;;  %v1194_v19 = vsub.f32 %v4587_v4, %v4625_v25  ;;  %v1174_v51 = vrot.slane %v1038_v44, %v6853_v54 }
  0xff   : > { %v4756_v47 = vsub.f32 %v6861_v39, %v1037_v5  ;;  %v4771_v9 = vsub.f32 %v4596_v7, %v1183_v0  ;;  %v1062_v40 = vsub.f32 %v4554_v13, %v4605_v22  ;;  %v1063_v5 = vsub.f32 %v6838_v23, %v4608_v11  ;;  %v6865_v11 = vld [vmem:[#allocation33_spill] sm:$0xff] }
 0x100   : > { %v6862_v3 = vsub.f32 %v4571_v1, %v4576_v58  ;;  %v4782_v15 = vrot.slane %v4765_v60, %v4337_v61  ;;  %v1207_v25 = vmul.f32 %v4591_v41, %v4400_v26  ;;  %v1208_v4 = vmul.f32 %v4591_v41, %v4384_v42  ;;  %v6864_v41 = vld [vmem:[#allocation31_spill] sm:$0xff] }
 0x101   : > { %v1175_v7 = vmul.f32 %v1174_v51, %v4400_v26  ;;  %v4790_v13 = vmul.f32 %v1174_v51, %v4384_v42  ;;  %v4794_v23 = vrot.slane %v4771_v9, %v4337_v61  ;;  %v4807_v39 = vsel %vm173_vm5, %v6865_v11, %v6864_v41 }
 0x102   : > { %v1186_v29 = vsub.f32 %v6862_v3, %v1184_v27  ;;  %v1198_v27 = vrot.slane %v1062_v40, %v6853_v54  ;;  %v1331_v1 = vmul.f32 %v4782_v15, %v4616_v30  ;;  %v4800_v58 = vsub.f32 %v4560_v56, %v1207_v25  ;;  %6867 = vst [vmem:[#allocation47_spill] sm:$0xff] %v4807_v39 }
 0x103   : > { %v1210_v22 = vsub.f32 %v6852_v18, %v1208_v4  ;;  %v4809_v0 = vsub.f32 %v1038_v44, %v1175_v7  ;;  %v1323_v3 = vmul.f32 %v4794_v23, %v4616_v30  ;;  %v4825_v44 = vrot.slane %v4807_v39, %v4337_v61 }
 0x104   : > { %6863 = vst [vmem:[#allocation48_spill] sm:$0xff] %v4800_v58  ;;  %v1199_v54 = vmul.f32 %v1198_v27, %v4400_v26  ;;  %v2891_v56 = vpop.eup %2890  ;;  %v4816_v25 = vsub.f32 %v1194_v19, %v1331_v1  ;;  %v1200_v18 = vmul.f32 %v1198_v27, %v4384_v42  ;;  %v4821_v4 = vrot.slane %v4800_v58, %v4337_v61 }
 0x105   : > { %v4828_v7 = vrot.slane %v2891_v56, %v6860_v63  ;;  %v1432_v41 = vadd.f32 1.0, %v2891_v56  ;;  %v1313_v26 = vrot.slane %v4809_v0, %v4337_v61  ;;  %v4832_v11 = vsub.f32 %v1186_v29, %v1323_v3 }
 0x106   : > { %v4836_v19 = vrot.slane %v4816_v25, %v6860_v63  ;;  %v4838_v27 = vsub.f32 %v1062_v40, %v1199_v54  ;;  %v4840_v1 = vsub.f32 %v1063_v5, %v1200_v18  ;;  %v1347_v51 = vmul.f32 %v4821_v4, %v4616_v30 }
 0x107   : > { %6868 = vst [vmem:[#allocation35_spill] sm:$0xff] %v4828_v7  ;;  %v6869_v39 = vsub.f32 %v4430_v21, %v4643_v46  ;;  %v4852_v29 = vmul.f32 %v4828_v7, %v4656_v55  ;;  %v1438_v3 = vrot.slane %v1432_v41, %v6860_v63  ;;  %v1315_v54 = vmul.f32 %v1313_v26, %v4616_v30 }
 0x108   : > { %v1460_v40 = vrot.slane %v4832_v11, %v6860_v63  ;;  %v1337_v5 = vrot.slane %v4838_v27, %v4337_v61  ;;  %v4860_v18 = vsub.f32 %v1210_v22, %v1347_v51  ;;  %v4864_v21 = vmul.f32 %v4825_v44, %v4616_v30 }
 0x109   : > { %v4848_v56 = vmul.f32 %v4828_v7, %v6869_v39  ;;  %6871 = vst [vmem:[#allocation36_spill] sm:$0xff] %v4852_v29  ;;  %v4869_v55 = vsel %vm186_vm7, %v1438_v3, %v4852_v29  ;;  %v6873_v46 = vsub.f32 %v4426_v36, %v4639_v14  ;;  %v6874_v29 = vsub.f32 %v4432_v16, %v4646_v49 }
 0x10a   : > { %v1446_v57 = vmul.f32 %v1444_v34, %v4869_v55  ;;  %v1510_v22 = vmul.f32 %v1508_v2, %v4869_v55  ;;  %v1518_v51 = vmul.f32 %v1516_v17, %v4869_v55  ;;  %v6876_v16 = vsub.f32 %v4454_v6, %v4676_v33 }
 0x10b   : > { %6870 = vst [vmem:[#allocation41_spill] sm:$0xff] %v4848_v56  ;;  %v1445_v39 = vmul.f32 %v1444_v34, %v4848_v56  ;;  %v1509_v41 = vmul.f32 %v1508_v2, %v4848_v56  ;;  %v1517_v7 = vmul.f32 %v1516_v17, %v4848_v56  ;;  %v1525_v61 = vmul.f32 %v4733_v24, %v4848_v56 }
 0x10c   : > { %v6875_v34 = vsub.f32 %v4446_v32, %v4650_v62  ;;  %v1526_v2 = vmul.f32 %v4733_v24, %v4869_v55  ;;  %v4897_v17 = vsub.f32 %v4653_v45, %v1446_v57  ;;  %v4900_v36 = vsub.f32 %v4659_v38, %v1510_v22 }
 0x10d   : > { %v4882_v3 = vsub.f32 %v6873_v46, %v1445_v39  ;;  %v4887_v58 = vsub.f32 %v6874_v29, %v1509_v41  ;;  %v4903_v14 = vsub.f32 %v4672_v12, %v1518_v51  ;;  %v4908_v49 = vsub.f32 %v6876_v16, %v1525_v61  ;;  %v6879_v29 = vld [vmem:[#allocation28_spill] sm:$0xff]  ;;  %v6883_v41 = vld [vmem:[#allocation39_spill] sm:$0xff] }
 0x10e   : > { %v4892_v42 = vsub.f32 %v6875_v34, %v1517_v7  ;;  %v4911_v32 = vsub.f32 %v4699_v53, %v1526_v2  ;;  %v1533_v62 = vmul.f32 %v4742_v50, %v4848_v56  ;;  %v1534_v45 = vmul.f32 %v4742_v50, %v4869_v55 }
 0x10f   : > { %v1541_v38 = vmul.f32 %v4746_v31, %v4848_v56  ;;  %v1542_v12 = vmul.f32 %v4746_v31, %v4869_v55  ;;  %v1549_v6 = vmul.f32 %v4750_v28, %v4848_v56  ;;  %v1550_v61 = vmul.f32 %v4750_v28, %v4869_v55 }
 0x110   : > { %v1557_v53 = vmul.f32 %v4761_v37, %v4848_v56  ;;  %v6877_v33 = vsub.f32 %v4463_v20, %v4682_v10  ;;  %v4933_v50 = vsub.f32 %v4706_v35, %v1534_v45  ;;  %v6878_v31 = vsub.f32 %v4471_v59, %v4688_v52  ;;  %v6881_v10 = vld [vmem:[#allocation27_spill] sm:$0xff]  ;;  %v6882_v35 = vld [vmem:[#allocation38_spill] sm:$0xff] }
 0x111   : > { %v1558_v7 = vmul.f32 %v4761_v37, %v4869_v55  ;;  %v4943_v28 = vsub.f32 %v4711_v43, %v1542_v12  ;;  %v6880_v46 = vsub.f32 %v4492_v48, %v6879_v29  ;;  %v4951_v39 = vsub.f32 %v6881_v10, %v1550_v61  ;;  %v6885_v43 = vld [vmem:[#allocation26_spill] sm:$0xff] }
 0x112   : > { %v4930_v24 = vsub.f32 %v6877_v33, %v1533_v62  ;;  %v4938_v57 = vsub.f32 %v6878_v31, %v1541_v38  ;;  %v6884_v22 = vsub.f32 %v6882_v35, %v6883_v41  ;;  %2892 = vrcp.f32 %v4900_v36  ;;  %v6886_v62 = vld [vmem:[#allocation29_spill] sm:$0xff] }
 0x113   : > { %v4948_v20 = vsub.f32 %v6880_v46, %v1549_v6  ;;  %v4959_v52 = vsub.f32 %v4738_v8, %v1558_v7  ;;  %v4964_v37 = vrot.slane %v4897_v17, %v6885_v43  ;;  %v4968_v48 = vrot.slane %v4903_v14, %v6885_v43 }
 0x114   : > { %v4956_v59 = vsub.f32 %v6884_v22, %v1557_v53  ;;  %v4972_v51 = vrot.slane %v4911_v32, %v6885_v43  ;;  %v4976_v34 = vrot.slane %v4933_v50, %v6885_v43  ;;  %v4980_v8 = vrot.slane %v4943_v28, %v6885_v43 }
 0x115   : > { %v4984_v2 = vrot.slane %v4951_v39, %v6885_v43  ;;  %v4988_v16 = vrot.slane %v4959_v52, %v6885_v43  ;;  %v1314_v45 = vmul.f32 %v1313_v26, %v6886_v62  ;;  %v6887_v38 = vsub.f32 %v4756_v47, %v4790_v13 }
 0x116   : > { %v1322_v6 = vmul.f32 %v4794_v23, %v6886_v62  ;;  %v1461_v61 = vmul.f32 %v1460_v40, %v4848_v56  ;;  %v1462_v53 = vmul.f32 %v1460_v40, %v4869_v55  ;;  %v1330_v33 = vmul.f32 %v4782_v15, %v6886_v62 }
 0x117   : > { %v1317_v12 = vsub.f32 %v6887_v38, %v1315_v54  ;;  %v1469_v31 = vmul.f32 %v4836_v19, %v4848_v56  ;;  %v1316_v7 = vsub.f32 %v4809_v0, %v1314_v45  ;;  %v1470_v13 = vmul.f32 %v4836_v19, %v4869_v55 }
 0x118   : > { %v1324_v47 = vsub.f32 %v4771_v9, %v1322_v6  ;;  %v5008_v23 = vsub.f32 %v4832_v11, %v1462_v53  ;;  %v1332_v54 = vsub.f32 %v4765_v60, %v1330_v33  ;;  %v1338_v40 = vmul.f32 %v1337_v5, %v6886_v62  ;;  %v6893_v33 = vld [vmem:[#allocation40_spill] sm:$0xff] }
 0x119   : > { %v1452_v26 = vrot.slane %v1317_v12, %v6860_v63  ;;  %v1339_v15 = vmul.f32 %v1337_v5, %v4616_v30  ;;  %v5018_v9 = vsub.f32 %v4816_v25, %v1470_v13  ;;  %v1346_v25 = vmul.f32 %v4821_v4, %v6886_v62  ;;  %v6892_v4 = vld [vmem:[#allocation49_spill] sm:$0xff] }
 0x11a   : > { %v5015_v46 = vsub.f32 %v1324_v47, %v1461_v61  ;;  %v5022_v19 = vrot.slane %v5008_v23, %v6885_v43  ;;  %v5024_v11 = vsub.f32 %v1332_v54, %v1469_v31  ;;  %v1340_v60 = vsub.f32 %v4838_v27, %v1338_v40  ;;  %v6891_v61 = vld [vmem:[#allocation48_spill] sm:$0xff]  ;;  %v6897_v40 = vld [vmem:[#allocation47_spill] sm:$0xff] }
 0x11b   : > { %v1453_v29 = vmul.f32 %v1452_v26, %v4848_v56  ;;  %v1454_v0 = vmul.f32 %v1452_v26, %v4869_v55  ;;  %v1341_v10 = vsub.f32 %v4840_v1, %v1339_v15  ;;  %v5034_v41 = vrot.slane %v5018_v9, %v6885_v43  ;;  %v6890_v1 = vld [vmem:[#allocation34_spill] sm:$0xff] }
 0x11c   : > { %6888 = vst [vmem:[#allocation50_spill] sm:$0xff] %v5015_v46  ;;  %6889 = vst [vmem:[#allocation43_spill] sm:$0xff] %v5024_v11  ;;  %v1484_v45 = vrot.slane %v4860_v18, %v6860_v63  ;;  %v5043_v27 = vmul.f32 %v4825_v44, %v6886_v62  ;;  %v5047_v38 = vsub.f32 %v6890_v1, %v4864_v21 }
 0x11d   : > { %v5028_v5 = vsub.f32 %v1316_v7, %v1453_v29  ;;  %v5030_v35 = vsub.f32 %v1317_v12, %v1454_v0  ;;  %v1476_v22 = vrot.slane %v1341_v10, %v6860_v63  ;;  %v2893_v12 = vpop.eup %2892  ;;  %v1348_v53 = vsub.f32 %v6891_v61, %v1346_v25 }
 0x11e   : > { %v5056_v7 = vsel %vm179_vm6, %v6893_v33, %v6892_v4  ;;  %v5060_v44 = vrot.slane %v4616_v30, %v6860_v63  ;;  %v5063_v62 = vrot.slane %v2893_v12, %v6885_v43  ;;  %v1571_v21 = vadd.f32 1.0, %v2893_v12 }
 0x11f   : > { %v1591_v6 = vrot.slane %v5030_v35, %v6885_v43  ;;  %6895 = vst [vmem:[#allocation14_spill] sm:$0xff] %v5056_v7  ;;  %v1477_v26 = vmul.f32 %v1476_v22, %v4848_v56  ;;  %v1478_v47 = vmul.f32 %v1476_v22, %v4869_v55  ;;  %v1485_v13 = vmul.f32 %v1484_v45, %v4848_v56 }
 0x120   : > { %6896 = vst [vmem:[#allocation31_spill] sm:$0xff] %v5063_v62  ;;  %v1486_v54 = vmul.f32 %v1484_v45, %v4869_v55  ;;  %v1492_v29 = vrot.slane %v5047_v38, %v6860_v63  ;;  %v5075_v0 = vmul.f32 %v5063_v62, %v4887_v58  ;;  %v5079_v25 = vmul.f32 %v5063_v62, %v4900_v36 }
 0x121   : > { %v1577_v22 = vrot.slane %v1571_v21, %v6885_v43  ;;  %v5082_v1 = vsub.f32 %v1340_v60, %v1477_v26  ;;  %v5084_v12 = vsub.f32 %v1341_v10, %v1478_v47  ;;  %v5086_v45 = vsub.f32 %v1348_v53, %v1485_v13 }
 0x122   : > { %6898 = vst [vmem:[#allocation33_spill] sm:$0xff] %v5079_v25  ;;  %v5089_v61 = vsub.f32 %v4860_v18, %v1486_v54  ;;  %v1493_v63 = vmul.f32 %v1492_v29, %v4848_v56  ;;  %v5099_v36 = vmul.f32 %v4964_v37, %v5075_v0  ;;  %v5103_v60 = vmul.f32 %v4968_v48, %v5075_v0 }
 0x123   : > { %v5095_v4 = vsel %vm192_vm8, %v1577_v22, %v5079_v25  ;;  %v5107_v10 = vmul.f32 %v4972_v51, %v5075_v0  ;;  %v5117_v31 = vmul.f32 %v4976_v34, %v5075_v0  ;;  %v5141_v47 = vmul.f32 %v4980_v8, %v5075_v0 }
 0x124   : > { %v1585_v18 = vmul.f32 %v4964_v37, %v5095_v4  ;;  %v1657_v53 = vmul.f32 %v4968_v48, %v5095_v4  ;;  %v1665_v33 = vmul.f32 %v4972_v51, %v5095_v4  ;;  %v1673_v37 = vmul.f32 %v4976_v34, %v5095_v4 }
 0x125   : > { %v1681_v34 = vmul.f32 %v4980_v8, %v5095_v4  ;;  %v1601_v54 = vmul.f32 %v5022_v19, %v5095_v4  ;;  %v5205_v26 = vmul.f32 %v5034_v41, %v5075_v0  ;;  %v1609_v15 = vmul.f32 %v5034_v41, %v5095_v4 }
 0x126   : > { %v5128_v48 = vsub.f32 %v4897_v17, %v1585_v18  ;;  %v1659_v51 = vsub.f32 %v4903_v14, %v1657_v53  ;;  %v5132_v13 = vsub.f32 %v4911_v32, %v1665_v33  ;;  %v5137_v22 = vsub.f32 %v4933_v50, %v1673_v37  ;;  %v6900_v33 = vld [vmem:[#allocation30_spill] sm:$0xff] }
 0x127   : > { %v5147_v17 = vmul.f32 %v4984_v2, %v5075_v0  ;;  %v1689_v14 = vmul.f32 %v4984_v2, %v5095_v4  ;;  %v5153_v32 = vmul.f32 %v4988_v16, %v5075_v0  ;;  %v1697_v50 = vmul.f32 %v4988_v16, %v5095_v4  ;;  %6903 = vst [vmem:[#allocation38_spill] sm:$0xff] %v5205_v26 }
 0x128   : > { %2894 = vrcp.f32 %v1659_v51  ;;  %v5160_v8 = vsub.f32 %v4943_v28, %v1681_v34  ;;  %v1722_v2 = vrot.slane %v5128_v48, %v6900_v33  ;;  %v1802_v18 = vrot.slane %v5132_v13, %v6900_v33 }
 0x129   : > { %v5167_v37 = vsub.f32 %v4951_v39, %v1689_v14  ;;  %v5172_v16 = vsub.f32 %v4959_v52, %v1697_v50  ;;  %v1810_v28 = vrot.slane %v5137_v22, %v6900_v33  ;;  %v5181_v53 = vmul.f32 %v1591_v6, %v5075_v0 }
 0x12a   : > { %v1818_v34 = vrot.slane %v5160_v8, %v6900_v33  ;;  %v1593_v39 = vmul.f32 %v1591_v6, %v5095_v4  ;;  %v5194_v50 = vmul.f32 %v5022_v19, %v5075_v0  ;;  %v5212_v25 = vsub.f32 %v5008_v23, %v1601_v54 }
 0x12b   : > { %v5186_v14 = vrot.slane %v5167_v37, %v6900_v33  ;;  %v5190_v52 = vrot.slane %v5172_v16, %v6900_v33  ;;  %v1615_v19 = vrot.slane %v5084_v12, %v6885_v43  ;;  %v5225_v41 = vsub.f32 %v5018_v9, %v1609_v15 }
 0x12c   : > { %6901 = vst [vmem:[#allocation28_spill] sm:$0xff] %v5194_v50  ;;  %v5201_v6 = vsub.f32 %v5030_v35, %v1593_v39  ;;  %v1623_v35 = vrot.slane %v5089_v61, %v6885_v43  ;;  %v1494_v62 = vmul.f32 %v1492_v29, %v4869_v55  ;;  %v1738_v23 = vrot.slane %v5212_v25, %v6900_v33 }
 0x12d   : > { %6904 = vst [vmem:[#allocation39_spill] sm:$0xff] %v5225_v41  ;;  %v5231_v54 = vmul.f32 %v1615_v19, %v5075_v0  ;;  %v1617_v50 = vmul.f32 %v1615_v19, %v5095_v4  ;;  %v6905_v9 = vsub.f32 %v6897_v40, %v5043_v27 }
 0x12e   : > { %6902 = vst [vmem:[#allocation27_spill] sm:$0xff] %v5201_v6  ;;  %v5220_v39 = vrot.slane %v5201_v6, %v6900_v33  ;;  %v5235_v46 = vmul.f32 %v1623_v35, %v5075_v0  ;;  %v1746_v6 = vrot.slane %v5225_v41, %v6900_v33  ;;  %v1625_v21 = vmul.f32 %v1623_v35, %v5095_v4  ;;  %v6909_v41 = vld [vmem:[#allocation35_spill] sm:$0xff] }
 0x12f   : > { %v5243_v15 = vsub.f32 %v6905_v9, %v1493_v63  ;;  %v5246_v29 = vsub.f32 %v5047_v38, %v1494_v62  ;;  %v5251_v11 = vsub.f32 %v5084_v12, %v1617_v50  ;;  %v5257_v35 = vmul.f32 %v5060_v44, %v4848_v56  ;;  %v6908_v9 = vld [vmem:[#allocation36_spill] sm:$0xff] }
 0x130   : > { %v5263_v38 = vsub.f32 %v5089_v61, %v1625_v21  ;;  %v1502_v63 = vmul.f32 %v5060_v44, %v4869_v55  ;;  %v6911_v61 = vsub.f32 %v4892_v42, %v5103_v60 }
 0x131   : > { %6906 = vst [vmem:[#allocation26_spill] sm:$0xff] %v5257_v35  ;;  %v1631_v62 = vrot.slane %v5246_v29, %v6885_v43  ;;  %v1754_v12 = vrot.slane %v5251_v11, %v6900_v33  ;;  %v6914_v35 = vsub.f32 %v4882_v3, %v5099_v36 }
 0x132   : > { %v2895_v26 = vpop.eup %2894  ;;  %v1762_v44 = vrot.slane %v5263_v38, %v6900_v33 }
 0x133   : > { %v5260_v27 = vrot.slane %v2895_v26, %v6900_v33  ;;  %v1710_v40 = vadd.f32 1.0, %v2895_v26  ;;  %v5277_v26 = vsel %vm186_vm7, %v6909_v41, %v6908_v9  ;;  %v5292_v50 = vmul.f32 %v1631_v62, %v5075_v0 }
 0x134   : > { %6910 = vst [vmem:[#allocation34_spill] sm:$0xff] %v5277_v26  ;;  %v1633_v41 = vmul.f32 %v1631_v62, %v5095_v4  ;;  %v5296_v9 = vsub.f32 %v4616_v30, %v1502_v63  ;;  %v1647_v42 = vrot.slane %v5277_v26, %v6885_v43  ;;  %v6916_v26 = vsub.f32 %v4930_v24, %v5117_v31 }
 0x135   : > { %6907 = vst [vmem:[#allocation29_spill] sm:$0xff] %v5260_v27  ;;  %v5283_v21 = vmul.f32 %v5260_v27, %v6911_v61  ;;  %v5286_v19 = vmul.f32 %v5260_v27, %v1659_v51  ;;  %v1716_v55 = vrot.slane %v1710_v40, %v6900_v33 }
 0x137   : > { %6912 = vst [vmem:[#allocation48_spill] sm:$0xff] %v5283_v21  ;;  %6913 = vst [vmem:[#allocation49_spill] sm:$0xff] %v5286_v19  ;;  %v5303_v60 = vsel %vm198_vm9, %v1716_v55, %v5286_v19  ;;  %v1723_v51 = vmul.f32 %v1722_v2, %v5283_v21  ;;  %v1803_v40 = vmul.f32 %v1802_v18, %v5283_v21 }
 0x138   : > { %v1811_v61 = vmul.f32 %v1810_v28, %v5283_v21  ;;  %v1724_v27 = vmul.f32 %v1722_v2, %v5303_v60  ;;  %v1804_v62 = vmul.f32 %v1802_v18, %v5303_v60  ;;  %v1812_v30 = vmul.f32 %v1810_v28, %v5303_v60 }
 0x139   : > { %v1819_v63 = vmul.f32 %v1818_v34, %v5283_v21  ;;  %v5315_v7 = vsub.f32 %v6914_v35, %v1723_v51  ;;  %v6915_v55 = vsub.f32 %v4908_v49, %v5107_v10  ;;  %v1820_v18 = vmul.f32 %v1818_v34, %v5303_v60 }
 0x13a   : > { %v5325_v2 = vsub.f32 %v6916_v26, %v1811_v61  ;;  %v5329_v28 = vsub.f32 %v5128_v48, %v1724_v27  ;;  %v1806_v56 = vsub.f32 %v5132_v13, %v1804_v62  ;;  %v5333_v3 = vsub.f32 %v5137_v22, %v1812_v30  ;;  %v6918_v22 = vld [vmem:[#allocation37_spill] sm:$0xff] }
 0x13b   : > { %v5320_v19 = vsub.f32 %v6915_v55, %v1803_v40  ;;  %v6917_v49 = vsub.f32 %v4938_v57, %v5141_v47  ;;  %v5341_v10 = vsub.f32 %v5160_v8, %v1820_v18  ;;  %v1827_v24 = vmul.f32 %v5186_v14, %v5283_v21  ;;  %v6924_v55 = vld [vmem:[#allocation28_spill] sm:$0xff] }
 0x13c   : > { %v1828_v31 = vmul.f32 %v5186_v14, %v5303_v60  ;;  %v1835_v48 = vmul.f32 %v5190_v52, %v5283_v21  ;;  %v1836_v13 = vmul.f32 %v5190_v52, %v5303_v60  ;;  %2896 = vrcp.f32 %v1806_v56 }
 0x13d   : > { %v5338_v36 = vsub.f32 %v6917_v49, %v1819_v63  ;;  %v5353_v57 = vrot.slane %v5329_v28, %v6918_v22  ;;  %v5357_v47 = vrot.slane %v5333_v3, %v6918_v22  ;;  %v6919_v8 = vsub.f32 %v4948_v20, %v5147_v17  ;;  %v6923_v63 = vld [vmem:[#allocation50_spill] sm:$0xff] }
 0x13e   : > { %v5365_v14 = vsub.f32 %v5167_v37, %v1828_v31  ;;  %v6920_v52 = vsub.f32 %v4956_v59, %v5153_v32  ;;  %v1957_v27 = vrot.slane %v5341_v10, %v6918_v22  ;;  %v5375_v26 = vsub.f32 %v5172_v16, %v1836_v13  ;;  %v6929_v13 = vld [vmem:[#allocation39_spill] sm:$0xff] }
 0x13f   : > { %v5362_v34 = vsub.f32 %v6919_v8, %v1827_v24  ;;  %v1731_v51 = vmul.f32 %v5220_v39, %v5283_v21  ;;  %v1732_v20 = vmul.f32 %v5220_v39, %v5303_v60  ;;  %v1739_v17 = vmul.f32 %v1738_v23, %v5283_v21  ;;  %v6922_v39 = vld [vmem:[#allocation27_spill] sm:$0xff]  ;;  %v6927_v24 = vld [vmem:[#allocation38_spill] sm:$0xff] }
 0x140   : > { %v5370_v35 = vsub.f32 %v6920_v52, %v1835_v48  ;;  %v1965_v37 = vrot.slane %v5365_v14, %v6918_v22  ;;  %v1740_v59 = vmul.f32 %v1738_v23, %v5303_v60  ;;  %v1747_v32 = vmul.f32 %v1746_v6, %v5283_v21 }
 0x141   : > { %v1748_v40 = vmul.f32 %v1746_v6, %v5303_v60  ;;  %v5389_v16 = vrot.slane %v5375_v26, %v6918_v22  ;;  %v6921_v61 = vsub.f32 %v5028_v5, %v5181_v53  ;;  %v5397_v30 = vsub.f32 %v6922_v39, %v1732_v20  ;;  %v6926_v6 = vld [vmem:[#allocation43_spill] sm:$0xff] }
 0x142   : > { %v6925_v18 = vsub.f32 %v6923_v63, %v6924_v55  ;;  %v5405_v49 = vsub.f32 %v5212_v25, %v1740_v59  ;;  %v6928_v31 = vsub.f32 %v6926_v6, %v6927_v24  ;;  %v1755_v53 = vmul.f32 %v1754_v12, %v5283_v21 }
 0x143   : > { %v5394_v62 = vsub.f32 %v6921_v61, %v1731_v51  ;;  %v5413_v5 = vsub.f32 %v6929_v13, %v1748_v40  ;;  %v1869_v8 = vrot.slane %v5397_v30, %v6918_v22  ;;  %v1756_v52 = vmul.f32 %v1754_v12, %v5303_v60  ;;  %v6935_v13 = vld [vmem:[#allocation41_spill] sm:$0xff] }
 0x144   : > { %v5402_v23 = vsub.f32 %v6925_v18, %v1739_v17  ;;  %v5410_v48 = vsub.f32 %v6928_v31, %v1747_v32  ;;  %v1763_v51 = vmul.f32 %v1762_v44, %v5283_v21  ;;  %v1764_v25 = vmul.f32 %v1762_v44, %v5303_v60 }
 0x145   : > { %v5423_v20 = vrot.slane %v5405_v49, %v6918_v22  ;;  %v5427_v17 = vrot.slane %v5413_v5, %v6918_v22  ;;  %v6930_v59 = vsub.f32 %v5082_v1, %v5231_v54  ;;  %v1634_v12 = vsub.f32 %v5243_v15, %v5292_v50  ;;  %v6934_v50 = vld [vmem:[#allocation31_spill] sm:$0xff] }
 0x146   : > { %v5437_v40 = vsub.f32 %v5251_v11, %v1756_v52  ;;  %v6932_v44 = vsub.f32 %v5086_v45, %v5235_v46  ;;  %v5445_v39 = vsub.f32 %v5263_v38, %v1764_v25  ;;  %v1635_v63 = vsub.f32 %v5246_v29, %v1633_v41  ;;  %v6933_v11 = vld [vmem:[#allocation33_spill] sm:$0xff]  ;;  %v2897_v45 = vpop.eup %2896  ;;  %v6936_v52 = vld [vmem:[#allocation34_spill] sm:$0xff] }
 0x147   : > { %v5432_v32 = vsub.f32 %v6930_v59, %v1755_v53  ;;  %v1639_v1 = vrot.slane %v5296_v9, %v6885_v43  ;;  %v5451_v54 = vmul.f32 %v1647_v42, %v5075_v0  ;;  %v1649_v15 = vmul.f32 %v1647_v42, %v5095_v4 }
 0x148   : > { %v5442_v61 = vsub.f32 %v6932_v44, %v1763_v51  ;;  %v5458_v46 = vsel %vm192_vm8, %v6934_v50, %v6933_v11  ;;  %v1893_v38 = vrot.slane %v5437_v40, %v6918_v22  ;;  %v5464_v29 = vrot.slane %v5445_v39, %v6918_v22 }
 0x149   : > { %6931 = vst [vmem:[#allocation40_spill] sm:$0xff] %v5432_v32  ;;  %v1770_v43 = vrot.slane %v1635_v63, %v6900_v33  ;;  %v5469_v41 = vrot.slane %v5458_v46, %v6900_v33  ;;  %v5472_v42 = vrot.slane %v2897_v45, %v6918_v22  ;;  %v1849_v55 = vadd.f32 1.0, %v2897_v45 }
 0x14a   : > { %v1640_v18 = vmul.f32 %v1639_v1, %v5075_v0  ;;  %v1641_v6 = vmul.f32 %v1639_v1, %v5095_v4  ;;  %v5481_v51 = vsub.f32 %v6936_v52, %v1649_v15  ;;  %v6938_v4 = vld [vmem:[#allocation14_spill] sm:$0xff] }
 0x14b   : > { %v1771_v24 = vmul.f32 %v1770_v43, %v5283_v21  ;;  %v1772_v31 = vmul.f32 %v1770_v43, %v5303_v60  ;;  %v5485_v25 = vmul.f32 %v5472_v42, %v5320_v19  ;;  %v5488_v59 = vmul.f32 %v5472_v42, %v1806_v56  ;;  %v6939_v1 = vld [vmem:[#allocation26_spill] sm:$0xff] }
 0x14c   : > { %v1855_v44 = vrot.slane %v1849_v55, %v6918_v22  ;;  %v6940_v11 = vsub.f32 %v6938_v4, %v6939_v1  ;;  %v5501_v15 = vsub.f32 %v5296_v9, %v1641_v6  ;;  %v1786_v19 = vrot.slane %v5481_v51, %v6900_v33 }
 0x14d   : > { %6937 = vst [vmem:[#allocation8_spill] sm:$0xff] %v5485_v25  ;;  %v5496_v45 = vsub.f32 %v1634_v12, %v1771_v24  ;;  %v5498_v43 = vsub.f32 %v1635_v63, %v1772_v31  ;;  %v5512_v55 = vmul.f32 %v5353_v57, %v5485_v25  ;;  %v5516_v12 = vmul.f32 %v5357_v47, %v5485_v25 }
 0x14e   : > { %v5494_v50 = vsub.f32 %v6940_v11, %v1640_v18  ;;  %v5508_v56 = vsel %vm204_vm10, %v1855_v44, %v5488_v59  ;;  %v5519_v63 = vmul.f32 %v1957_v27, %v5485_v25  ;;  %v5527_v24 = vmul.f32 %v1965_v37, %v5485_v25 }
 0x14f   : > { %6941 = vst [vmem:[#allocation47_spill] sm:$0xff] %v5508_v56  ;;  %v1863_v9 = vmul.f32 %v5353_v57, %v5508_v56  ;;  %v1951_v18 = vmul.f32 %v5357_v47, %v5508_v56  ;;  %v1959_v6 = vmul.f32 %v1957_v27, %v5508_v56  ;;  %v1967_v4 = vmul.f32 %v1965_v37, %v5508_v56 }
 0x150   : > { %v5550_v31 = vmul.f32 %v5389_v16, %v5485_v25  ;;  %v1975_v37 = vmul.f32 %v5389_v16, %v5508_v56  ;;  %v5580_v44 = vmul.f32 %v5423_v20, %v5485_v25  ;;  %v1787_v53 = vmul.f32 %v1786_v19, %v5283_v21 }
 0x151   : > { %v5537_v57 = vsub.f32 %v5329_v28, %v1863_v9  ;;  %v1953_v47 = vsub.f32 %v5333_v3, %v1951_v18  ;;  %v5541_v27 = vsub.f32 %v5341_v10, %v1959_v6  ;;  %v5546_v11 = vsub.f32 %v5365_v14, %v1967_v4  ;;  %v6943_v3 = vld [vmem:[#allocation46_spill] sm:$0xff] }
 0x152   : > { %v5555_v28 = vmul.f32 %v1869_v8, %v5485_v25  ;;  %v1871_v14 = vmul.f32 %v1869_v8, %v5508_v56  ;;  %v5569_v6 = vsub.f32 %v5375_v26, %v1975_v37  ;;  %v1879_v8 = vmul.f32 %v5423_v20, %v5508_v56 }
 0x153   : > { %2898 = vrcp.f32 %v1953_v47  ;;  %v5559_v10 = vrot.slane %v5537_v57, %v6943_v3  ;;  %v5563_v9 = vrot.slane %v5541_v27, %v6943_v3  ;;  %v2104_v16 = vrot.slane %v5546_v11, %v6943_v3 }
 0x154   : > { %6942 = vst [vmem:[#allocation30_spill] sm:$0xff] %v5555_v28  ;;  %v5576_v1 = vsub.f32 %v5397_v30, %v1871_v14  ;;  %v5586_v26 = vmul.f32 %v5427_v17, %v5485_v25  ;;  %v2112_v37 = vrot.slane %v5569_v6, %v6943_v3  ;;  %v1887_v4 = vmul.f32 %v5427_v17, %v5508_v56 }
 0x155   : > { %v5593_v30 = vmul.f32 %v1893_v38, %v5485_v25  ;;  %v1895_v14 = vmul.f32 %v1893_v38, %v5508_v56  ;;  %v5603_v52 = vsub.f32 %v5405_v49, %v1879_v8  ;;  %v1903_v8 = vmul.f32 %v5464_v29, %v5508_v56 }
 0x156   : > { %6944 = vst [vmem:[#allocation36_spill] sm:$0xff] %v5576_v1  ;;  %v5598_v18 = vrot.slane %v5576_v1, %v6943_v3  ;;  %v5608_v17 = vsub.f32 %v5413_v5, %v1887_v4  ;;  %v5617_v1 = vmul.f32 %v5464_v29, %v5485_v25  ;;  %v1909_v5 = vrot.slane %v5498_v43, %v6918_v22 }
 0x157   : > { %6945 = vst [vmem:[#allocation35_spill] sm:$0xff] %v5593_v30  ;;  %v5613_v38 = vsub.f32 %v5437_v40, %v1895_v14  ;;  %v2016_v49 = vrot.slane %v5603_v52, %v6943_v3  ;;  %v1778_v4 = vrot.slane %v5501_v15, %v6900_v33  ;;  %v5639_v29 = vsub.f32 %v5445_v39, %v1903_v8 }
 0x158   : > { %6947 = vst [vmem:[#allocation27_spill] sm:$0xff] %v5617_v1  ;;  %v5629_v40 = vrot.slane %v5608_v17, %v6943_v3  ;;  %v5642_v20 = vmul.f32 %v1909_v5, %v5485_v25  ;;  %v1911_v33 = vmul.f32 %v1909_v5, %v5508_v56  ;;  %v6948_v28 = vsub.f32 %v6935_v13, %v5451_v54  ;;  %v6951_v56 = vld [vmem:[#allocation29_spill] sm:$0xff] }
 0x159   : > { %6946 = vst [vmem:[#allocation37_spill] sm:$0xff] %v5613_v38  ;;  %v5633_v14 = vrot.slane %v5613_v38, %v6943_v3  ;;  %v5646_v30 = vmul.f32 %v1778_v4, %v5283_v21  ;;  %v1780_v32 = vmul.f32 %v1778_v4, %v5303_v60  ;;  %v1788_v38 = vmul.f32 %v1786_v19, %v5303_v60  ;;  %v6950_v19 = vld [vmem:[#allocation49_spill] sm:$0xff] }
 0x15a   : > { %v5653_v1 = vsub.f32 %v6948_v28, %v1787_v53  ;;  %v5657_v39 = vmul.f32 %v5469_v41, %v5283_v21  ;;  %v2040_v5 = vrot.slane %v5639_v29, %v6943_v3  ;;  %v5664_v4 = vsub.f32 %v5498_v43, %v1911_v33 }
 0x15b   : > { %v5672_v53 = vsub.f32 %v5501_v15, %v1780_v32  ;;  %v5675_v28 = vsub.f32 %v5481_v51, %v1788_v38  ;;  %v1796_v43 = vmul.f32 %v5469_v41, %v5303_v60  ;;  %v6953_v32 = vsub.f32 %v5325_v2, %v5516_v12 }
 0x15c   : > { %v2048_v21 = vrot.slane %v5664_v4, %v6943_v3  ;;  %v5712_v12 = vsel %vm204_vm10, %v5472_v42, %v5488_v59 }
 0x15d   : > { %v2899_v8 = vpop.eup %2898  ;;  %v1917_v41 = vrot.slane %v5672_v53, %v6918_v22  ;;  %v1925_v38 = vrot.slane %v5675_v28, %v6918_v22  ;;  %6956 = vst [vmem:[#allocation39_spill] sm:$0xff] %v5712_v12 }
 0x15e   : > { %v5669_v54 = vrot.slane %v2899_v8, %v6943_v3  ;;  %v1988_v13 = vadd.f32 1.0, %v2899_v8  ;;  %v5687_v8 = vsel %vm198_vm9, %v6951_v56, %v6950_v19  ;;  %v5704_v56 = vsub.f32 %v5458_v46, %v1796_v43 }
 0x15f   : > { %6952 = vst [vmem:[#allocation28_spill] sm:$0xff] %v5687_v8  ;;  %v1941_v2 = vrot.slane %v5687_v8, %v6918_v22 }
 0x160   : > { %6949 = vst [vmem:[#allocation50_spill] sm:$0xff] %v5669_v54  ;;  %v5693_v51 = vmul.f32 %v5669_v54, %v6953_v32  ;;  %v5696_v15 = vmul.f32 %v5669_v54, %v1953_v47  ;;  %v1994_v60 = vrot.slane %v1988_v13, %v6943_v3  ;;  %v6958_v54 = vsub.f32 %v5338_v36, %v5519_v63 }
 0x161   : > { %v6960_v36 = vsub.f32 %v5370_v35, %v5550_v31 }
 0x162   : > { %6954 = vst [vmem:[#allocation43_spill] sm:$0xff] %v5693_v51  ;;  %6955 = vst [vmem:[#allocation38_spill] sm:$0xff] %v5696_v15  ;;  %v5717_v47 = vsel %vm210_vm11, %v1994_v60, %v5696_v15  ;;  %v2001_v19 = vmul.f32 %v5559_v10, %v5693_v51  ;;  %v2097_v46 = vmul.f32 %v5563_v9, %v5693_v51 }
 0x163   : > { %v2105_v13 = vmul.f32 %v2104_v16, %v5693_v51  ;;  %v2002_v43 = vmul.f32 %v5559_v10, %v5717_v47  ;;  %v2098_v42 = vmul.f32 %v5563_v9, %v5717_v47  ;;  %v2106_v59 = vmul.f32 %v2104_v16, %v5717_v47 }
 0x164   : > { %v2113_v32 = vmul.f32 %v2112_v37, %v5693_v51  ;;  %v6957_v60 = vsub.f32 %v5315_v7, %v5512_v55  ;;  %v5738_v15 = vsub.f32 %v6958_v54, %v2097_v46  ;;  %v6959_v10 = vsub.f32 %v5362_v34, %v5527_v24 }
 0x165   : > { %v2114_v9 = vmul.f32 %v2112_v37, %v5717_v47  ;;  %v5747_v16 = vsub.f32 %v5537_v57, %v2002_v43  ;;  %v2100_v58 = vsub.f32 %v5541_v27, %v2098_v42  ;;  %v5751_v7 = vsub.f32 %v5546_v11, %v2106_v59  ;;  %v6961_v27 = vld [vmem:[#allocation42_spill] sm:$0xff] }
 0x166   : > { %v5733_v33 = vsub.f32 %v6957_v60, %v2001_v19  ;;  %v5743_v8 = vsub.f32 %v6959_v10, %v2105_v13  ;;  %v5756_v55 = vsub.f32 %v6960_v36, %v2113_v32  ;;  %v2009_v34 = vmul.f32 %v5598_v18, %v5693_v51  ;;  %v6962_v37 = vld [vmem:[#allocation30_spill] sm:$0xff]  ;;  %v6964_v19 = vld [vmem:[#allocation36_spill] sm:$0xff] }
 0x167   : > { %v5759_v63 = vsub.f32 %v5569_v6, %v2114_v9  ;;  %v2010_v24 = vmul.f32 %v5598_v18, %v5717_v47  ;;  %v2017_v57 = vmul.f32 %v2016_v49, %v5693_v51  ;;  %2900 = vrcp.f32 %v2100_v58  ;;  %v6967_v36 = vld [vmem:[#allocation40_spill] sm:$0xff] }
 0x168   : > { %v5768_v11 = vrot.slane %v5747_v16, %v6961_v27  ;;  %v5772_v35 = vrot.slane %v5751_v7, %v6961_v27  ;;  %v2018_v31 = vmul.f32 %v2016_v49, %v5717_v47  ;;  %v6963_v18 = vsub.f32 %v5394_v62, %v6962_v37 }
 0x169   : > { %v5777_v6 = vrot.slane %v5759_v63, %v6961_v27  ;;  %v5785_v46 = vsub.f32 %v6964_v19, %v2010_v24  ;;  %v6965_v13 = vsub.f32 %v5402_v23, %v5580_v44  ;;  %v2025_v49 = vmul.f32 %v5629_v40, %v5693_v51 }
 0x16a   : > { %v5782_v54 = vsub.f32 %v6963_v18, %v2009_v34  ;;  %v5793_v42 = vsub.f32 %v5603_v52, %v2018_v31  ;;  %v2026_v59 = vmul.f32 %v5629_v40, %v5717_v47  ;;  %v2033_v62 = vmul.f32 %v5633_v14, %v5693_v51  ;;  %v6968_v34 = vld [vmem:[#allocation35_spill] sm:$0xff] }
 0x16b   : > { %v5790_v43 = vsub.f32 %v6965_v13, %v2017_v57  ;;  %v2147_v32 = vrot.slane %v5785_v46, %v6961_v27  ;;  %v2034_v23 = vmul.f32 %v5633_v14, %v5717_v47  ;;  %v2041_v44 = vmul.f32 %v2040_v5, %v5693_v51  ;;  %v6970_v57 = vld [vmem:[#allocation37_spill] sm:$0xff] }
 0x16c   : > { %v2042_v52 = vmul.f32 %v2040_v5, %v5717_v47  ;;  %v5809_v60 = vrot.slane %v5793_v42, %v6961_v27  ;;  %v6966_v40 = vsub.f32 %v5410_v48, %v5586_v26  ;;  %v5817_v9 = vsub.f32 %v5608_v17, %v2026_v59  ;;  %v6971_v5 = vld [vmem:[#allocation27_spill] sm:$0xff] }
 0x16d   : > { %v6969_v24 = vsub.f32 %v6967_v36, %v6968_v34  ;;  %v5825_v31 = vsub.f32 %v6970_v57, %v2034_v23  ;;  %v6972_v37 = vsub.f32 %v5442_v61, %v6971_v5  ;;  %v2049_v26 = vmul.f32 %v2048_v21, %v5693_v51 }
 0x16e   : > { %v5814_v10 = vsub.f32 %v6966_v40, %v2025_v49  ;;  %v5833_v48 = vsub.f32 %v5639_v29, %v2042_v52  ;;  %v2163_v17 = vrot.slane %v5817_v9, %v6961_v27  ;;  %v2050_v19 = vmul.f32 %v2048_v21, %v5717_v47  ;;  %v6973_v49 = vld [vmem:[#allocation47_spill] sm:$0xff] }
 0x16f   : > { %v5822_v14 = vsub.f32 %v6969_v24, %v2033_v62  ;;  %v5830_v18 = vsub.f32 %v6972_v37, %v2041_v44  ;;  %v1918_v13 = vmul.f32 %v1917_v41, %v5485_v25  ;;  %v1919_v59 = vmul.f32 %v1917_v41, %v6973_v49 }
 0x170   : > { %v5843_v62 = vrot.slane %v5825_v31, %v6961_v27  ;;  %v5847_v61 = vrot.slane %v5833_v48, %v6961_v27  ;;  %v6974_v29 = vsub.f32 %v5496_v45, %v5642_v20  ;;  %v5855_v44 = vmul.f32 %v1925_v38, %v5485_v25 }
 0x171   : > { %v5858_v21 = vsub.f32 %v5664_v4, %v2050_v19  ;;  %v6975_v41 = vsub.f32 %v5494_v50, %v5646_v30  ;;  %v1921_v40 = vsub.f32 %v5672_v53, %v1919_v59  ;;  %v1927_v36 = vmul.f32 %v1925_v38, %v6973_v49  ;;  %v2901_v24 = vpop.eup %2900  ;;  %v6992_v19 = vld [vmem:[#allocation50_spill] sm:$0xff] }
 0x172   : > { %v5852_v23 = vsub.f32 %v6974_v29, %v2049_v26  ;;  %v1933_v20 = vrot.slane %v5704_v56, %v6918_v22  ;;  %v5872_v34 = vmul.f32 %v1941_v2, %v5485_v25  ;;  %v5875_v4 = vmul.f32 %v1941_v2, %v6973_v49 }
 0x173   : > { %v5863_v52 = vsub.f32 %v6975_v41, %v1918_v13  ;;  %v2187_v50 = vrot.slane %v5858_v21, %v6961_v27  ;;  %v2056_v30 = vrot.slane %v1921_v40, %v6943_v3  ;;  %v5881_v53 = vsub.f32 %v5675_v28, %v1927_v36 }
 0x174   : > { %6976 = vst [vmem:[#allocation33_spill] sm:$0xff] %v5872_v34  ;;  %v5885_v38 = vrot.slane %v5712_v12, %v6943_v3  ;;  %v5888_v22 = vrot.slane %v2901_v24, %v6961_v27  ;;  %v2127_v57 = vadd.f32 1.0, %v2901_v24  ;;  %v1934_v2 = vmul.f32 %v1933_v20, %v5485_v25 }
 0x175   : > { %v1935_v5 = vmul.f32 %v1933_v20, %v6973_v49  ;;  %v5893_v37 = vmul.f32 %v2056_v30, %v5693_v51  ;;  %v2058_v26 = vmul.f32 %v2056_v30, %v5717_v47  ;;  %v2064_v28 = vrot.slane %v5881_v53, %v6943_v3 }
 0x176   : > { %6977 = vst [vmem:[#allocation31_spill] sm:$0xff] %v5888_v22  ;;  %v5902_v59 = vmul.f32 %v5888_v22, %v5738_v15  ;;  %v5905_v29 = vmul.f32 %v5888_v22, %v2100_v58  ;;  %v2133_v49 = vrot.slane %v2127_v57, %v6961_v27  ;;  %v6981_v41 = vsub.f32 %v5075_v0, %v5657_v39 }
 0x177   : > { %v2059_v20 = vsub.f32 %v5863_v52, %v5893_v37  ;;  %v2060_v24 = vsub.f32 %v1921_v40, %v2058_v26  ;;  %v2065_v30 = vmul.f32 %v2064_v28, %v5693_v51  ;;  %v2066_v13 = vmul.f32 %v2064_v28, %v5717_v47 }
 0x178   : > { %6979 = vst [vmem:[#allocation41_spill] sm:$0xff] %v5902_v59  ;;  %6980 = vst [vmem:[#allocation34_spill] sm:$0xff] %v5905_v29  ;;  %v5911_v36 = vsub.f32 %v6981_v41, %v1934_v2  ;;  %v5920_v58 = vsel %vm216_vm12, %v2133_v49, %v5905_v29  ;;  %v5924_v57 = vmul.f32 %v5768_v11, %v5902_v59 }
 0x179   : > { %6983 = vst [vmem:[#allocation14_spill] sm:$0xff] %v5920_v58  ;;  %v5928_v0 = vmul.f32 %v5772_v35, %v5902_v59  ;;  %v5932_v39 = vmul.f32 %v5777_v6, %v5902_v59  ;;  %v2141_v52 = vmul.f32 %v5768_v11, %v5920_v58  ;;  %v2245_v40 = vmul.f32 %v5772_v35, %v5920_v58 }
 0x17a   : > { %v2253_v2 = vmul.f32 %v5777_v6, %v5920_v58  ;;  %v5941_v37 = vmul.f32 %v2147_v32, %v5902_v59  ;;  %v2149_v11 = vmul.f32 %v2147_v32, %v5920_v58  ;;  %v5964_v28 = vmul.f32 %v5809_v60, %v5902_v59 }
 0x17b   : > { %v5951_v41 = vsub.f32 %v5747_v16, %v2141_v52  ;;  %v2247_v35 = vsub.f32 %v5751_v7, %v2245_v40  ;;  %v2157_v32 = vmul.f32 %v5809_v60, %v5920_v58  ;;  %v5969_v16 = vmul.f32 %v2163_v17, %v5902_v59  ;;  %v6984_v7 = vld [vmem:[#allocation44_spill] sm:$0xff] }
 0x17c   : > { %v5955_v6 = vsub.f32 %v5759_v63, %v2253_v2  ;;  %v5960_v26 = vsub.f32 %v5785_v46, %v2149_v11  ;;  %v2165_v46 = vmul.f32 %v2163_v17, %v5920_v58  ;;  %v5996_v49 = vmul.f32 %v5843_v62, %v5902_v59 }
 0x17d   : > { %2902 = vrcp.f32 %v2247_v35  ;;  %v5973_v63 = vrot.slane %v5951_v41, %v6984_v7  ;;  %v5987_v2 = vsub.f32 %v5793_v42, %v2157_v32  ;;  %v2173_v17 = vmul.f32 %v5843_v62, %v5920_v58 }
 0x17e   : > { %v5977_v52 = vrot.slane %v5955_v6, %v6984_v7  ;;  %v5982_v40 = vrot.slane %v5960_v26, %v6984_v7  ;;  %v5992_v45 = vsub.f32 %v5817_v9, %v2165_v46  ;;  %v6002_v22 = vmul.f32 %v5847_v61, %v5902_v59 }
 0x17f   : > { %v2294_v42 = vrot.slane %v5987_v2, %v6984_v7  ;;  %v2181_v32 = vmul.f32 %v5847_v61, %v5920_v58  ;;  %v6009_v9 = vmul.f32 %v2187_v50, %v5902_v59  ;;  %v2189_v46 = vmul.f32 %v2187_v50, %v5920_v58 }
 0x180   : > { %v6014_v11 = vrot.slane %v5992_v45, %v6984_v7  ;;  %v6019_v60 = vsub.f32 %v5825_v31, %v2173_v17  ;;  %v2195_v34 = vrot.slane %v2060_v24, %v6961_v27  ;;  %v6987_v31 = vsub.f32 %v5653_v1, %v5855_v44 }
 0x181   : > { %6985 = vst [vmem:[#allocation26_spill] sm:$0xff] %v6009_v9  ;;  %v6024_v61 = vsub.f32 %v5833_v48, %v2181_v32  ;;  %v6029_v50 = vsub.f32 %v5858_v21, %v2189_v46  ;;  %v2068_v29 = vsub.f32 %v5881_v53, %v2066_v13  ;;  %v1937_v48 = vsub.f32 %v5704_v56, %v1935_v5  ;;  %v6988_v53 = vld [vmem:[#allocation28_spill] sm:$0xff] }
 0x182   : > { %v2310_v62 = vrot.slane %v6019_v60, %v6984_v7  ;;  %v6037_v17 = vsub.f32 %v6987_v31, %v2065_v30  ;;  %v2196_v46 = vmul.f32 %v2195_v34, %v5902_v59  ;;  %v2197_v12 = vmul.f32 %v2195_v34, %v5920_v58  ;;  %v6991_v34 = vld [vmem:[#allocation38_spill] sm:$0xff] }
 0x183   : > { %6986 = vst [vmem:[#allocation46_spill] sm:$0xff] %v6029_v50  ;;  %v6043_v32 = vrot.slane %v6024_v61, %v6984_v7  ;;  %v6047_v21 = vrot.slane %v6029_v50, %v6984_v7  ;;  %v2203_v1 = vrot.slane %v2068_v29, %v6961_v27  ;;  %v2072_v44 = vrot.slane %v1937_v48, %v6943_v3 }
 0x184   : > { %v6055_v13 = vsub.f32 %v6988_v53, %v5875_v4  ;;  %v6059_v56 = vmul.f32 %v5885_v38, %v5693_v51  ;;  %v6061_v5 = vsub.f32 %v2059_v20, %v2196_v46  ;;  %v6063_v30 = vsub.f32 %v2060_v24, %v2197_v12 }
 0x185   : > { %v6067_v31 = vmul.f32 %v5885_v38, %v5717_v47  ;;  %v6073_v50 = vsel %vm210_vm11, %v6992_v19, %v6991_v34  ;;  %v6076_v53 = vmul.f32 %v2203_v1, %v5902_v59  ;;  %v2205_v9 = vmul.f32 %v2203_v1, %v5920_v58 }
 0x186   : > { %6989 = vst [vmem:[#allocation49_spill] sm:$0xff] %v6059_v56  ;;  %6993 = vst [vmem:[#allocation42_spill] sm:$0xff] %v6073_v50  ;;  %v6080_v20 = vmul.f32 %v2072_v44, %v5693_v51  ;;  %v2074_v12 = vmul.f32 %v2072_v44, %v5717_v47  ;;  %v2334_v46 = vrot.slane %v6063_v30, %v6984_v7 }
 0x187   : > { %6990 = vst [vmem:[#allocation29_spill] sm:$0xff] %v6067_v31  ;;  %v2903_v4 = vpop.eup %2902  ;;  %v2080_v19 = vrot.slane %v6055_v13, %v6943_v3  ;;  %v2206_v34 = vsub.f32 %v6037_v17, %v6076_v53  ;;  %v6092_v50 = vsub.f32 %v2068_v29, %v2205_v9  ;;  %v6994_v44 = vsub.f32 %v5743_v8, %v5928_v0 }
 0x188   : > { %v6084_v38 = vrot.slane %v2903_v4, %v6984_v7  ;;  %v2266_v24 = vadd.f32 1.0, %v2903_v4  ;;  %v6096_v31 = vsub.f32 %v1937_v48, %v2074_v12  ;;  %v6996_v1 = vsub.f32 %v5756_v55, %v5932_v39 }
 0x189   : > { %v2081_v17 = vmul.f32 %v2080_v19, %v5693_v51  ;;  %v2342_v29 = vrot.slane %v6092_v50, %v6984_v7  ;;  %v2082_v48 = vmul.f32 %v2080_v19, %v5717_v47  ;;  %v6998_v55 = vsub.f32 %v5790_v43, %v5964_v28 }
 0x18a   : > { %v6102_v4 = vmul.f32 %v6084_v38, %v6994_v44  ;;  %v6105_v58 = vmul.f32 %v6084_v38, %v2247_v35  ;;  %v2272_v3 = vrot.slane %v2266_v24, %v6984_v7  ;;  %v2211_v9 = vrot.slane %v6096_v31, %v6961_v27 }
 0x18c   : > { %v6119_v0 = vsel %vm222_vm13, %v2272_v3, %v6105_v58  ;;  %v2279_v35 = vmul.f32 %v5973_v63, %v6102_v4  ;;  %v2391_v53 = vmul.f32 %v5977_v52, %v6102_v4  ;;  %v2287_v12 = vmul.f32 %v5982_v40, %v6102_v4 }
 0x18d   : > { %v2280_v47 = vmul.f32 %v5973_v63, %v6119_v0  ;;  %v2392_v24 = vmul.f32 %v5977_v52, %v6119_v0  ;;  %v2288_v19 = vmul.f32 %v5982_v40, %v6119_v0  ;;  %v2295_v44 = vmul.f32 %v2294_v42, %v6102_v4 }
 0x18e   : > { %v6995_v3 = vsub.f32 %v5733_v33, %v5924_v57  ;;  %v6142_v51 = vsub.f32 %v6996_v1, %v2391_v53  ;;  %v6997_v63 = vsub.f32 %v5782_v54, %v5941_v37  ;;  %v2296_v52 = vmul.f32 %v2294_v42, %v6119_v0 }
 0x18f   : > { %v6151_v40 = vsub.f32 %v5951_v41, %v2280_v47  ;;  %v2394_v25 = vsub.f32 %v5955_v6, %v2392_v24  ;;  %v6155_v33 = vsub.f32 %v5960_v26, %v2288_v19  ;;  %v6160_v57 = vsub.f32 %v6998_v55, %v2295_v44  ;;  %v6999_v6 = vld [vmem:[#allocation45_spill] sm:$0xff]  ;;  %v7003_v44 = vld [vmem:[#allocation26_spill] sm:$0xff] }
 0x190   : > { %v6137_v8 = vsub.f32 %v6995_v3, %v2279_v35  ;;  %v6147_v56 = vsub.f32 %v6997_v63, %v2287_v12  ;;  %v6163_v39 = vsub.f32 %v5987_v2, %v2296_v52  ;;  %v2303_v54 = vmul.f32 %v6014_v11, %v6102_v4  ;;  %v7005_v63 = vld [vmem:[#allocation46_spill] sm:$0xff] }
 0x191   : > { %v2304_v37 = vmul.f32 %v6014_v11, %v6119_v0  ;;  %v2311_v41 = vmul.f32 %v2310_v62, %v6102_v4  ;;  %2904 = vrcp.f32 %v2394_v25  ;;  %v6172_v26 = vrot.slane %v6151_v40, %v6999_v6 }
 0x192   : > { %v6176_v43 = vrot.slane %v6155_v33, %v6999_v6  ;;  %v2312_v28 = vmul.f32 %v2310_v62, %v6119_v0  ;;  %v6181_v2 = vrot.slane %v6163_v39, %v6999_v6  ;;  %v7000_v11 = vsub.f32 %v5814_v10, %v5969_v16 }
 0x193   : > { %v6189_v1 = vsub.f32 %v5992_v45, %v2304_v37  ;;  %v7001_v35 = vsub.f32 %v5822_v14, %v5996_v49  ;;  %v2319_v62 = vmul.f32 %v6043_v32, %v6102_v4  ;;  %v2320_v47 = vmul.f32 %v6043_v32, %v6119_v0 }
 0x194   : > { %v6186_v42 = vsub.f32 %v7000_v11, %v2303_v54  ;;  %v6197_v12 = vsub.f32 %v6019_v60, %v2312_v28  ;;  %v2327_v10 = vmul.f32 %v6047_v21, %v6102_v4  ;;  %v2328_v14 = vmul.f32 %v6047_v21, %v6119_v0  ;;  %v7006_v54 = vld [vmem:[#allocation14_spill] sm:$0xff]  ;;  %v7007_v11 = vld [vmem:[#allocation48_spill] sm:$0xff] }
 0x195   : > { %v6194_v53 = vsub.f32 %v7001_v35, %v2311_v41  ;;  %v2441_v45 = vrot.slane %v6189_v1, %v6999_v6  ;;  %v6210_v49 = vmul.f32 %v2334_v46, %v6102_v4  ;;  %v2336_v16 = vmul.f32 %v2334_v46, %v6119_v0  ;;  %v7008_v35 = vld [vmem:[#allocation33_spill] sm:$0xff] }
 0x196   : > { %v6215_v60 = vrot.slane %v6197_v12, %v6999_v6  ;;  %v7002_v32 = vsub.f32 %v5830_v18, %v6002_v22  ;;  %v6223_v19 = vsub.f32 %v6024_v61, %v2320_v47  ;;  %v7004_v21 = vsub.f32 %v5852_v23, %v7003_v44 }
 0x197   : > { %v6231_v52 = vsub.f32 %v7005_v63, %v2328_v14  ;;  %v6236_v55 = vsub.f32 %v6063_v30, %v2336_v16  ;;  %v2343_v18 = vmul.f32 %v2342_v29, %v6102_v4  ;;  %v2344_v61 = vmul.f32 %v2342_v29, %v6119_v0  ;;  %v7014_v63 = vld [vmem:[#allocation34_spill] sm:$0xff] }
 0x198   : > { %v6220_v24 = vsub.f32 %v7002_v32, %v2319_v62  ;;  %v6228_v3 = vsub.f32 %v7004_v21, %v2327_v10  ;;  %v6241_v22 = vrot.slane %v6223_v19, %v6999_v6  ;;  %v2212_v23 = vmul.f32 %v2211_v9, %v5902_v59  ;;  %v7011_v32 = vld [vmem:[#allocation29_spill] sm:$0xff]  ;;  %v7013_v21 = vld [vmem:[#allocation42_spill] sm:$0xff] }
 0x199   : > { %v2213_v37 = vmul.f32 %v2211_v9, %v7006_v54  ;;  %v6248_v41 = vrot.slane %v6231_v52, %v6999_v6  ;;  %v6252_v30 = vrot.slane %v6236_v55, %v6999_v6  ;;  %v6254_v28 = vsub.f32 %v2206_v34, %v2343_v18  ;;  %v7012_v34 = vld [vmem:[#allocation39_spill] sm:$0xff] }
 0x19a   : > { %v7009_v62 = vsub.f32 %v7007_v11, %v7008_v35  ;;  %v6262_v29 = vsub.f32 %v6092_v50, %v2344_v61  ;;  %v7010_v9 = vsub.f32 %v5911_v36, %v6080_v20  ;;  %v2084_v16 = vsub.f32 %v6055_v13, %v2082_v48  ;;  %v7015_v50 = vld [vmem:[#allocation31_spill] sm:$0xff] }
 0x19b   : > { %v2215_v14 = vsub.f32 %v6096_v31, %v2213_v37  ;;  %v6273_v44 = vsub.f32 %v7012_v34, %v7011_v32  ;;  %v6283_v18 = vsel %vm216_vm12, %v7015_v50, %v7014_v63  ;;  %v6289_v36 = vsel %vm222_vm13, %v6084_v38, %v6105_v58  ;;  %v2905_v13 = vpop.eup %2904 }
 0x19c   : > { %v6259_v47 = vsub.f32 %v7009_v62, %v2081_v17  ;;  %v6267_v10 = vsub.f32 %v7010_v9, %v2212_v23  ;;  %v6277_v17 = vrot.slane %v7013_v21, %v6961_v27  ;;  %7016 = vst [vmem:[#allocation30_spill] sm:$0xff] %v6283_v18  ;;  %7017 = vst [vmem:[#allocation36_spill] sm:$0xff] %v6289_v36  ;;  %v2405_v37 = vadd.f32 1.0, %v2905_v13 }
 0x19d   : > { %v6293_v31 = vrot.slane %v6262_v29, %v6999_v6  ;;  %v2350_v20 = vrot.slane %v2215_v14, %v6984_v7  ;;  %v2219_v48 = vrot.slane %v2084_v16, %v6961_v27  ;;  %v6299_v61 = vrot.slane %v6283_v18, %v6984_v7 }
 0x19e   : > { %v6302_v23 = vrot.slane %v2905_v13, %v6999_v6  ;;  %v6306_v58 = vrot.slane %v6273_v44, %v6961_v27  ;;  %v6310_v38 = vmul.f32 %v6277_v17, %v5902_v59  ;;  %v2411_v34 = vrot.slane %v2405_v37, %v6999_v6 }
 0x19f   : > { %7018 = vst [vmem:[#allocation40_spill] sm:$0xff] %v6299_v61  ;;  %v6313_v11 = vmul.f32 %v2350_v20, %v6102_v4  ;;  %v2352_v35 = vmul.f32 %v2350_v20, %v6119_v0  ;;  %v6317_v62 = vmul.f32 %v2219_v48, %v5902_v59  ;;  %v2221_v9 = vmul.f32 %v2219_v48, %v7006_v54 }
 0x1a0   : > { %7019 = vst [vmem:[#allocation35_spill] sm:$0xff] %v6302_v23  ;;  %v6322_v32 = vmul.f32 %v6302_v23, %v6142_v51  ;;  %v6325_v27 = vmul.f32 %v6302_v23, %v2394_v25  ;;  %v6330_v63 = vmul.f32 %v6306_v58, %v5902_v59  ;;  %v7022_v59 = vld [vmem:[#allocation10_spill] sm:$0xff] }
 0x1a1   : > { %v6334_v13 = vsub.f32 %v2215_v14, %v2352_v35  ;;  %v6338_v48 = vsub.f32 %v2084_v16, %v2221_v9 }
 0x1a2   : > { %7020 = vst [vmem:[#allocation37_spill] sm:$0xff] %v6325_v27  ;;  %v2418_v25 = vmul.f32 %v6172_v26, %v6322_v32  ;;  %v6345_v51 = vsel %vm228_vm14, %v2411_v34, %v6325_v27  ;;  %v2426_v37 = vmul.f32 %v6176_v43, %v6322_v32  ;;  %v2434_v14 = vmul.f32 %v6181_v2, %v6322_v32 }
 0x1a3   : > { %v2419_v35 = vmul.f32 %v6172_v26, %v6345_v51  ;;  %v2427_v16 = vmul.f32 %v6176_v43, %v6345_v51  ;;  %v2435_v9 = vmul.f32 %v6181_v2, %v6345_v51  ;;  %v2442_v20 = vmul.f32 %v2441_v45, %v6322_v32 }
 0x1a4   : > { %v2420_v34 = vsub.f32 %v6137_v8, %v2418_v25  ;;  %v2428_v50 = vsub.f32 %v6147_v56, %v2426_v37  ;;  %v2436_v46 = vsub.f32 %v6160_v57, %v2434_v14  ;;  %v2443_v15 = vmul.f32 %v2441_v45, %v6345_v51  ;;  %v7021_v14 = vld [vmem:[#allocation9_spill] sm:$0xff] }
 0x1a5   : > { %v2421_v23 = vsub.f32 %v6151_v40, %v2419_v35  ;;  %v2429_v26 = vsub.f32 %v6155_v33, %v2427_v16  ;;  %v2437_v43 = vsub.f32 %v6163_v39, %v2435_v9  ;;  %v2444_v27 = vsub.f32 %v6186_v42, %v2442_v20  ;;  %v7023_v35 = vld [vmem:[#allocation11_spill] sm:$0xff] }
 0x1a6   : > { %v2536_v2 = vmul.f32 2.0, %v2420_v34  ;;  %v2542_v18 = vmul.f32 2.0, %v2428_v50  ;;  %v2549_v36 = vmul.f32 2.0, %v2436_v46  ;;  %v2445_v8 = vsub.f32 %v6189_v1, %v2443_v15  ;;  %v7024_v15 = vld [vmem:[#allocation12_spill] sm:$0xff] }
 0x1a7   : > { %v2537_v25 = vmul.f32 2.0, %v2421_v23  ;;  %v2543_v56 = vmul.f32 2.0, %v2429_v26  ;;  %v2550_v37 = vmul.f32 2.0, %v2437_v43  ;;  %v2556_v57 = vmul.f32 2.0, %v2444_v27  ;;  %v7026_v43 = vld [vmem:[#allocation15_spill] sm:$0xff] }
 0x1a8   : > { %v2538_v45 = vsub.f32 %v2536_v2, %v7021_v14  ;;  %v2544_v40 = vsub.f32 %v2542_v18, %v7022_v59  ;;  %v2551_v61 = vsub.f32 %v2549_v36, %v7023_v35  ;;  %v2557_v33 = vmul.f32 2.0, %v2445_v8 }
 0x1a9   : > { %2541 = vst [vmem:[%s6372_s17 + $0x8] sm:$0xff] %v2537_v25  ;;  %2788 = vst [vmem:[%s6372_s17 + $0x18] sm:$0xff] %v2543_v56  ;;  %v2558_v39 = vsub.f32 %v2556_v57, %v7024_v15  ;;  %v2450_v59 = vmul.f32 %v6215_v60, %v6322_v32  ;;  %v2451_v42 = vmul.f32 %v6215_v60, %v6345_v51  ;;  %v7029_v56 = vld [vmem:[#allocation17_spill] sm:$0xff] }
 0x1aa   : > { %2790 = vst [vmem:[%s6372_s17 + $0x28] sm:$0xff] %v2550_v37  ;;  %v2458_v1 = vmul.f32 %v6241_v22, %v6322_v32  ;;  %2540 = vst [vmem:[%s6372_s17] sm:$0xff] %v2538_v45  ;;  %v2459_v46 = vmul.f32 %v6241_v22, %v6345_v51  ;;  %v2466_v18 = vmul.f32 %v6248_v41, %v6322_v32  ;;  %v7031_v15 = vld [vmem:[#allocation49_spill] sm:$0xff] }
 0x1ab   : > { %2787 = vst [vmem:[%s6372_s17 + $0x10] sm:$0xff] %v2544_v40  ;;  %2789 = vst [vmem:[%s6372_s17 + $0x20] sm:$0xff] %v2551_v61  ;;  %v2467_v36 = vmul.f32 %v6248_v41, %v6345_v51  ;;  %v2474_v23 = vmul.f32 %v6252_v30, %v6322_v32  ;;  %v2452_v60 = vsub.f32 %v6194_v53, %v2450_v59 }
 0x1ac   : > { %2792 = vst [vmem:[%s6372_s17 + $0x38] sm:$0xff] %v2557_v33  ;;  %2791 = vst [vmem:[%s6372_s17 + $0x30] sm:$0xff] %v2558_v39  ;;  %v2453_v27 = vsub.f32 %v6197_v12, %v2451_v42  ;;  %v2460_v61 = vsub.f32 %v6220_v24, %v2458_v1  ;;  %v2475_v22 = vmul.f32 %v6252_v30, %v6345_v51  ;;  %v7030_v33 = vld [vmem:[#allocation8_spill] sm:$0xff] }
 0x1ad   : > { %v2461_v50 = vsub.f32 %v6223_v19, %v2459_v46  ;;  %v2468_v20 = vsub.f32 %v6228_v3, %v2466_v18  ;;  %v2469_v41 = vsub.f32 %v6231_v52, %v2467_v36  ;;  %v7025_v16 = vsub.f32 %v6061_v5, %v6210_v49  ;;  %v7027_v52 = vld [vmem:[#allocation32_spill] sm:$0xff] }
 0x1ae   : > { %v2563_v53 = vmul.f32 2.0, %v2452_v60  ;;  %v2564_v12 = vmul.f32 2.0, %v2453_v27  ;;  %v2570_v34 = vmul.f32 2.0, %v2460_v61  ;;  %v2477_v24 = vsub.f32 %v6236_v55, %v2475_v22  ;;  %v7028_v55 = vld [vmem:[#allocation16_spill] sm:$0xff]  ;;  %v7034_v27 = vld [vmem:[#allocation43_spill] sm:$0xff] }
 0x1af   : > { %v2476_v9 = vsub.f32 %v7025_v16, %v2474_v23  ;;  %v2571_v26 = vmul.f32 2.0, %v2461_v50  ;;  %v2577_v30 = vmul.f32 2.0, %v2468_v20  ;;  %v2578_v19 = vmul.f32 2.0, %v2469_v41 }
 0x1b0   : > { %v2565_v2 = vsub.f32 %v2563_v53, %v7026_v43  ;;  %2794 = vst [vmem:[%s6372_s17 + $0x48] sm:$0xff] %v2564_v12  ;;  %v2572_v8 = vsub.f32 %v2570_v34, %v7027_v52  ;;  %v2585_v5 = vmul.f32 2.0, %v2477_v24  ;;  %v2482_v49 = vmul.f32 %v6293_v31, %v6322_v32  ;;  %v7039_v12 = vld [vmem:[#allocation41_spill] sm:$0xff]  ;;  %v7040_v24 = vld [vmem:[#allocation36_spill] sm:$0xff]  ;;  %v7041_v52 = vld [vmem:[#allocation30_spill] sm:$0xff] }
 0x1b1   : > { %v2584_v3 = vmul.f32 2.0, %v2476_v9  ;;  %2796 = vst [vmem:[%s6372_s17 + $0x58] sm:$0xff] %v2571_v26  ;;  %v2579_v25 = vsub.f32 %v2577_v30, %v7028_v55  ;;  %2798 = vst [vmem:[%s6372_s17 + $0x68] sm:$0xff] %v2578_v19  ;;  %v2483_v57 = vmul.f32 %v6293_v31, %v6345_v51  ;;  %v2489_v14 = vrot.slane %v6334_v13, %v6999_v6 }
 0x1b2   : > { %2793 = vst [vmem:[%s6372_s17 + $0x40] sm:$0xff] %v2565_v2  ;;  %2795 = vst [vmem:[%s6372_s17 + $0x50] sm:$0xff] %v2572_v8  ;;  %v2484_v45 = vsub.f32 %v6254_v28, %v2482_v49  ;;  %v2358_v40 = vrot.slane %v6338_v48, %v6984_v7  ;;  %v2229_v35 = vmul.f32 %v6306_v58, %v7006_v54 }
 0x1b3   : > { %v2586_v37 = vsub.f32 %v2584_v3, %v7029_v56  ;;  %2800 = vst [vmem:[%s6372_s17 + $0x78] sm:$0xff] %v2585_v5  ;;  %v7032_v39 = vsub.f32 %v7030_v33, %v7031_v15  ;;  %2797 = vst [vmem:[%s6372_s17 + $0x60] sm:$0xff] %v2579_v25  ;;  %v2485_v59 = vsub.f32 %v6262_v29, %v2483_v57 }
 0x1b4   : > { %v2490_v42 = vmul.f32 %v2489_v14, %v6322_v32  ;;  %v2491_v28 = vmul.f32 %v2489_v14, %v6345_v51  ;;  %v2237_v1 = vmul.f32 %v6277_v17, %v7006_v54  ;;  %v2591_v46 = vmul.f32 2.0, %v2484_v45 }
 0x1b5   : > { %v2230_v31 = vsub.f32 %v7032_v39, %v6330_v63  ;;  %2799 = vst [vmem:[%s6372_s17 + $0x70] sm:$0xff] %v2586_v37  ;;  %v2359_v58 = vmul.f32 %v2358_v40, %v6102_v4  ;;  %v2360_v18 = vmul.f32 %v2358_v40, %v6119_v0  ;;  %v2231_v36 = vsub.f32 %v6273_v44, %v2229_v35 }
 0x1b6   : > { %v2592_v23 = vmul.f32 2.0, %v2485_v59  ;;  %v7033_v63 = vsub.f32 %v6267_v10, %v6313_v11  ;;  %v2493_v29 = vsub.f32 %v6334_v13, %v2491_v28  ;;  %v2238_v61 = vsub.f32 %v7034_v27, %v6310_v38  ;;  %2801 = vst [vmem:[%s6372_s17 + $0x80] sm:$0xff] %v2591_v46  ;;  %v7036_v10 = vld [vmem:[#allocation18_spill] sm:$0xff]  ;;  %v7037_v13 = vld [vmem:[#allocation40_spill] sm:$0xff] }
 0x1b7   : > { %v7035_v54 = vsub.f32 %v6259_v47, %v6317_v62  ;;  %v2362_v22 = vsub.f32 %v6338_v48, %v2360_v18  ;;  %v2366_v44 = vrot.slane %v2231_v36, %v6984_v7  ;;  %v2239_v50 = vsub.f32 %v7013_v21, %v2237_v1  ;;  %v7038_v48 = vld [vmem:[#allocation19_spill] sm:$0xff] }
 0x1b8   : > { %v2492_v60 = vsub.f32 %v7033_v63, %v2490_v42  ;;  %v2594_v11 = vsub.f32 %v2592_v23, %v7036_v10  ;;  %v2599_v41 = vmul.f32 2.0, %v2493_v29  ;;  %v2383_v16 = vmul.f32 %v7037_v13, %v6102_v4  ;;  %v7042_v42 = vld [vmem:[#allocation20_spill] sm:$0xff]  ;;  %v7045_v10 = vld [vmem:[#allocation37_spill] sm:$0xff] }
 0x1b9   : > { %v2361_v17 = vsub.f32 %v7035_v54, %v2359_v58  ;;  %v2497_v38 = vrot.slane %v2362_v22, %v6999_v6  ;;  %v2367_v9 = vmul.f32 %v2366_v44, %v6102_v4  ;;  %v2368_v47 = vmul.f32 %v2366_v44, %v6119_v0  ;;  %v7044_v44 = vld [vmem:[#allocation24_spill] sm:$0xff] }
 0x1ba   : > { %v2598_v20 = vmul.f32 2.0, %v2492_v60  ;;  %v2374_v62 = vrot.slane %v2239_v50, %v6984_v7  ;;  %2802 = vst [vmem:[%s6372_s17 + $0x88] sm:$0xff] %v2594_v11  ;;  %v2601_v21 = vsub.f32 %v2599_v41, %v7038_v48  ;;  %v2384_v53 = vmul.f32 %v7037_v13, %v6119_v0  ;;  %v7046_v11 = vld [vmem:[#allocation35_spill] sm:$0xff]  ;;  %v7050_v48 = vld [vmem:[#allocation25_spill] sm:$0xff] }
 0x1bb   : > { %v2385_v34 = vsub.f32 %v7039_v12, %v2383_v16  ;;  %v2529_v26 = vrot.slane %v7040_v24, %v6999_v6  ;;  %v2498_v30 = vmul.f32 %v2497_v38, %v6322_v32  ;;  %v2499_v19 = vmul.f32 %v2497_v38, %v6345_v51  ;;  %v7048_v16 = vld [vmem:[#allocation23_spill] sm:$0xff] }
 0x1bc   : > { %2803 = vst [vmem:[%s6372_s17 + $0x90] sm:$0xff] %v2598_v20  ;;  %v2369_v3 = vsub.f32 %v2230_v31, %v2367_v9  ;;  %v2370_v43 = vsub.f32 %v2231_v36, %v2368_v47  ;;  %2804 = vst [vmem:[%s6372_s17 + $0x98] sm:$0xff] %v2601_v21  ;;  %v2375_v7 = vmul.f32 %v2374_v62, %v6102_v4  ;;  %v2640_v29 = vmul.f32 2.0, %v6322_v32  ;;  %v7049_v47 = vld [vmem:[#allocation22_spill] sm:$0xff] }
 0x1bd   : > { %v2376_v2 = vmul.f32 %v2374_v62, %v6119_v0  ;;  %v2386_v8 = vsub.f32 %v7041_v52, %v2384_v53  ;;  %v2530_v5 = vmul.f32 %v2529_v26, %v6322_v32  ;;  %v2500_v49 = vsub.f32 %v2361_v17, %v2498_v30 }
 0x1be   : > { %v2501_v55 = vsub.f32 %v2362_v22, %v2499_v19  ;;  %v2505_v25 = vrot.slane %v2370_v43, %v6999_v6  ;;  %v2531_v56 = vmul.f32 %v2529_v26, %v6345_v51  ;;  %v2377_v37 = vsub.f32 %v2238_v61, %v2375_v7  ;;  %2815 = vst [vmem:[%s6372_s17 + $0xf0] sm:$0xff] %v2640_v29 }
 0x1bf   : > { %v2378_v57 = vsub.f32 %v2239_v50, %v2376_v2  ;;  %v2521_v14 = vrot.slane %v2386_v8, %v6999_v6  ;;  %v2532_v45 = vsub.f32 %v6102_v4, %v2530_v5  ;;  %v2605_v40 = vmul.f32 2.0, %v2500_v49 }
 0x1c0   : > { %v2606_v35 = vmul.f32 2.0, %v2501_v55  ;;  %v2506_v0 = vmul.f32 %v2505_v25, %v6322_v32  ;;  %v2507_v33 = vmul.f32 %v2505_v25, %v6345_v51  ;;  %v2533_v46 = vsub.f32 %v7040_v24, %v2531_v56 }
 0x1c1   : > { %v2513_v15 = vrot.slane %v2378_v57, %v6999_v6  ;;  %v2522_v39 = vmul.f32 %v2521_v14, %v6322_v32  ;;  %v2523_v31 = vmul.f32 %v2521_v14, %v6345_v51  ;;  %v2633_v59 = vmul.f32 2.0, %v2532_v45  ;;  %2805 = vst [vmem:[%s6372_s17 + $0xa0] sm:$0xff] %v2605_v40 }
 0x1c2   : > { %v2608_v28 = vsub.f32 %v2606_v35, %v7042_v42  ;;  %v2508_v4 = vsub.f32 %v2369_v3, %v2506_v0  ;;  %v2509_v1 = vsub.f32 %v2370_v43, %v2507_v33  ;;  %v2634_v60 = vmul.f32 2.0, %v2533_v46 }
 0x1c3   : > { %v2514_v58 = vmul.f32 %v2513_v15, %v6322_v32  ;;  %v2515_v18 = vmul.f32 %v2513_v15, %v6345_v51  ;;  %v2524_v6 = vsub.f32 %v2385_v34, %v2522_v39  ;;  %v2525_v36 = vsub.f32 %v2386_v8, %v2523_v31  ;;  %2813 = vst [vmem:[%s6372_s17 + $0xe0] sm:$0xff] %v2633_v59  ;;  %v7043_v51 = vld [vmem:[#allocation21_spill] sm:$0xff] }
 0x1c4   : > { %2806 = vst [vmem:[%s6372_s17 + $0xa8] sm:$0xff] %v2608_v28  ;;  %v2612_v23 = vmul.f32 2.0, %v2508_v4  ;;  %v2613_v63 = vmul.f32 2.0, %v2509_v1  ;;  %v2636_v50 = vsub.f32 %v2634_v60, %v7044_v44  ;;  %v2535_v20 = vsel %vm228_vm14, %v7046_v11, %v7045_v10 }
 0x1c5   : > { %v2516_v27 = vsub.f32 %v2377_v37, %v2514_v58  ;;  %v2517_v61 = vsub.f32 %v2378_v57, %v2515_v18  ;;  %v2626_v54 = vmul.f32 2.0, %v2524_v6  ;;  %v2627_v17 = vmul.f32 2.0, %v2525_v36 }
 0x1c6   : > { %2807 = vst [vmem:[%s6372_s17 + $0xb0] sm:$0xff] %v2612_v23  ;;  %v2615_v22 = vsub.f32 %v2613_v63, %v7043_v51  ;;  %v2641_v9 = vmul.f32 2.0, %v2535_v20  ;;  %2814 = vst [vmem:[%s6372_s17 + $0xe8] sm:$0xff] %v2636_v50 }
 0x1c7   : > { %v2619_v41 = vmul.f32 2.0, %v2516_v27  ;;  %v2620_v13 = vmul.f32 2.0, %v2517_v61  ;;  %2811 = vst [vmem:[%s6372_s17 + $0xd0] sm:$0xff] %v2626_v54  ;;  %v2629_v38 = vsub.f32 %v2627_v17, %v7048_v16 }
 0x1c8   : > { %2808 = vst [vmem:[%s6372_s17 + $0xb8] sm:$0xff] %v2615_v22  ;;  %v2643_v21 = vsub.f32 %v2641_v9, %v7050_v48 }
 0x1c9   : > { %2809 = vst [vmem:[%s6372_s17 + $0xc0] sm:$0xff] %v2619_v41  ;;  %v2622_v62 = vsub.f32 %v2620_v13, %v7049_v47  ;;  %2812 = vst [vmem:[%s6372_s17 + $0xd8] sm:$0xff] %v2629_v38 }
 0x1ca   : > { %2816 = vst [vmem:[%s6372_s17 + $0xf8] sm:$0xff] %v2643_v21 }
 0x1cb   : > { %2810 = vst [vmem:[%s6372_s17 + $0xc8] sm:$0xff] %v2622_v62 }
 0x1cc   : > { %2949 = shalt.err (!%p2946_p3)
}
 0x1cd   : > { %s2950_s14 = scalar_lea.hbm %s6511_s29, 4096  ;;  %s2954_s21 = scalar_lea.hbm %s6566_s1, 8192 }
 0x1ce   : > { %p2951_p5 = scmp.ne.s32.totalorder %s6511_s29, %s2950_s14  ;;  %p2955_p9 = scmp.lt.u32.totalorder %s6511_s29, %s6566_s1 }
 0x1cf   : > { %p2956_p0 = scmp.lt.u32.totalorder %s2954_s21, %s2950_s14  ;;  %p2958_p6 = scmp.lt.u32.totalorder %s2950_s14, %s6511_s29 }
 0x1d0   : > { %p2952_p7 = pnand %p2951_p5, %p7051_p11 }
 0x1d1   : > { %p2957_p2 = por %p2956_p0, %p2955_p9 }
 0x1d2   : > { %p2953_p8 = pneg %p2952_p7 }
 0x1d3   : > { %p2959_p12 = por %p2958_p6, %p2957_p2 }
 0x1d5   : > { %p2960_p13 = pnand %p2959_p12, %p2953_p8 }
 0x1d7   : > { %2963 = shalt.err (!%p2960_p13)
}
 0x1d8   : > { %s3010_s26 = smov 128   ;;  %s3011_s30 = smov 256  }
 0x1d9   : > { %s3012_s2 = smov 8  }
 0x1da   : > { %2823 = dma.vmem_to_hbm [thread:$0]  (%p7051_p11), %s6515_s27, 4096, %s6511_s29, %s2648_s3, %s3010_s26, %s3011_s30, %s3012_s2  }
 0x1db PF: > { %s2675_s17 = sand.u32 1, %s2990_s6   ;;  %p7052_p4 = scmp.ne.s32.totalorder %s6708_s19, 0 }
 0x1dc   : > { %p7053_p10 = scmp.ge.s32.totalorder %s3002_s9, 2  ;;  %s2676_s25 = scalar_lea.sflag [#allocation4], %s2675_s17 }
 0x1de   : > { %p2830_p1 = pnand %p7053_p10, %p7052_p4 }
 0x1e0   : > { %2985 = dma.done.wait (!%p2830_p1), %s2676_s25, 4096  }
 0x1e1   : > { %2987 = vsyncadd (!%p2830_p1), %s2676_s25, 4294963200  ;;  %p14_p3 = scmp.ge.s32.totalorder %s3048_s12, 4   ;;  %s7054_s6 = smov %s2994_s7 }
 0x1e2   : > { %s7055_s7 = smov %s2998_s8  ;;  %s7056_s8 = smov %s3060_s15 }
 0x1e3   : > { %s7057_s9 = smov %s3048_s12  ;;  %16 = sbr.rel (!%p14_p3) target bundleno = 5 (0x5), region = 99 }
 0x1ea   :  { %2681 = vsyncpa [#allocation3], 1 }
 0x1eb   :  { %2683 = vsyncpa [#allocation3 + $0x1], 1 }
 0x1ec   :  { %2684 = vsyncpa [#allocation4], 1 }
 0x1ed   :  { %2686 = vsyncpa [#allocation4 + $0x1], 1 }

</bundles_post_ra>
